<compile_context>
chip_gen: v6e
topology: v6e:2x2x1
jax: 0.10.0
libtpu: 0.0.40
codegen_flags: <defaults>
</compile_context>

<pallas_src>
import math

import jax
import jax.numpy as jnp
from jax.experimental import pallas as pl
from jax.experimental.pallas import tpu as pltpu


def _refiner_core_kernel(x_ref, mask_ref,
                         wq_ref, bq_ref,
                         gamma_a_ref, beta_a_ref,      # layer.norm (applied twice/layer)
                         gamma_s_ref, beta_s_ref,      # sublayer.norm
                         w1_ref, b1_ref, w2_ref, b2_ref,
                         x_out_ref, *attn_refs):
    TB, L, D = x_ref.shape
    NL = wq_ref.shape[0]
    H = attn_refs[0].shape[1]
    d_k = D // H
    d_ff = w1_ref.shape[2]
    inv_sqrt_dk = 1.0 / math.sqrt(d_k)
    CH = 512 if (d_ff > 512 and d_ff % 512 == 0) else d_ff   # FFN inner-dim chunk

    x = x_ref[...]                                           # (TB, L, D) f32 residual stream
    mask4 = mask_ref[...].reshape(TB, 1, 1, L) == 0          # hoisted; broadcasts over (TB,H,L,L)

    # ---- head-major relayout helpers (static H loop, f32 slices, single concat) ----------
    def split_heads(a):                                      # (TB, L, D) -> (TB*H, L, d_k)
        parts = [a[:, :, h * d_k:(h + 1) * d_k].reshape(TB, 1, L, d_k) for h in range(H)]
        return jnp.concatenate(parts, axis=1).reshape(TB * H, L, d_k)

    def merge_heads(a):                                      # (TB*H, L, d_k) -> (TB, L, D)
        a4 = a.reshape(TB, H, L, d_k)
        return jnp.concatenate([a4[:, h] for h in range(H)], axis=-1)

    # ---- torch LayerNorm variant: unbiased std, eps added to std; divide on the EUP ------
    def layernorm(v, gamma, beta):
        mean = jnp.mean(v, axis=-1, keepdims=True)
        var = jnp.sum((v - mean) ** 2, axis=-1, keepdims=True) / (D - 1)
        inv = pl.reciprocal(jnp.sqrt(var) + 1e-6, approx=True)
        return gamma * (v - mean) * inv + beta

    for l in range(NL):                                      # static unroll: 3 fused layers
        # ---- Verb_MHA (project_k_v=0): only the query is projected ----------------------
        xf16 = x.reshape(TB * L, D).astype(jnp.bfloat16)
        qp = (jnp.dot(xf16, wq_ref[l], preferred_element_type=jnp.float32)
              + bq_ref[l]).reshape(TB, L, D)

        kv = split_heads(x).astype(jnp.bfloat16)             # (TB*H, L, d_k)  K == V == x
        qh = split_heads(qp).astype(jnp.bfloat16)            # (TB*H, L, d_k)

        s = jnp.einsum("bqd,bkd->bqk", qh, kv,
                       preferred_element_type=jnp.float32) * inv_sqrt_dk
        s = s.reshape(TB, H, L, L)
        s = jnp.where(mask4, -1e9, s)                        # masked_fill(mask==0, -1e9)
        s = s - jnp.max(s, axis=-1, keepdims=True)
        e = jnp.exp(s)
        p = e * pl.reciprocal(jnp.sum(e, axis=-1, keepdims=True), approx=True)
        attn_refs[l][...] = p                                # one slab store per layer

        ctx = jnp.einsum("bqk,bkd->bqd",
                         p.reshape(TB * H, L, L).astype(jnp.bfloat16), kv,
                         preferred_element_type=jnp.float32)
        attn_x = merge_heads(ctx)                            # (TB, L, D) head merge

        # ---- step 2: x = LayerNorm_a(x + attn_out) ---------------------------------------
        x1 = layernorm(x + attn_x, gamma_a_ref[l], beta_a_ref[l])

        # ---- step 3: SublayerConnection: x1 + FFN(LayerNorm_s(x1)), d_ff-chunked ---------
        xn16 = layernorm(x1, gamma_s_ref[l], beta_s_ref[l]).reshape(TB * L, D).astype(jnp.bfloat16)
        ff = jnp.zeros((TB * L, D), jnp.float32)
        for c in range(0, d_ff, CH):                         # static chunk loop over d_ff
            h1 = jnp.maximum(
                jnp.dot(xn16, w1_ref[l, :, c:c + CH], preferred_element_type=jnp.float32)
                + b1_ref[l, :, c:c + CH], 0.0)
            ff = ff + jnp.dot(h1.astype(jnp.bfloat16), w2_ref[l, c:c + CH, :],
                              preferred_element_type=jnp.float32)
        y = x1 + (ff + b2_ref[l]).reshape(TB, L, D)

        # ---- step 4: final LayerNorm_a (same params as step 2) ---------------------------
        x = layernorm(y, gamma_a_ref[l], beta_a_ref[l])

    x_out_ref[...] = x


def _pick_batch_tile(batch, seq_len, max_rows=1024):
    # >=2 grid steps when batch >= 2 so dimension_semantics=("parallel",) can shard across
    # v7x's two TensorCores; also bound per-step rows to keep VMEM blocks in check.
    cap = batch if batch < 2 else batch // 2
    cap = max(1, min(cap, max(1, max_rows // max(seq_len, 1))))
    for tb in range(cap, 0, -1):
        if batch % tb == 0:
            return tb
    return 1


def deit_refiner_core(x, mask, layer_params, n_heads):
    """Mirrors Deit_Refiner_Core.forward(x, mask). x: (B, L, D), mask: (B, L)."""
    B, L, D = x.shape
    assert D % n_heads == 0
    NL = len(layer_params)
    d_ff = layer_params[0]["w1"].shape[1]
    tb = _pick_batch_tile(B, L)

    x = x.astype(jnp.float32)
    mask3 = mask.reshape(B, 1, L).astype(jnp.float32)

    def stack(key, dt):
        return jnp.stack([p[key] for p in layer_params]).astype(dt)

    # Matmul weights travel as bf16 (halves DMA/VMEM); biases & norm params stay f32.
    wq, bq = stack("wq", jnp.bfloat16), stack("bq", jnp.float32)
    gamma_a, beta_a = stack("gamma_a", jnp.float32), stack("beta_a", jnp.float32)
    gamma_s, beta_s = stack("gamma_s", jnp.float32), stack("beta_s", jnp.float32)
    w1, b1 = stack("w1", jnp.bfloat16), stack("b1", jnp.float32)
    w2, b2 = stack("w2", jnp.bfloat16), stack("b2", jnp.float32)

    grid = (B // tb,)

    def rep(shape):
        nd = len(shape)
        return pl.BlockSpec(shape, lambda i, _nd=nd: (0,) * _nd)

    in_specs = [
        pl.BlockSpec((tb, L, D), lambda i: (i, 0, 0)),        # x
        pl.BlockSpec((tb, 1, L), lambda i: (i, 0, 0)),        # mask
        rep((NL, D, D)), rep((NL, 1, D)),                     # Wq, bq (stacked over layers)
        rep((NL, 1, D)), rep((NL, 1, D)),                     # layer.norm gamma/beta
        rep((NL, 1, D)), rep((NL, 1, D)),                     # sublayer.norm gamma/beta
        rep((NL, D, d_ff)), rep((NL, 1, d_ff)),               # W1, b1
        rep((NL, d_ff, D)), rep((NL, 1, D)),                  # W2, b2
    ]
    x_spec = pl.BlockSpec((tb, L, D), lambda i: (i, 0, 0))
    a_spec = pl.BlockSpec((tb, n_heads, L, L), lambda i: (i, 0, 0, 0))
    out_specs = (x_spec,) + (a_spec,) * NL
    out_shapes = ((jax.ShapeDtypeStruct((B, L, D), jnp.float32),)
                  + tuple(jax.ShapeDtypeStruct((B, n_heads, L, L), jnp.float32)
                          for _ in range(NL)))

    outs = pl.pallas_call(
        _refiner_core_kernel,
        out_shape=out_shapes,
        grid=grid,
        in_specs=in_specs,
        out_specs=out_specs,
        compiler_params=pltpu.CompilerParams(
            dimension_semantics=("parallel",),                # batch tiles are independent
            vmem_limit_bytes=48 * 1024 * 1024,                # headroom on v7x's 64 MiB VMEM
        ),
    )(x, mask3, wq, bq, gamma_a, beta_a, gamma_s, beta_s, w1, b1, w2, b2)

    return outs[0], list(outs[1:])


# ----------------------------- pure-JAX f32 reference --------------------------------------
def _layernorm_ref(v, gamma, beta, eps=1e-6):
    mean = v.mean(-1, keepdims=True)
    std = jnp.sqrt(((v - mean) ** 2).sum(-1, keepdims=True) / (v.shape[-1] - 1))
    return gamma * (v - mean) / (std + eps) + beta


def _reference(x, mask, layer_params, n_heads):
    B, L, D = x.shape
    d_k = D // n_heads
    m4 = mask[:, None, None, :]
    attns = []
    for p in layer_params:
        q = x @ p["wq"] + p["bq"]
        qh = q.reshape(B, L, n_heads, d_k).transpose(0, 2, 1, 3)
        kh = x.reshape(B, L, n_heads, d_k).transpose(0, 2, 1, 3)
        vh = kh
        s = jnp.einsum("bhqd,bhkd->bhqk", qh, kh) / math.sqrt(d_k)
        s = jnp.where(m4 == 0, -1e9, s)
        pa = jax.nn.softmax(s, axis=-1)
        attns.append(pa)
        o = jnp.einsum("bhqk,bhkd->bhqd", pa, vh).transpose(0, 2, 1, 3).reshape(B, L, D)
        x1 = _layernorm_ref(x + o, p["gamma_a"], p["beta_a"])
        xn = _layernorm_ref(x1, p["gamma_s"], p["beta_s"])
        ff = jnp.maximum(xn @ p["w1"] + p["b1"], 0.0) @ p["w2"] + p["b2"]
        x = _layernorm_ref(x1 + ff, p["gamma_a"], p["beta_a"])
    return x, attns


if __name__ == "__main__":
    B, L, D, H = 2, 8, 32, 4        # batch, seq, cv_size, cv_num_heads
    D_FF = 2048                     # hard-coded in PositionwiseFeedForward(cv_size, 2048, 0.1)
    N_LAYERS = 3

    keys = iter(jax.random.split(jax.random.PRNGKey(0), 64))

    def nrm(shape, scale=0.05):
        return jax.random.normal(next(keys), shape, jnp.float32) * scale

    layer_params = []
    for _ in range(N_LAYERS):
        layer_params.append({
            "wq": nrm((D, D)), "bq": nrm((1, D)),
            "gamma_a": 1.0 + nrm((1, D), 0.1), "beta_a": nrm((1, D), 0.1),
            "gamma_s": 1.0 + nrm((1, D), 0.1), "beta_s": nrm((1, D), 0.1),
            "w1": nrm((D, D_FF)), "b1": nrm((1, D_FF)),
            "w2": nrm((D_FF, D)), "b2": nrm((1, D)),
        })

    x_in = jax.random.normal(next(keys), (B, L, D), jnp.float32)
    mask = jnp.ones((B, L), jnp.float32).at[1, -3:].set(0.0)   # mask last 3 keys of batch 1

    x_out, attn_list = deit_refiner_core(x_in, mask, layer_params, H)
    jax.block_until_ready((x_out, attn_list))

    x_ref, attn_ref = _reference(x_in, mask, layer_params, H)

    assert x_out.shape == (B, L, D)
    assert len(attn_list) == N_LAYERS and attn_list[0].shape == (B, H, L, L)
    # Tolerances reflect bf16 MXU operands (f32 accumulation) vs. the f32 reference.
    assert jnp.allclose(x_out, x_ref, atol=3e-2, rtol=3e-2), \
        float(jnp.max(jnp.abs(x_out - x_ref)))
    for a, ar in zip(attn_list, attn_ref):
        assert jnp.allclose(a, ar, atol=1e-2, rtol=1e-2), float(jnp.max(jnp.abs(a - ar)))

    print("KERNEL_OK")
</pallas_src>

<mosaic_0001>
module attributes {stable_mosaic.version = 11 : i64} {
  func.func @_refiner_core_kernel(%arg0: i32, %arg1: memref<1x8x32xf32, #tpu.memory_space<vmem>>, %arg2: memref<1x1x8xf32, #tpu.memory_space<vmem>>, %arg3: memref<3x32x32xbf16, #tpu.memory_space<vmem>>, %arg4: memref<3x1x32xf32, #tpu.memory_space<vmem>>, %arg5: memref<3x1x32xf32, #tpu.memory_space<vmem>>, %arg6: memref<3x1x32xf32, #tpu.memory_space<vmem>>, %arg7: memref<3x1x32xf32, #tpu.memory_space<vmem>>, %arg8: memref<3x1x32xf32, #tpu.memory_space<vmem>>, %arg9: memref<3x32x2048xbf16, #tpu.memory_space<vmem>>, %arg10: memref<3x1x2048xf32, #tpu.memory_space<vmem>>, %arg11: memref<3x2048x32xbf16, #tpu.memory_space<vmem>>, %arg12: memref<3x1x32xf32, #tpu.memory_space<vmem>>, %arg13: memref<1x8x32xf32, #tpu.memory_space<vmem>>, %arg14: memref<1x4x8x8xf32, #tpu.memory_space<vmem>>, %arg15: memref<1x4x8x8xf32, #tpu.memory_space<vmem>>, %arg16: memref<1x4x8x8xf32, #tpu.memory_space<vmem>>) attributes {dimension_semantics = [#tpu.dimension_semantics<parallel>], iteration_bounds = array<i64: 2>, scalar_prefetch = 0 : i64, scratch_operands = 0 : i64, tpu.core_type = #tpu.core_type<tc>, window_params = [{transform_indices = @transform_0, window_bounds = array<i64: 1, 8, 32>}, {transform_indices = @transform_1, window_bounds = array<i64: 1, 1, 8>}, {pipeline_mode = #tpu.pipeline_mode<synchronous>, transform_indices = @transform_2, window_bounds = array<i64: 3, 32, 32>}, {pipeline_mode = #tpu.pipeline_mode<synchronous>, transform_indices = @transform_3, window_bounds = array<i64: 3, 1, 32>}, {pipeline_mode = #tpu.pipeline_mode<synchronous>, transform_indices = @transform_4, window_bounds = array<i64: 3, 1, 32>}, {pipeline_mode = #tpu.pipeline_mode<synchronous>, transform_indices = @transform_5, window_bounds = array<i64: 3, 1, 32>}, {pipeline_mode = #tpu.pipeline_mode<synchronous>, transform_indices = @transform_6, window_bounds = array<i64: 3, 1, 32>}, {pipeline_mode = #tpu.pipeline_mode<synchronous>, transform_indices = @transform_7, window_bounds = array<i64: 3, 1, 32>}, {pipeline_mode = #tpu.pipeline_mode<synchronous>, transform_indices = @transform_8, window_bounds = array<i64: 3, 32, 2048>}, {pipeline_mode = #tpu.pipeline_mode<synchronous>, transform_indices = @transform_9, window_bounds = array<i64: 3, 1, 2048>}, {pipeline_mode = #tpu.pipeline_mode<synchronous>, transform_indices = @transform_10, window_bounds = array<i64: 3, 2048, 32>}, {pipeline_mode = #tpu.pipeline_mode<synchronous>, transform_indices = @transform_11, window_bounds = array<i64: 3, 1, 32>}, {transform_indices = @transform_12, window_bounds = array<i64: 1, 8, 32>}, {transform_indices = @transform_13, window_bounds = array<i64: 1, 4, 8, 8>}, {transform_indices = @transform_14, window_bounds = array<i64: 1, 4, 8, 8>}, {transform_indices = @transform_15, window_bounds = array<i64: 1, 4, 8, 8>}]} {
    %c0 = arith.constant 0 : index
    %c0_0 = arith.constant 0 : index
    %c0_1 = arith.constant 0 : index
    %0 = vector.load %arg1[%c0, %c0_0, %c0_1] : memref<1x8x32xf32, #tpu.memory_space<vmem>>, vector<1x8x32xf32>
    %c0_2 = arith.constant 0 : index
    %c0_3 = arith.constant 0 : index
    %c0_4 = arith.constant 0 : index
    %1 = vector.load %arg2[%c0_2, %c0_3, %c0_4] : memref<1x1x8xf32, #tpu.memory_space<vmem>>, vector<1x1x8xf32>
    %2 = vector.shape_cast %1 : vector<1x1x8xf32> to vector<1x1x1x8xf32>
    %cst = arith.constant 0.000000e+00 : f32
    %3 = vector.broadcast %cst : f32 to vector<1x1x1x8xf32>
    %4 = arith.cmpf oeq, %2, %3 : vector<1x1x1x8xf32>
    %5 = vector.shape_cast %0 : vector<1x8x32xf32> to vector<8x32xf32>
    %6 = arith.truncf %5 : vector<8x32xf32> to vector<8x32xbf16>
    %c0_5 = arith.constant 0 : index
    %c0_6 = arith.constant 0 : index
    %c0_7 = arith.constant 0 : index
    %7 = vector.load %arg3[%c0_5, %c0_6, %c0_7] : memref<3x32x32xbf16, #tpu.memory_space<vmem>>, vector<1x32x32xbf16>
    %8 = vector.shape_cast %7 : vector<1x32x32xbf16> to vector<32x32xbf16>
    %cst_8 = arith.constant dense<0.000000e+00> : vector<8x32xf32>
    %9 = tpu.matmul %6, %8, %cst_8 {dimension_numbers = #tpu.dot_dimension_numbers<[1], [0], [0], [1], [0, 0, 1, 1], [], []>} : vector<8x32xbf16>, vector<32x32xbf16>, vector<8x32xf32> -> vector<8x32xf32>
    %c0_9 = arith.constant 0 : index
    %c0_10 = arith.constant 0 : index
    %c0_11 = arith.constant 0 : index
    %10 = vector.load %arg4[%c0_9, %c0_10, %c0_11] : memref<3x1x32xf32, #tpu.memory_space<vmem>>, vector<1x1x32xf32>
    %11 = vector.shape_cast %10 : vector<1x1x32xf32> to vector<1x32xf32>
    %12 = vector.broadcast %11 : vector<1x32xf32> to vector<8x32xf32>
    %13 = arith.addf %9, %12 : vector<8x32xf32>
    %14 = vector.shape_cast %13 : vector<8x32xf32> to vector<1x8x32xf32>
    %15 = vector.extract_strided_slice %0 {offsets = [0, 0, 0], sizes = [1, 8, 8], strides = [1, 1, 1]} : vector<1x8x32xf32> to vector<1x8x8xf32>
    %16 = vector.shape_cast %15 : vector<1x8x8xf32> to vector<1x1x8x8xf32>
    %17 = vector.extract_strided_slice %0 {offsets = [0, 0, 8], sizes = [1, 8, 8], strides = [1, 1, 1]} : vector<1x8x32xf32> to vector<1x8x8xf32>
    %18 = vector.shape_cast %17 : vector<1x8x8xf32> to vector<1x1x8x8xf32>
    %19 = vector.extract_strided_slice %0 {offsets = [0, 0, 16], sizes = [1, 8, 8], strides = [1, 1, 1]} : vector<1x8x32xf32> to vector<1x8x8xf32>
    %20 = vector.shape_cast %19 : vector<1x8x8xf32> to vector<1x1x8x8xf32>
    %21 = vector.extract_strided_slice %0 {offsets = [0, 0, 24], sizes = [1, 8, 8], strides = [1, 1, 1]} : vector<1x8x32xf32> to vector<1x8x8xf32>
    %22 = vector.shape_cast %21 : vector<1x8x8xf32> to vector<1x1x8x8xf32>
    %23 = tpu.concatenate %16, %18, %20, %22 in 1 : vector<1x1x8x8xf32>, vector<1x1x8x8xf32>, vector<1x1x8x8xf32>, vector<1x1x8x8xf32> -> vector<1x4x8x8xf32>
    %24 = vector.shape_cast %23 : vector<1x4x8x8xf32> to vector<4x8x8xf32>
    %25 = arith.truncf %24 : vector<4x8x8xf32> to vector<4x8x8xbf16>
    %26 = vector.extract_strided_slice %14 {offsets = [0, 0, 0], sizes = [1, 8, 8], strides = [1, 1, 1]} : vector<1x8x32xf32> to vector<1x8x8xf32>
    %27 = vector.shape_cast %26 : vector<1x8x8xf32> to vector<1x1x8x8xf32>
    %28 = vector.extract_strided_slice %14 {offsets = [0, 0, 8], sizes = [1, 8, 8], strides = [1, 1, 1]} : vector<1x8x32xf32> to vector<1x8x8xf32>
    %29 = vector.shape_cast %28 : vector<1x8x8xf32> to vector<1x1x8x8xf32>
    %30 = vector.extract_strided_slice %14 {offsets = [0, 0, 16], sizes = [1, 8, 8], strides = [1, 1, 1]} : vector<1x8x32xf32> to vector<1x8x8xf32>
    %31 = vector.shape_cast %30 : vector<1x8x8xf32> to vector<1x1x8x8xf32>
    %32 = vector.extract_strided_slice %14 {offsets = [0, 0, 24], sizes = [1, 8, 8], strides = [1, 1, 1]} : vector<1x8x32xf32> to vector<1x8x8xf32>
    %33 = vector.shape_cast %32 : vector<1x8x8xf32> to vector<1x1x8x8xf32>
    %34 = tpu.concatenate %27, %29, %31, %33 in 1 : vector<1x1x8x8xf32>, vector<1x1x8x8xf32>, vector<1x1x8x8xf32>, vector<1x1x8x8xf32> -> vector<1x4x8x8xf32>
    %35 = vector.shape_cast %34 : vector<1x4x8x8xf32> to vector<4x8x8xf32>
    %36 = arith.truncf %35 : vector<4x8x8xf32> to vector<4x8x8xbf16>
    "tpu.trace_start"() <{level = 10 : i32, message = "bqd,bkd->bqk"}> : () -> ()
    %cst_12 = arith.constant dense<0.000000e+00> : vector<4x8x8xf32>
    %37 = tpu.matmul %36, %25, %cst_12 {dimension_numbers = #tpu.dot_dimension_numbers<[2], [2], [1], [1], [0, 0, 0, 1, 1, 1], [0], [0]>} : vector<4x8x8xbf16>, vector<4x8x8xbf16>, vector<4x8x8xf32> -> vector<4x8x8xf32>
    "tpu.trace_stop"() : () -> ()
    %cst_13 = arith.constant 0.353553385 : f32
    %38 = vector.broadcast %cst_13 : f32 to vector<4x8x8xf32>
    %39 = arith.mulf %37, %38 : vector<4x8x8xf32>
    %40 = vector.shape_cast %39 : vector<4x8x8xf32> to vector<1x4x8x8xf32>
    %cst_14 = arith.constant -1.000000e+09 : f32
    %41 = vector.shape_cast %4 : vector<1x1x1x8xi1> to vector<1x1x1x8xi1>
    %42 = vector.broadcast %41 : vector<1x1x1x8xi1> to vector<1x4x8x8xi1>
    %43 = vector.broadcast %cst_14 : f32 to vector<1x4x8x8xf32>
    %44 = arith.select %42, %43, %40 : vector<1x4x8x8xi1>, vector<1x4x8x8xf32>
    %cst_15 = arith.constant dense<0xFF800000> : vector<1x4x8xf32>
    %45 = vector.multi_reduction <maximumf>, %44, %cst_15 [3] : vector<1x4x8x8xf32> to vector<1x4x8xf32>
    %46 = vector.shape_cast %45 : vector<1x4x8xf32> to vector<1x4x8x1xf32>
    %47 = vector.broadcast %46 : vector<1x4x8x1xf32> to vector<1x4x8x8xf32>
    %48 = arith.subf %44, %47 : vector<1x4x8x8xf32>
    %49 = math.exp %48 : vector<1x4x8x8xf32>
    %cst_16 = arith.constant dense<0.000000e+00> : vector<1x4x8xf32>
    %50 = vector.multi_reduction <add>, %49, %cst_16 [3] : vector<1x4x8x8xf32> to vector<1x4x8xf32>
    %51 = vector.shape_cast %50 : vector<1x4x8xf32> to vector<1x4x8x1xf32>
    %52 = tpu.reciprocal %51 {approx = true} : vector<1x4x8x1xf32> -> vector<1x4x8x1xf32>
    %53 = vector.broadcast %52 : vector<1x4x8x1xf32> to vector<1x4x8x8xf32>
    %54 = arith.mulf %49, %53 : vector<1x4x8x8xf32>
    %c0_17 = arith.constant 0 : index
    %c0_18 = arith.constant 0 : index
    %c0_19 = arith.constant 0 : index
    %c0_20 = arith.constant 0 : index
    %55 = vector.load %arg14[%c0_17, %c0_18, %c0_19, %c0_20] : memref<1x4x8x8xf32, #tpu.memory_space<vmem>>, vector<1x4x8x8xf32>
    tpu.vector_store %arg14[%c0_17, %c0_18, %c0_19, %c0_20], %54 {strides = array<i32>} : memref<1x4x8x8xf32, #tpu.memory_space<vmem>>, vector<1x4x8x8xf32>,
    %56 = vector.shape_cast %54 : vector<1x4x8x8xf32> to vector<4x8x8xf32>
    %57 = arith.truncf %56 : vector<4x8x8xf32> to vector<4x8x8xbf16>
    "tpu.trace_start"() <{level = 10 : i32, message = "bqk,bkd->bqd"}> : () -> ()
    %cst_21 = arith.constant dense<0.000000e+00> : vector<4x8x8xf32>
    %58 = tpu.matmul %57, %25, %cst_21 {dimension_numbers = #tpu.dot_dimension_numbers<[2], [1], [1], [2], [0, 0, 0, 1, 1, 2], [0], [0]>} : vector<4x8x8xbf16>, vector<4x8x8xbf16>, vector<4x8x8xf32> -> vector<4x8x8xf32>
    "tpu.trace_stop"() : () -> ()
    %59 = vector.shape_cast %58 : vector<4x8x8xf32> to vector<1x4x8x8xf32>
    %60 = vector.extract_strided_slice %59 {offsets = [0, 0, 0, 0], sizes = [1, 1, 8, 8], strides = [1, 1, 1, 1]} : vector<1x4x8x8xf32> to vector<1x1x8x8xf32>
    %61 = vector.shape_cast %60 : vector<1x1x8x8xf32> to vector<1x8x8xf32>
    %62 = vector.extract_strided_slice %59 {offsets = [0, 1, 0, 0], sizes = [1, 1, 8, 8], strides = [1, 1, 1, 1]} : vector<1x4x8x8xf32> to vector<1x1x8x8xf32>
    %63 = vector.shape_cast %62 : vector<1x1x8x8xf32> to vector<1x8x8xf32>
    %64 = vector.extract_strided_slice %59 {offsets = [0, 2, 0, 0], sizes = [1, 1, 8, 8], strides = [1, 1, 1, 1]} : vector<1x4x8x8xf32> to vector<1x1x8x8xf32>
    %65 = vector.shape_cast %64 : vector<1x1x8x8xf32> to vector<1x8x8xf32>
    %66 = vector.extract_strided_slice %59 {offsets = [0, 3, 0, 0], sizes = [1, 1, 8, 8], strides = [1, 1, 1, 1]} : vector<1x4x8x8xf32> to vector<1x1x8x8xf32>
    %67 = vector.shape_cast %66 : vector<1x1x8x8xf32> to vector<1x8x8xf32>
    %68 = tpu.concatenate %61, %63, %65, %67 in 2 : vector<1x8x8xf32>, vector<1x8x8xf32>, vector<1x8x8xf32>, vector<1x8x8xf32> -> vector<1x8x32xf32>
    %69 = arith.addf %0, %68 : vector<1x8x32xf32>
    %c0_22 = arith.constant 0 : index
    %c0_23 = arith.constant 0 : index
    %c0_24 = arith.constant 0 : index
    %70 = vector.load %arg5[%c0_22, %c0_23, %c0_24] : memref<3x1x32xf32, #tpu.memory_space<vmem>>, vector<1x1x32xf32>
    %71 = vector.shape_cast %70 : vector<1x1x32xf32> to vector<1x32xf32>
    %c0_25 = arith.constant 0 : index
    %c0_26 = arith.constant 0 : index
    %c0_27 = arith.constant 0 : index
    %72 = vector.load %arg6[%c0_25, %c0_26, %c0_27] : memref<3x1x32xf32, #tpu.memory_space<vmem>>, vector<1x1x32xf32>
    %73 = vector.shape_cast %72 : vector<1x1x32xf32> to vector<1x32xf32>
    %cst_28 = arith.constant dense<0.000000e+00> : vector<1x8xf32>
    %74 = vector.multi_reduction <add>, %69, %cst_28 [2] : vector<1x8x32xf32> to vector<1x8xf32>
    %75 = vector.shape_cast %74 : vector<1x8xf32> to vector<1x8x1xf32>
    %cst_29 = arith.constant 3.200000e+01 : f32
    %76 = vector.broadcast %cst_29 : f32 to vector<1x8x1xf32>
    %77 = arith.divf %75, %76 : vector<1x8x1xf32>
    %78 = vector.broadcast %77 : vector<1x8x1xf32> to vector<1x8x32xf32>
    %79 = arith.subf %69, %78 : vector<1x8x32xf32>
    %80 = arith.mulf %79, %79 : vector<1x8x32xf32>
    %cst_30 = arith.constant dense<0.000000e+00> : vector<1x8xf32>
    %81 = vector.multi_reduction <add>, %80, %cst_30 [2] : vector<1x8x32xf32> to vector<1x8xf32>
    %82 = vector.shape_cast %81 : vector<1x8xf32> to vector<1x8x1xf32>
    %cst_31 = arith.constant 3.100000e+01 : f32
    %83 = vector.broadcast %cst_31 : f32 to vector<1x8x1xf32>
    %84 = arith.divf %82, %83 : vector<1x8x1xf32>
    %85 = math.sqrt %84 : vector<1x8x1xf32>
    %cst_32 = arith.constant 9.99999997E-7 : f32
    %86 = vector.broadcast %cst_32 : f32 to vector<1x8x1xf32>
    %87 = arith.addf %85, %86 : vector<1x8x1xf32>
    %88 = tpu.reciprocal %87 {approx = true} : vector<1x8x1xf32> -> vector<1x8x1xf32>
    %89 = vector.broadcast %77 : vector<1x8x1xf32> to vector<1x8x32xf32>
    %90 = arith.subf %69, %89 : vector<1x8x32xf32>
    %91 = vector.shape_cast %71 : vector<1x32xf32> to vector<1x1x32xf32>
    %92 = vector.broadcast %91 : vector<1x1x32xf32> to vector<1x8x32xf32>
    %93 = arith.mulf %92, %90 : vector<1x8x32xf32>
    %94 = vector.broadcast %88 : vector<1x8x1xf32> to vector<1x8x32xf32>
    %95 = arith.mulf %93, %94 : vector<1x8x32xf32>
    %96 = vector.shape_cast %73 : vector<1x32xf32> to vector<1x1x32xf32>
    %97 = vector.broadcast %96 : vector<1x1x32xf32> to vector<1x8x32xf32>
    %98 = arith.addf %95, %97 : vector<1x8x32xf32>
    %c0_33 = arith.constant 0 : index
    %c0_34 = arith.constant 0 : index
    %c0_35 = arith.constant 0 : index
    %99 = vector.load %arg7[%c0_33, %c0_34, %c0_35] : memref<3x1x32xf32, #tpu.memory_space<vmem>>, vector<1x1x32xf32>
    %100 = vector.shape_cast %99 : vector<1x1x32xf32> to vector<1x32xf32>
    %c0_36 = arith.constant 0 : index
    %c0_37 = arith.constant 0 : index
    %c0_38 = arith.constant 0 : index
    %101 = vector.load %arg8[%c0_36, %c0_37, %c0_38] : memref<3x1x32xf32, #tpu.memory_space<vmem>>, vector<1x1x32xf32>
    %102 = vector.shape_cast %101 : vector<1x1x32xf32> to vector<1x32xf32>
    %cst_39 = arith.constant dense<0.000000e+00> : vector<1x8xf32>
    %103 = vector.multi_reduction <add>, %98, %cst_39 [2] : vector<1x8x32xf32> to vector<1x8xf32>
    %104 = vector.shape_cast %103 : vector<1x8xf32> to vector<1x8x1xf32>
    %cst_40 = arith.constant 3.200000e+01 : f32
    %105 = vector.broadcast %cst_40 : f32 to vector<1x8x1xf32>
    %106 = arith.divf %104, %105 : vector<1x8x1xf32>
    %107 = vector.broadcast %106 : vector<1x8x1xf32> to vector<1x8x32xf32>
    %108 = arith.subf %98, %107 : vector<1x8x32xf32>
    %109 = arith.mulf %108, %108 : vector<1x8x32xf32>
    %cst_41 = arith.constant dense<0.000000e+00> : vector<1x8xf32>
    %110 = vector.multi_reduction <add>, %109, %cst_41 [2] : vector<1x8x32xf32> to vector<1x8xf32>
    %111 = vector.shape_cast %110 : vector<1x8xf32> to vector<1x8x1xf32>
    %cst_42 = arith.constant 3.100000e+01 : f32
    %112 = vector.broadcast %cst_42 : f32 to vector<1x8x1xf32>
    %113 = arith.divf %111, %112 : vector<1x8x1xf32>
    %114 = math.sqrt %113 : vector<1x8x1xf32>
    %cst_43 = arith.constant 9.99999997E-7 : f32
    %115 = vector.broadcast %cst_43 : f32 to vector<1x8x1xf32>
    %116 = arith.addf %114, %115 : vector<1x8x1xf32>
    %117 = tpu.reciprocal %116 {approx = true} : vector<1x8x1xf32> -> vector<1x8x1xf32>
    %118 = vector.broadcast %106 : vector<1x8x1xf32> to vector<1x8x32xf32>
    %119 = arith.subf %98, %118 : vector<1x8x32xf32>
    %120 = vector.shape_cast %100 : vector<1x32xf32> to vector<1x1x32xf32>
    %121 = vector.broadcast %120 : vector<1x1x32xf32> to vector<1x8x32xf32>
    %122 = arith.mulf %121, %119 : vector<1x8x32xf32>
    %123 = vector.broadcast %117 : vector<1x8x1xf32> to vector<1x8x32xf32>
    %124 = arith.mulf %122, %123 : vector<1x8x32xf32>
    %125 = vector.shape_cast %102 : vector<1x32xf32> to vector<1x1x32xf32>
    %126 = vector.broadcast %125 : vector<1x1x32xf32> to vector<1x8x32xf32>
    %127 = arith.addf %124, %126 : vector<1x8x32xf32>
    %128 = vector.shape_cast %127 : vector<1x8x32xf32> to vector<8x32xf32>
    %129 = arith.truncf %128 : vector<8x32xf32> to vector<8x32xbf16>
    %cst_44 = arith.constant 0.000000e+00 : f32
    %130 = vector.broadcast %cst_44 : f32 to vector<8x32xf32>
    %c0_45 = arith.constant 0 : index
    %c0_46 = arith.constant 0 : index
    %c0_47 = arith.constant 0 : index
    %131 = vector.load %arg9[%c0_45, %c0_46, %c0_47] : memref<3x32x2048xbf16, #tpu.memory_space<vmem>>, vector<1x32x512xbf16>
    %132 = vector.shape_cast %131 : vector<1x32x512xbf16> to vector<32x512xbf16>
    %cst_48 = arith.constant dense<0.000000e+00> : vector<8x512xf32>
    %133 = tpu.matmul %129, %132, %cst_48 {dimension_numbers = #tpu.dot_dimension_numbers<[1], [0], [0], [1], [0, 0, 1, 1], [], []>} : vector<8x32xbf16>, vector<32x512xbf16>, vector<8x512xf32> -> vector<8x512xf32>
    %c0_49 = arith.constant 0 : index
    %c0_50 = arith.constant 0 : index
    %c0_51 = arith.constant 0 : index
    %134 = vector.load %arg10[%c0_49, %c0_50, %c0_51] : memref<3x1x2048xf32, #tpu.memory_space<vmem>>, vector<1x1x512xf32>
    %135 = vector.shape_cast %134 : vector<1x1x512xf32> to vector<1x512xf32>
    %136 = vector.broadcast %135 : vector<1x512xf32> to vector<8x512xf32>
    %137 = arith.addf %133, %136 : vector<8x512xf32>
    %cst_52 = arith.constant 0.000000e+00 : f32
    %138 = vector.broadcast %cst_52 : f32 to vector<8x512xf32>
    %139 = arith.maximumf %137, %138 : vector<8x512xf32>
    %140 = arith.truncf %139 : vector<8x512xf32> to vector<8x512xbf16>
    %c0_53 = arith.constant 0 : index
    %c0_54 = arith.constant 0 : index
    %c0_55 = arith.constant 0 : index
    %141 = vector.load %arg11[%c0_53, %c0_54, %c0_55] : memref<3x2048x32xbf16, #tpu.memory_space<vmem>>, vector<1x512x32xbf16>
    %142 = vector.shape_cast %141 : vector<1x512x32xbf16> to vector<512x32xbf16>
    %cst_56 = arith.constant dense<0.000000e+00> : vector<8x32xf32>
    %143 = tpu.matmul %140, %142, %cst_56 {dimension_numbers = #tpu.dot_dimension_numbers<[1], [0], [0], [1], [0, 0, 1, 1], [], []>} : vector<8x512xbf16>, vector<512x32xbf16>, vector<8x32xf32> -> vector<8x32xf32>
    %144 = arith.addf %130, %143 : vector<8x32xf32>
    %c0_57 = arith.constant 0 : index
    %c0_58 = arith.constant 0 : index
    %c512 = arith.constant 512 : index
    %145 = vector.load %arg9[%c0_57, %c0_58, %c512] : memref<3x32x2048xbf16, #tpu.memory_space<vmem>>, vector<1x32x512xbf16>
    %146 = vector.shape_cast %145 : vector<1x32x512xbf16> to vector<32x512xbf16>
    %cst_59 = arith.constant dense<0.000000e+00> : vector<8x512xf32>
    %147 = tpu.matmul %129, %146, %cst_59 {dimension_numbers = #tpu.dot_dimension_numbers<[1], [0], [0], [1], [0, 0, 1, 1], [], []>} : vector<8x32xbf16>, vector<32x512xbf16>, vector<8x512xf32> -> vector<8x512xf32>
    %c0_60 = arith.constant 0 : index
    %c0_61 = arith.constant 0 : index
    %c512_62 = arith.constant 512 : index
    %148 = vector.load %arg10[%c0_60, %c0_61, %c512_62] : memref<3x1x2048xf32, #tpu.memory_space<vmem>>, vector<1x1x512xf32>
    %149 = vector.shape_cast %148 : vector<1x1x512xf32> to vector<1x512xf32>
    %150 = vector.broadcast %149 : vector<1x512xf32> to vector<8x512xf32>
    %151 = arith.addf %147, %150 : vector<8x512xf32>
    %cst_63 = arith.constant 0.000000e+00 : f32
    %152 = vector.broadcast %cst_63 : f32 to vector<8x512xf32>
    %153 = arith.maximumf %151, %152 : vector<8x512xf32>
    %154 = arith.truncf %153 : vector<8x512xf32> to vector<8x512xbf16>
    %c0_64 = arith.constant 0 : index
    %c512_65 = arith.constant 512 : index
    %c0_66 = arith.constant 0 : index
    %155 = vector.load %arg11[%c0_64, %c512_65, %c0_66] : memref<3x2048x32xbf16, #tpu.memory_space<vmem>>, vector<1x512x32xbf16>
    %156 = vector.shape_cast %155 : vector<1x512x32xbf16> to vector<512x32xbf16>
    %cst_67 = arith.constant dense<0.000000e+00> : vector<8x32xf32>
    %157 = tpu.matmul %154, %156, %cst_67 {dimension_numbers = #tpu.dot_dimension_numbers<[1], [0], [0], [1], [0, 0, 1, 1], [], []>} : vector<8x512xbf16>, vector<512x32xbf16>, vector<8x32xf32> -> vector<8x32xf32>
    %158 = arith.addf %144, %157 : vector<8x32xf32>
    %c0_68 = arith.constant 0 : index
    %c0_69 = arith.constant 0 : index
    %c1024 = arith.constant 1024 : index
    %159 = vector.load %arg9[%c0_68, %c0_69, %c1024] : memref<3x32x2048xbf16, #tpu.memory_space<vmem>>, vector<1x32x512xbf16>
    %160 = vector.shape_cast %159 : vector<1x32x512xbf16> to vector<32x512xbf16>
    %cst_70 = arith.constant dense<0.000000e+00> : vector<8x512xf32>
    %161 = tpu.matmul %129, %160, %cst_70 {dimension_numbers = #tpu.dot_dimension_numbers<[1], [0], [0], [1], [0, 0, 1, 1], [], []>} : vector<8x32xbf16>, vector<32x512xbf16>, vector<8x512xf32> -> vector<8x512xf32>
    %c0_71 = arith.constant 0 : index
    %c0_72 = arith.constant 0 : index
    %c1024_73 = arith.constant 1024 : index
    %162 = vector.load %arg10[%c0_71, %c0_72, %c1024_73] : memref<3x1x2048xf32, #tpu.memory_space<vmem>>, vector<1x1x512xf32>
    %163 = vector.shape_cast %162 : vector<1x1x512xf32> to vector<1x512xf32>
    %164 = vector.broadcast %163 : vector<1x512xf32> to vector<8x512xf32>
    %165 = arith.addf %161, %164 : vector<8x512xf32>
    %cst_74 = arith.constant 0.000000e+00 : f32
    %166 = vector.broadcast %cst_74 : f32 to vector<8x512xf32>
    %167 = arith.maximumf %165, %166 : vector<8x512xf32>
    %168 = arith.truncf %167 : vector<8x512xf32> to vector<8x512xbf16>
    %c0_75 = arith.constant 0 : index
    %c1024_76 = arith.constant 1024 : index
    %c0_77 = arith.constant 0 : index
    %169 = vector.load %arg11[%c0_75, %c1024_76, %c0_77] : memref<3x2048x32xbf16, #tpu.memory_space<vmem>>, vector<1x512x32xbf16>
    %170 = vector.shape_cast %169 : vector<1x512x32xbf16> to vector<512x32xbf16>
    %cst_78 = arith.constant dense<0.000000e+00> : vector<8x32xf32>
    %171 = tpu.matmul %168, %170, %cst_78 {dimension_numbers = #tpu.dot_dimension_numbers<[1], [0], [0], [1], [0, 0, 1, 1], [], []>} : vector<8x512xbf16>, vector<512x32xbf16>, vector<8x32xf32> -> vector<8x32xf32>
    %172 = arith.addf %158, %171 : vector<8x32xf32>
    %c0_79 = arith.constant 0 : index
    %c0_80 = arith.constant 0 : index
    %c1536 = arith.constant 1536 : index
    %173 = vector.load %arg9[%c0_79, %c0_80, %c1536] : memref<3x32x2048xbf16, #tpu.memory_space<vmem>>, vector<1x32x512xbf16>
    %174 = vector.shape_cast %173 : vector<1x32x512xbf16> to vector<32x512xbf16>
    %cst_81 = arith.constant dense<0.000000e+00> : vector<8x512xf32>
    %175 = tpu.matmul %129, %174, %cst_81 {dimension_numbers = #tpu.dot_dimension_numbers<[1], [0], [0], [1], [0, 0, 1, 1], [], []>} : vector<8x32xbf16>, vector<32x512xbf16>, vector<8x512xf32> -> vector<8x512xf32>
    %c0_82 = arith.constant 0 : index
    %c0_83 = arith.constant 0 : index
    %c1536_84 = arith.constant 1536 : index
    %176 = vector.load %arg10[%c0_82, %c0_83, %c1536_84] : memref<3x1x2048xf32, #tpu.memory_space<vmem>>, vector<1x1x512xf32>
    %177 = vector.shape_cast %176 : vector<1x1x512xf32> to vector<1x512xf32>
    %178 = vector.broadcast %177 : vector<1x512xf32> to vector<8x512xf32>
    %179 = arith.addf %175, %178 : vector<8x512xf32>
    %cst_85 = arith.constant 0.000000e+00 : f32
    %180 = vector.broadcast %cst_85 : f32 to vector<8x512xf32>
    %181 = arith.maximumf %179, %180 : vector<8x512xf32>
    %182 = arith.truncf %181 : vector<8x512xf32> to vector<8x512xbf16>
    %c0_86 = arith.constant 0 : index
    %c1536_87 = arith.constant 1536 : index
    %c0_88 = arith.constant 0 : index
    %183 = vector.load %arg11[%c0_86, %c1536_87, %c0_88] : memref<3x2048x32xbf16, #tpu.memory_space<vmem>>, vector<1x512x32xbf16>
    %184 = vector.shape_cast %183 : vector<1x512x32xbf16> to vector<512x32xbf16>
    %cst_89 = arith.constant dense<0.000000e+00> : vector<8x32xf32>
    %185 = tpu.matmul %182, %184, %cst_89 {dimension_numbers = #tpu.dot_dimension_numbers<[1], [0], [0], [1], [0, 0, 1, 1], [], []>} : vector<8x512xbf16>, vector<512x32xbf16>, vector<8x32xf32> -> vector<8x32xf32>
    %186 = arith.addf %172, %185 : vector<8x32xf32>
    %c0_90 = arith.constant 0 : index
    %c0_91 = arith.constant 0 : index
    %c0_92 = arith.constant 0 : index
    %187 = vector.load %arg12[%c0_90, %c0_91, %c0_92] : memref<3x1x32xf32, #tpu.memory_space<vmem>>, vector<1x1x32xf32>
    %188 = vector.shape_cast %187 : vector<1x1x32xf32> to vector<1x32xf32>
    %189 = vector.broadcast %188 : vector<1x32xf32> to vector<8x32xf32>
    %190 = arith.addf %186, %189 : vector<8x32xf32>
    %191 = vector.shape_cast %190 : vector<8x32xf32> to vector<1x8x32xf32>
    %192 = arith.addf %98, %191 : vector<1x8x32xf32>
    %c0_93 = arith.constant 0 : index
    %c0_94 = arith.constant 0 : index
    %c0_95 = arith.constant 0 : index
    %193 = vector.load %arg5[%c0_93, %c0_94, %c0_95] : memref<3x1x32xf32, #tpu.memory_space<vmem>>, vector<1x1x32xf32>
    %194 = vector.shape_cast %193 : vector<1x1x32xf32> to vector<1x32xf32>
    %c0_96 = arith.constant 0 : index
    %c0_97 = arith.constant 0 : index
    %c0_98 = arith.constant 0 : index
    %195 = vector.load %arg6[%c0_96, %c0_97, %c0_98] : memref<3x1x32xf32, #tpu.memory_space<vmem>>, vector<1x1x32xf32>
    %196 = vector.shape_cast %195 : vector<1x1x32xf32> to vector<1x32xf32>
    %cst_99 = arith.constant dense<0.000000e+00> : vector<1x8xf32>
    %197 = vector.multi_reduction <add>, %192, %cst_99 [2] : vector<1x8x32xf32> to vector<1x8xf32>
    %198 = vector.shape_cast %197 : vector<1x8xf32> to vector<1x8x1xf32>
    %cst_100 = arith.constant 3.200000e+01 : f32
    %199 = vector.broadcast %cst_100 : f32 to vector<1x8x1xf32>
    %200 = arith.divf %198, %199 : vector<1x8x1xf32>
    %201 = vector.broadcast %200 : vector<1x8x1xf32> to vector<1x8x32xf32>
    %202 = arith.subf %192, %201 : vector<1x8x32xf32>
    %203 = arith.mulf %202, %202 : vector<1x8x32xf32>
    %cst_101 = arith.constant dense<0.000000e+00> : vector<1x8xf32>
    %204 = vector.multi_reduction <add>, %203, %cst_101 [2] : vector<1x8x32xf32> to vector<1x8xf32>
    %205 = vector.shape_cast %204 : vector<1x8xf32> to vector<1x8x1xf32>
    %cst_102 = arith.constant 3.100000e+01 : f32
    %206 = vector.broadcast %cst_102 : f32 to vector<1x8x1xf32>
    %207 = arith.divf %205, %206 : vector<1x8x1xf32>
    %208 = math.sqrt %207 : vector<1x8x1xf32>
    %cst_103 = arith.constant 9.99999997E-7 : f32
    %209 = vector.broadcast %cst_103 : f32 to vector<1x8x1xf32>
    %210 = arith.addf %208, %209 : vector<1x8x1xf32>
    %211 = tpu.reciprocal %210 {approx = true} : vector<1x8x1xf32> -> vector<1x8x1xf32>
    %212 = vector.broadcast %200 : vector<1x8x1xf32> to vector<1x8x32xf32>
    %213 = arith.subf %192, %212 : vector<1x8x32xf32>
    %214 = vector.shape_cast %194 : vector<1x32xf32> to vector<1x1x32xf32>
    %215 = vector.broadcast %214 : vector<1x1x32xf32> to vector<1x8x32xf32>
    %216 = arith.mulf %215, %213 : vector<1x8x32xf32>
    %217 = vector.broadcast %211 : vector<1x8x1xf32> to vector<1x8x32xf32>
    %218 = arith.mulf %216, %217 : vector<1x8x32xf32>
    %219 = vector.shape_cast %196 : vector<1x32xf32> to vector<1x1x32xf32>
    %220 = vector.broadcast %219 : vector<1x1x32xf32> to vector<1x8x32xf32>
    %221 = arith.addf %218, %220 : vector<1x8x32xf32>
    %222 = vector.shape_cast %221 : vector<1x8x32xf32> to vector<8x32xf32>
    %223 = arith.truncf %222 : vector<8x32xf32> to vector<8x32xbf16>
    %c1 = arith.constant 1 : index
    %c0_104 = arith.constant 0 : index
    %c0_105 = arith.constant 0 : index
    %224 = vector.load %arg3[%c1, %c0_104, %c0_105] : memref<3x32x32xbf16, #tpu.memory_space<vmem>>, vector<1x32x32xbf16>
    %225 = vector.shape_cast %224 : vector<1x32x32xbf16> to vector<32x32xbf16>
    %cst_106 = arith.constant dense<0.000000e+00> : vector<8x32xf32>
    %226 = tpu.matmul %223, %225, %cst_106 {dimension_numbers = #tpu.dot_dimension_numbers<[1], [0], [0], [1], [0, 0, 1, 1], [], []>} : vector<8x32xbf16>, vector<32x32xbf16>, vector<8x32xf32> -> vector<8x32xf32>
    %c1_107 = arith.constant 1 : index
    %c0_108 = arith.constant 0 : index
    %c0_109 = arith.constant 0 : index
    %227 = vector.load %arg4[%c1_107, %c0_108, %c0_109] : memref<3x1x32xf32, #tpu.memory_space<vmem>>, vector<1x1x32xf32>
    %228 = vector.shape_cast %227 : vector<1x1x32xf32> to vector<1x32xf32>
    %229 = vector.broadcast %228 : vector<1x32xf32> to vector<8x32xf32>
    %230 = arith.addf %226, %229 : vector<8x32xf32>
    %231 = vector.shape_cast %230 : vector<8x32xf32> to vector<1x8x32xf32>
    %232 = vector.extract_strided_slice %221 {offsets = [0, 0, 0], sizes = [1, 8, 8], strides = [1, 1, 1]} : vector<1x8x32xf32> to vector<1x8x8xf32>
    %233 = vector.shape_cast %232 : vector<1x8x8xf32> to vector<1x1x8x8xf32>
    %234 = vector.extract_strided_slice %221 {offsets = [0, 0, 8], sizes = [1, 8, 8], strides = [1, 1, 1]} : vector<1x8x32xf32> to vector<1x8x8xf32>
    %235 = vector.shape_cast %234 : vector<1x8x8xf32> to vector<1x1x8x8xf32>
    %236 = vector.extract_strided_slice %221 {offsets = [0, 0, 16], sizes = [1, 8, 8], strides = [1, 1, 1]} : vector<1x8x32xf32> to vector<1x8x8xf32>
    %237 = vector.shape_cast %236 : vector<1x8x8xf32> to vector<1x1x8x8xf32>
    %238 = vector.extract_strided_slice %221 {offsets = [0, 0, 24], sizes = [1, 8, 8], strides = [1, 1, 1]} : vector<1x8x32xf32> to vector<1x8x8xf32>
    %239 = vector.shape_cast %238 : vector<1x8x8xf32> to vector<1x1x8x8xf32>
    %240 = tpu.concatenate %233, %235, %237, %239 in 1 : vector<1x1x8x8xf32>, vector<1x1x8x8xf32>, vector<1x1x8x8xf32>, vector<1x1x8x8xf32> -> vector<1x4x8x8xf32>
    %241 = vector.shape_cast %240 : vector<1x4x8x8xf32> to vector<4x8x8xf32>
    %242 = arith.truncf %241 : vector<4x8x8xf32> to vector<4x8x8xbf16>
    %243 = vector.extract_strided_slice %231 {offsets = [0, 0, 0], sizes = [1, 8, 8], strides = [1, 1, 1]} : vector<1x8x32xf32> to vector<1x8x8xf32>
    %244 = vector.shape_cast %243 : vector<1x8x8xf32> to vector<1x1x8x8xf32>
    %245 = vector.extract_strided_slice %231 {offsets = [0, 0, 8], sizes = [1, 8, 8], strides = [1, 1, 1]} : vector<1x8x32xf32> to vector<1x8x8xf32>
    %246 = vector.shape_cast %245 : vector<1x8x8xf32> to vector<1x1x8x8xf32>
    %247 = vector.extract_strided_slice %231 {offsets = [0, 0, 16], sizes = [1, 8, 8], strides = [1, 1, 1]} : vector<1x8x32xf32> to vector<1x8x8xf32>
    %248 = vector.shape_cast %247 : vector<1x8x8xf32> to vector<1x1x8x8xf32>
    %249 = vector.extract_strided_slice %231 {offsets = [0, 0, 24], sizes = [1, 8, 8], strides = [1, 1, 1]} : vector<1x8x32xf32> to vector<1x8x8xf32>
    %250 = vector.shape_cast %249 : vector<1x8x8xf32> to vector<1x1x8x8xf32>
    %251 = tpu.concatenate %244, %246, %248, %250 in 1 : vector<1x1x8x8xf32>, vector<1x1x8x8xf32>, vector<1x1x8x8xf32>, vector<1x1x8x8xf32> -> vector<1x4x8x8xf32>
    %252 = vector.shape_cast %251 : vector<1x4x8x8xf32> to vector<4x8x8xf32>
    %253 = arith.truncf %252 : vector<4x8x8xf32> to vector<4x8x8xbf16>
    "tpu.trace_start"() <{level = 10 : i32, message = "bqd,bkd->bqk"}> : () -> ()
    %cst_110 = arith.constant dense<0.000000e+00> : vector<4x8x8xf32>
    %254 = tpu.matmul %253, %242, %cst_110 {dimension_numbers = #tpu.dot_dimension_numbers<[2], [2], [1], [1], [0, 0, 0, 1, 1, 1], [0], [0]>} : vector<4x8x8xbf16>, vector<4x8x8xbf16>, vector<4x8x8xf32> -> vector<4x8x8xf32>
    "tpu.trace_stop"() : () -> ()
    %cst_111 = arith.constant 0.353553385 : f32
    %255 = vector.broadcast %cst_111 : f32 to vector<4x8x8xf32>
    %256 = arith.mulf %254, %255 : vector<4x8x8xf32>
    %257 = vector.shape_cast %256 : vector<4x8x8xf32> to vector<1x4x8x8xf32>
    %cst_112 = arith.constant -1.000000e+09 : f32
    %258 = vector.shape_cast %4 : vector<1x1x1x8xi1> to vector<1x1x1x8xi1>
    %259 = vector.broadcast %258 : vector<1x1x1x8xi1> to vector<1x4x8x8xi1>
    %260 = vector.broadcast %cst_112 : f32 to vector<1x4x8x8xf32>
    %261 = arith.select %259, %260, %257 : vector<1x4x8x8xi1>, vector<1x4x8x8xf32>
    %cst_113 = arith.constant dense<0xFF800000> : vector<1x4x8xf32>
    %262 = vector.multi_reduction <maximumf>, %261, %cst_113 [3] : vector<1x4x8x8xf32> to vector<1x4x8xf32>
    %263 = vector.shape_cast %262 : vector<1x4x8xf32> to vector<1x4x8x1xf32>
    %264 = vector.broadcast %263 : vector<1x4x8x1xf32> to vector<1x4x8x8xf32>
    %265 = arith.subf %261, %264 : vector<1x4x8x8xf32>
    %266 = math.exp %265 : vector<1x4x8x8xf32>
    %cst_114 = arith.constant dense<0.000000e+00> : vector<1x4x8xf32>
    %267 = vector.multi_reduction <add>, %266, %cst_114 [3] : vector<1x4x8x8xf32> to vector<1x4x8xf32>
    %268 = vector.shape_cast %267 : vector<1x4x8xf32> to vector<1x4x8x1xf32>
    %269 = tpu.reciprocal %268 {approx = true} : vector<1x4x8x1xf32> -> vector<1x4x8x1xf32>
    %270 = vector.broadcast %269 : vector<1x4x8x1xf32> to vector<1x4x8x8xf32>
    %271 = arith.mulf %266, %270 : vector<1x4x8x8xf32>
    %c0_115 = arith.constant 0 : index
    %c0_116 = arith.constant 0 : index
    %c0_117 = arith.constant 0 : index
    %c0_118 = arith.constant 0 : index
    %272 = vector.load %arg15[%c0_115, %c0_116, %c0_117, %c0_118] : memref<1x4x8x8xf32, #tpu.memory_space<vmem>>, vector<1x4x8x8xf32>
    tpu.vector_store %arg15[%c0_115, %c0_116, %c0_117, %c0_118], %271 {strides = array<i32>} : memref<1x4x8x8xf32, #tpu.memory_space<vmem>>, vector<1x4x8x8xf32>,
    %273 = vector.shape_cast %271 : vector<1x4x8x8xf32> to vector<4x8x8xf32>
    %274 = arith.truncf %273 : vector<4x8x8xf32> to vector<4x8x8xbf16>
    "tpu.trace_start"() <{level = 10 : i32, message = "bqk,bkd->bqd"}> : () -> ()
    %cst_119 = arith.constant dense<0.000000e+00> : vector<4x8x8xf32>
    %275 = tpu.matmul %274, %242, %cst_119 {dimension_numbers = #tpu.dot_dimension_numbers<[2], [1], [1], [2], [0, 0, 0, 1, 1, 2], [0], [0]>} : vector<4x8x8xbf16>, vector<4x8x8xbf16>, vector<4x8x8xf32> -> vector<4x8x8xf32>
    "tpu.trace_stop"() : () -> ()
    %276 = vector.shape_cast %275 : vector<4x8x8xf32> to vector<1x4x8x8xf32>
    %277 = vector.extract_strided_slice %276 {offsets = [0, 0, 0, 0], sizes = [1, 1, 8, 8], strides = [1, 1, 1, 1]} : vector<1x4x8x8xf32> to vector<1x1x8x8xf32>
    %278 = vector.shape_cast %277 : vector<1x1x8x8xf32> to vector<1x8x8xf32>
    %279 = vector.extract_strided_slice %276 {offsets = [0, 1, 0, 0], sizes = [1, 1, 8, 8], strides = [1, 1, 1, 1]} : vector<1x4x8x8xf32> to vector<1x1x8x8xf32>
    %280 = vector.shape_cast %279 : vector<1x1x8x8xf32> to vector<1x8x8xf32>
    %281 = vector.extract_strided_slice %276 {offsets = [0, 2, 0, 0], sizes = [1, 1, 8, 8], strides = [1, 1, 1, 1]} : vector<1x4x8x8xf32> to vector<1x1x8x8xf32>
    %282 = vector.shape_cast %281 : vector<1x1x8x8xf32> to vector<1x8x8xf32>
    %283 = vector.extract_strided_slice %276 {offsets = [0, 3, 0, 0], sizes = [1, 1, 8, 8], strides = [1, 1, 1, 1]} : vector<1x4x8x8xf32> to vector<1x1x8x8xf32>
    %284 = vector.shape_cast %283 : vector<1x1x8x8xf32> to vector<1x8x8xf32>
    %285 = tpu.concatenate %278, %280, %282, %284 in 2 : vector<1x8x8xf32>, vector<1x8x8xf32>, vector<1x8x8xf32>, vector<1x8x8xf32> -> vector<1x8x32xf32>
    %286 = arith.addf %221, %285 : vector<1x8x32xf32>
    %c1_120 = arith.constant 1 : index
    %c0_121 = arith.constant 0 : index
    %c0_122 = arith.constant 0 : index
    %287 = vector.load %arg5[%c1_120, %c0_121, %c0_122] : memref<3x1x32xf32, #tpu.memory_space<vmem>>, vector<1x1x32xf32>
    %288 = vector.shape_cast %287 : vector<1x1x32xf32> to vector<1x32xf32>
    %c1_123 = arith.constant 1 : index
    %c0_124 = arith.constant 0 : index
    %c0_125 = arith.constant 0 : index
    %289 = vector.load %arg6[%c1_123, %c0_124, %c0_125] : memref<3x1x32xf32, #tpu.memory_space<vmem>>, vector<1x1x32xf32>
    %290 = vector.shape_cast %289 : vector<1x1x32xf32> to vector<1x32xf32>
    %cst_126 = arith.constant dense<0.000000e+00> : vector<1x8xf32>
    %291 = vector.multi_reduction <add>, %286, %cst_126 [2] : vector<1x8x32xf32> to vector<1x8xf32>
    %292 = vector.shape_cast %291 : vector<1x8xf32> to vector<1x8x1xf32>
    %cst_127 = arith.constant 3.200000e+01 : f32
    %293 = vector.broadcast %cst_127 : f32 to vector<1x8x1xf32>
    %294 = arith.divf %292, %293 : vector<1x8x1xf32>
    %295 = vector.broadcast %294 : vector<1x8x1xf32> to vector<1x8x32xf32>
    %296 = arith.subf %286, %295 : vector<1x8x32xf32>
    %297 = arith.mulf %296, %296 : vector<1x8x32xf32>
    %cst_128 = arith.constant dense<0.000000e+00> : vector<1x8xf32>
    %298 = vector.multi_reduction <add>, %297, %cst_128 [2] : vector<1x8x32xf32> to vector<1x8xf32>
    %299 = vector.shape_cast %298 : vector<1x8xf32> to vector<1x8x1xf32>
    %cst_129 = arith.constant 3.100000e+01 : f32
    %300 = vector.broadcast %cst_129 : f32 to vector<1x8x1xf32>
    %301 = arith.divf %299, %300 : vector<1x8x1xf32>
    %302 = math.sqrt %301 : vector<1x8x1xf32>
    %cst_130 = arith.constant 9.99999997E-7 : f32
    %303 = vector.broadcast %cst_130 : f32 to vector<1x8x1xf32>
    %304 = arith.addf %302, %303 : vector<1x8x1xf32>
    %305 = tpu.reciprocal %304 {approx = true} : vector<1x8x1xf32> -> vector<1x8x1xf32>
    %306 = vector.broadcast %294 : vector<1x8x1xf32> to vector<1x8x32xf32>
    %307 = arith.subf %286, %306 : vector<1x8x32xf32>
    %308 = vector.shape_cast %288 : vector<1x32xf32> to vector<1x1x32xf32>
    %309 = vector.broadcast %308 : vector<1x1x32xf32> to vector<1x8x32xf32>
    %310 = arith.mulf %309, %307 : vector<1x8x32xf32>
    %311 = vector.broadcast %305 : vector<1x8x1xf32> to vector<1x8x32xf32>
    %312 = arith.mulf %310, %311 : vector<1x8x32xf32>
    %313 = vector.shape_cast %290 : vector<1x32xf32> to vector<1x1x32xf32>
    %314 = vector.broadcast %313 : vector<1x1x32xf32> to vector<1x8x32xf32>
    %315 = arith.addf %312, %314 : vector<1x8x32xf32>
    %c1_131 = arith.constant 1 : index
    %c0_132 = arith.constant 0 : index
    %c0_133 = arith.constant 0 : index
    %316 = vector.load %arg7[%c1_131, %c0_132, %c0_133] : memref<3x1x32xf32, #tpu.memory_space<vmem>>, vector<1x1x32xf32>
    %317 = vector.shape_cast %316 : vector<1x1x32xf32> to vector<1x32xf32>
    %c1_134 = arith.constant 1 : index
    %c0_135 = arith.constant 0 : index
    %c0_136 = arith.constant 0 : index
    %318 = vector.load %arg8[%c1_134, %c0_135, %c0_136] : memref<3x1x32xf32, #tpu.memory_space<vmem>>, vector<1x1x32xf32>
    %319 = vector.shape_cast %318 : vector<1x1x32xf32> to vector<1x32xf32>
    %cst_137 = arith.constant dense<0.000000e+00> : vector<1x8xf32>
    %320 = vector.multi_reduction <add>, %315, %cst_137 [2] : vector<1x8x32xf32> to vector<1x8xf32>
    %321 = vector.shape_cast %320 : vector<1x8xf32> to vector<1x8x1xf32>
    %cst_138 = arith.constant 3.200000e+01 : f32
    %322 = vector.broadcast %cst_138 : f32 to vector<1x8x1xf32>
    %323 = arith.divf %321, %322 : vector<1x8x1xf32>
    %324 = vector.broadcast %323 : vector<1x8x1xf32> to vector<1x8x32xf32>
    %325 = arith.subf %315, %324 : vector<1x8x32xf32>
    %326 = arith.mulf %325, %325 : vector<1x8x32xf32>
    %cst_139 = arith.constant dense<0.000000e+00> : vector<1x8xf32>
    %327 = vector.multi_reduction <add>, %326, %cst_139 [2] : vector<1x8x32xf32> to vector<1x8xf32>
    %328 = vector.shape_cast %327 : vector<1x8xf32> to vector<1x8x1xf32>
    %cst_140 = arith.constant 3.100000e+01 : f32
    %329 = vector.broadcast %cst_140 : f32 to vector<1x8x1xf32>
    %330 = arith.divf %328, %329 : vector<1x8x1xf32>
    %331 = math.sqrt %330 : vector<1x8x1xf32>
    %cst_141 = arith.constant 9.99999997E-7 : f32
    %332 = vector.broadcast %cst_141 : f32 to vector<1x8x1xf32>
    %333 = arith.addf %331, %332 : vector<1x8x1xf32>
    %334 = tpu.reciprocal %333 {approx = true} : vector<1x8x1xf32> -> vector<1x8x1xf32>
    %335 = vector.broadcast %323 : vector<1x8x1xf32> to vector<1x8x32xf32>
    %336 = arith.subf %315, %335 : vector<1x8x32xf32>
    %337 = vector.shape_cast %317 : vector<1x32xf32> to vector<1x1x32xf32>
    %338 = vector.broadcast %337 : vector<1x1x32xf32> to vector<1x8x32xf32>
    %339 = arith.mulf %338, %336 : vector<1x8x32xf32>
    %340 = vector.broadcast %334 : vector<1x8x1xf32> to vector<1x8x32xf32>
    %341 = arith.mulf %339, %340 : vector<1x8x32xf32>
    %342 = vector.shape_cast %319 : vector<1x32xf32> to vector<1x1x32xf32>
    %343 = vector.broadcast %342 : vector<1x1x32xf32> to vector<1x8x32xf32>
    %344 = arith.addf %341, %343 : vector<1x8x32xf32>
    %345 = vector.shape_cast %344 : vector<1x8x32xf32> to vector<8x32xf32>
    %346 = arith.truncf %345 : vector<8x32xf32> to vector<8x32xbf16>
    %cst_142 = arith.constant 0.000000e+00 : f32
    %347 = vector.broadcast %cst_142 : f32 to vector<8x32xf32>
    %c1_143 = arith.constant 1 : index
    %c0_144 = arith.constant 0 : index
    %c0_145 = arith.constant 0 : index
    %348 = vector.load %arg9[%c1_143, %c0_144, %c0_145] : memref<3x32x2048xbf16, #tpu.memory_space<vmem>>, vector<1x32x512xbf16>
    %349 = vector.shape_cast %348 : vector<1x32x512xbf16> to vector<32x512xbf16>
    %cst_146 = arith.constant dense<0.000000e+00> : vector<8x512xf32>
    %350 = tpu.matmul %346, %349, %cst_146 {dimension_numbers = #tpu.dot_dimension_numbers<[1], [0], [0], [1], [0, 0, 1, 1], [], []>} : vector<8x32xbf16>, vector<32x512xbf16>, vector<8x512xf32> -> vector<8x512xf32>
    %c1_147 = arith.constant 1 : index
    %c0_148 = arith.constant 0 : index
    %c0_149 = arith.constant 0 : index
    %351 = vector.load %arg10[%c1_147, %c0_148, %c0_149] : memref<3x1x2048xf32, #tpu.memory_space<vmem>>, vector<1x1x512xf32>
    %352 = vector.shape_cast %351 : vector<1x1x512xf32> to vector<1x512xf32>
    %353 = vector.broadcast %352 : vector<1x512xf32> to vector<8x512xf32>
    %354 = arith.addf %350, %353 : vector<8x512xf32>
    %cst_150 = arith.constant 0.000000e+00 : f32
    %355 = vector.broadcast %cst_150 : f32 to vector<8x512xf32>
    %356 = arith.maximumf %354, %355 : vector<8x512xf32>
    %357 = arith.truncf %356 : vector<8x512xf32> to vector<8x512xbf16>
    %c1_151 = arith.constant 1 : index
    %c0_152 = arith.constant 0 : index
    %c0_153 = arith.constant 0 : index
    %358 = vector.load %arg11[%c1_151, %c0_152, %c0_153] : memref<3x2048x32xbf16, #tpu.memory_space<vmem>>, vector<1x512x32xbf16>
    %359 = vector.shape_cast %358 : vector<1x512x32xbf16> to vector<512x32xbf16>
    %cst_154 = arith.constant dense<0.000000e+00> : vector<8x32xf32>
    %360 = tpu.matmul %357, %359, %cst_154 {dimension_numbers = #tpu.dot_dimension_numbers<[1], [0], [0], [1], [0, 0, 1, 1], [], []>} : vector<8x512xbf16>, vector<512x32xbf16>, vector<8x32xf32> -> vector<8x32xf32>
    %361 = arith.addf %347, %360 : vector<8x32xf32>
    %c1_155 = arith.constant 1 : index
    %c0_156 = arith.constant 0 : index
    %c512_157 = arith.constant 512 : index
    %362 = vector.load %arg9[%c1_155, %c0_156, %c512_157] : memref<3x32x2048xbf16, #tpu.memory_space<vmem>>, vector<1x32x512xbf16>
    %363 = vector.shape_cast %362 : vector<1x32x512xbf16> to vector<32x512xbf16>
    %cst_158 = arith.constant dense<0.000000e+00> : vector<8x512xf32>
    %364 = tpu.matmul %346, %363, %cst_158 {dimension_numbers = #tpu.dot_dimension_numbers<[1], [0], [0], [1], [0, 0, 1, 1], [], []>} : vector<8x32xbf16>, vector<32x512xbf16>, vector<8x512xf32> -> vector<8x512xf32>
    %c1_159 = arith.constant 1 : index
    %c0_160 = arith.constant 0 : index
    %c512_161 = arith.constant 512 : index
    %365 = vector.load %arg10[%c1_159, %c0_160, %c512_161] : memref<3x1x2048xf32, #tpu.memory_space<vmem>>, vector<1x1x512xf32>
    %366 = vector.shape_cast %365 : vector<1x1x512xf32> to vector<1x512xf32>
    %367 = vector.broadcast %366 : vector<1x512xf32> to vector<8x512xf32>
    %368 = arith.addf %364, %367 : vector<8x512xf32>
    %cst_162 = arith.constant 0.000000e+00 : f32
    %369 = vector.broadcast %cst_162 : f32 to vector<8x512xf32>
    %370 = arith.maximumf %368, %369 : vector<8x512xf32>
    %371 = arith.truncf %370 : vector<8x512xf32> to vector<8x512xbf16>
    %c1_163 = arith.constant 1 : index
    %c512_164 = arith.constant 512 : index
    %c0_165 = arith.constant 0 : index
    %372 = vector.load %arg11[%c1_163, %c512_164, %c0_165] : memref<3x2048x32xbf16, #tpu.memory_space<vmem>>, vector<1x512x32xbf16>
    %373 = vector.shape_cast %372 : vector<1x512x32xbf16> to vector<512x32xbf16>
    %cst_166 = arith.constant dense<0.000000e+00> : vector<8x32xf32>
    %374 = tpu.matmul %371, %373, %cst_166 {dimension_numbers = #tpu.dot_dimension_numbers<[1], [0], [0], [1], [0, 0, 1, 1], [], []>} : vector<8x512xbf16>, vector<512x32xbf16>, vector<8x32xf32> -> vector<8x32xf32>
    %375 = arith.addf %361, %374 : vector<8x32xf32>
    %c1_167 = arith.constant 1 : index
    %c0_168 = arith.constant 0 : index
    %c1024_169 = arith.constant 1024 : index
    %376 = vector.load %arg9[%c1_167, %c0_168, %c1024_169] : memref<3x32x2048xbf16, #tpu.memory_space<vmem>>, vector<1x32x512xbf16>
    %377 = vector.shape_cast %376 : vector<1x32x512xbf16> to vector<32x512xbf16>
    %cst_170 = arith.constant dense<0.000000e+00> : vector<8x512xf32>
    %378 = tpu.matmul %346, %377, %cst_170 {dimension_numbers = #tpu.dot_dimension_numbers<[1], [0], [0], [1], [0, 0, 1, 1], [], []>} : vector<8x32xbf16>, vector<32x512xbf16>, vector<8x512xf32> -> vector<8x512xf32>
    %c1_171 = arith.constant 1 : index
    %c0_172 = arith.constant 0 : index
    %c1024_173 = arith.constant 1024 : index
    %379 = vector.load %arg10[%c1_171, %c0_172, %c1024_173] : memref<3x1x2048xf32, #tpu.memory_space<vmem>>, vector<1x1x512xf32>
    %380 = vector.shape_cast %379 : vector<1x1x512xf32> to vector<1x512xf32>
    %381 = vector.broadcast %380 : vector<1x512xf32> to vector<8x512xf32>
    %382 = arith.addf %378, %381 : vector<8x512xf32>
    %cst_174 = arith.constant 0.000000e+00 : f32
    %383 = vector.broadcast %cst_174 : f32 to vector<8x512xf32>
    %384 = arith.maximumf %382, %383 : vector<8x512xf32>
    %385 = arith.truncf %384 : vector<8x512xf32> to vector<8x512xbf16>
    %c1_175 = arith.constant 1 : index
    %c1024_176 = arith.constant 1024 : index
    %c0_177 = arith.constant 0 : index
    %386 = vector.load %arg11[%c1_175, %c1024_176, %c0_177] : memref<3x2048x32xbf16, #tpu.memory_space<vmem>>, vector<1x512x32xbf16>
    %387 = vector.shape_cast %386 : vector<1x512x32xbf16> to vector<512x32xbf16>
    %cst_178 = arith.constant dense<0.000000e+00> : vector<8x32xf32>
    %388 = tpu.matmul %385, %387, %cst_178 {dimension_numbers = #tpu.dot_dimension_numbers<[1], [0], [0], [1], [0, 0, 1, 1], [], []>} : vector<8x512xbf16>, vector<512x32xbf16>, vector<8x32xf32> -> vector<8x32xf32>
    %389 = arith.addf %375, %388 : vector<8x32xf32>
    %c1_179 = arith.constant 1 : index
    %c0_180 = arith.constant 0 : index
    %c1536_181 = arith.constant 1536 : index
    %390 = vector.load %arg9[%c1_179, %c0_180, %c1536_181] : memref<3x32x2048xbf16, #tpu.memory_space<vmem>>, vector<1x32x512xbf16>
    %391 = vector.shape_cast %390 : vector<1x32x512xbf16> to vector<32x512xbf16>
    %cst_182 = arith.constant dense<0.000000e+00> : vector<8x512xf32>
    %392 = tpu.matmul %346, %391, %cst_182 {dimension_numbers = #tpu.dot_dimension_numbers<[1], [0], [0], [1], [0, 0, 1, 1], [], []>} : vector<8x32xbf16>, vector<32x512xbf16>, vector<8x512xf32> -> vector<8x512xf32>
    %c1_183 = arith.constant 1 : index
    %c0_184 = arith.constant 0 : index
    %c1536_185 = arith.constant 1536 : index
    %393 = vector.load %arg10[%c1_183, %c0_184, %c1536_185] : memref<3x1x2048xf32, #tpu.memory_space<vmem>>, vector<1x1x512xf32>
    %394 = vector.shape_cast %393 : vector<1x1x512xf32> to vector<1x512xf32>
    %395 = vector.broadcast %394 : vector<1x512xf32> to vector<8x512xf32>
    %396 = arith.addf %392, %395 : vector<8x512xf32>
    %cst_186 = arith.constant 0.000000e+00 : f32
    %397 = vector.broadcast %cst_186 : f32 to vector<8x512xf32>
    %398 = arith.maximumf %396, %397 : vector<8x512xf32>
    %399 = arith.truncf %398 : vector<8x512xf32> to vector<8x512xbf16>
    %c1_187 = arith.constant 1 : index
    %c1536_188 = arith.constant 1536 : index
    %c0_189 = arith.constant 0 : index
    %400 = vector.load %arg11[%c1_187, %c1536_188, %c0_189] : memref<3x2048x32xbf16, #tpu.memory_space<vmem>>, vector<1x512x32xbf16>
    %401 = vector.shape_cast %400 : vector<1x512x32xbf16> to vector<512x32xbf16>
    %cst_190 = arith.constant dense<0.000000e+00> : vector<8x32xf32>
    %402 = tpu.matmul %399, %401, %cst_190 {dimension_numbers = #tpu.dot_dimension_numbers<[1], [0], [0], [1], [0, 0, 1, 1], [], []>} : vector<8x512xbf16>, vector<512x32xbf16>, vector<8x32xf32> -> vector<8x32xf32>
    %403 = arith.addf %389, %402 : vector<8x32xf32>
    %c1_191 = arith.constant 1 : index
    %c0_192 = arith.constant 0 : index
    %c0_193 = arith.constant 0 : index
    %404 = vector.load %arg12[%c1_191, %c0_192, %c0_193] : memref<3x1x32xf32, #tpu.memory_space<vmem>>, vector<1x1x32xf32>
    %405 = vector.shape_cast %404 : vector<1x1x32xf32> to vector<1x32xf32>
    %406 = vector.broadcast %405 : vector<1x32xf32> to vector<8x32xf32>
    %407 = arith.addf %403, %406 : vector<8x32xf32>
    %408 = vector.shape_cast %407 : vector<8x32xf32> to vector<1x8x32xf32>
    %409 = arith.addf %315, %408 : vector<1x8x32xf32>
    %c1_194 = arith.constant 1 : index
    %c0_195 = arith.constant 0 : index
    %c0_196 = arith.constant 0 : index
    %410 = vector.load %arg5[%c1_194, %c0_195, %c0_196] : memref<3x1x32xf32, #tpu.memory_space<vmem>>, vector<1x1x32xf32>
    %411 = vector.shape_cast %410 : vector<1x1x32xf32> to vector<1x32xf32>
    %c1_197 = arith.constant 1 : index
    %c0_198 = arith.constant 0 : index
    %c0_199 = arith.constant 0 : index
    %412 = vector.load %arg6[%c1_197, %c0_198, %c0_199] : memref<3x1x32xf32, #tpu.memory_space<vmem>>, vector<1x1x32xf32>
    %413 = vector.shape_cast %412 : vector<1x1x32xf32> to vector<1x32xf32>
    %cst_200 = arith.constant dense<0.000000e+00> : vector<1x8xf32>
    %414 = vector.multi_reduction <add>, %409, %cst_200 [2] : vector<1x8x32xf32> to vector<1x8xf32>
    %415 = vector.shape_cast %414 : vector<1x8xf32> to vector<1x8x1xf32>
    %cst_201 = arith.constant 3.200000e+01 : f32
    %416 = vector.broadcast %cst_201 : f32 to vector<1x8x1xf32>
    %417 = arith.divf %415, %416 : vector<1x8x1xf32>
    %418 = vector.broadcast %417 : vector<1x8x1xf32> to vector<1x8x32xf32>
    %419 = arith.subf %409, %418 : vector<1x8x32xf32>
    %420 = arith.mulf %419, %419 : vector<1x8x32xf32>
    %cst_202 = arith.constant dense<0.000000e+00> : vector<1x8xf32>
    %421 = vector.multi_reduction <add>, %420, %cst_202 [2] : vector<1x8x32xf32> to vector<1x8xf32>
    %422 = vector.shape_cast %421 : vector<1x8xf32> to vector<1x8x1xf32>
    %cst_203 = arith.constant 3.100000e+01 : f32
    %423 = vector.broadcast %cst_203 : f32 to vector<1x8x1xf32>
    %424 = arith.divf %422, %423 : vector<1x8x1xf32>
    %425 = math.sqrt %424 : vector<1x8x1xf32>
    %cst_204 = arith.constant 9.99999997E-7 : f32
    %426 = vector.broadcast %cst_204 : f32 to vector<1x8x1xf32>
    %427 = arith.addf %425, %426 : vector<1x8x1xf32>
    %428 = tpu.reciprocal %427 {approx = true} : vector<1x8x1xf32> -> vector<1x8x1xf32>
    %429 = vector.broadcast %417 : vector<1x8x1xf32> to vector<1x8x32xf32>
    %430 = arith.subf %409, %429 : vector<1x8x32xf32>
    %431 = vector.shape_cast %411 : vector<1x32xf32> to vector<1x1x32xf32>
    %432 = vector.broadcast %431 : vector<1x1x32xf32> to vector<1x8x32xf32>
    %433 = arith.mulf %432, %430 : vector<1x8x32xf32>
    %434 = vector.broadcast %428 : vector<1x8x1xf32> to vector<1x8x32xf32>
    %435 = arith.mulf %433, %434 : vector<1x8x32xf32>
    %436 = vector.shape_cast %413 : vector<1x32xf32> to vector<1x1x32xf32>
    %437 = vector.broadcast %436 : vector<1x1x32xf32> to vector<1x8x32xf32>
    %438 = arith.addf %435, %437 : vector<1x8x32xf32>
    %439 = vector.shape_cast %438 : vector<1x8x32xf32> to vector<8x32xf32>
    %440 = arith.truncf %439 : vector<8x32xf32> to vector<8x32xbf16>
    %c2 = arith.constant 2 : index
    %c0_205 = arith.constant 0 : index
    %c0_206 = arith.constant 0 : index
    %441 = vector.load %arg3[%c2, %c0_205, %c0_206] : memref<3x32x32xbf16, #tpu.memory_space<vmem>>, vector<1x32x32xbf16>
    %442 = vector.shape_cast %441 : vector<1x32x32xbf16> to vector<32x32xbf16>
    %cst_207 = arith.constant dense<0.000000e+00> : vector<8x32xf32>
    %443 = tpu.matmul %440, %442, %cst_207 {dimension_numbers = #tpu.dot_dimension_numbers<[1], [0], [0], [1], [0, 0, 1, 1], [], []>} : vector<8x32xbf16>, vector<32x32xbf16>, vector<8x32xf32> -> vector<8x32xf32>
    %c2_208 = arith.constant 2 : index
    %c0_209 = arith.constant 0 : index
    %c0_210 = arith.constant 0 : index
    %444 = vector.load %arg4[%c2_208, %c0_209, %c0_210] : memref<3x1x32xf32, #tpu.memory_space<vmem>>, vector<1x1x32xf32>
    %445 = vector.shape_cast %444 : vector<1x1x32xf32> to vector<1x32xf32>
    %446 = vector.broadcast %445 : vector<1x32xf32> to vector<8x32xf32>
    %447 = arith.addf %443, %446 : vector<8x32xf32>
    %448 = vector.shape_cast %447 : vector<8x32xf32> to vector<1x8x32xf32>
    %449 = vector.extract_strided_slice %438 {offsets = [0, 0, 0], sizes = [1, 8, 8], strides = [1, 1, 1]} : vector<1x8x32xf32> to vector<1x8x8xf32>
    %450 = vector.shape_cast %449 : vector<1x8x8xf32> to vector<1x1x8x8xf32>
    %451 = vector.extract_strided_slice %438 {offsets = [0, 0, 8], sizes = [1, 8, 8], strides = [1, 1, 1]} : vector<1x8x32xf32> to vector<1x8x8xf32>
    %452 = vector.shape_cast %451 : vector<1x8x8xf32> to vector<1x1x8x8xf32>
    %453 = vector.extract_strided_slice %438 {offsets = [0, 0, 16], sizes = [1, 8, 8], strides = [1, 1, 1]} : vector<1x8x32xf32> to vector<1x8x8xf32>
    %454 = vector.shape_cast %453 : vector<1x8x8xf32> to vector<1x1x8x8xf32>
    %455 = vector.extract_strided_slice %438 {offsets = [0, 0, 24], sizes = [1, 8, 8], strides = [1, 1, 1]} : vector<1x8x32xf32> to vector<1x8x8xf32>
    %456 = vector.shape_cast %455 : vector<1x8x8xf32> to vector<1x1x8x8xf32>
    %457 = tpu.concatenate %450, %452, %454, %456 in 1 : vector<1x1x8x8xf32>, vector<1x1x8x8xf32>, vector<1x1x8x8xf32>, vector<1x1x8x8xf32> -> vector<1x4x8x8xf32>
    %458 = vector.shape_cast %457 : vector<1x4x8x8xf32> to vector<4x8x8xf32>
    %459 = arith.truncf %458 : vector<4x8x8xf32> to vector<4x8x8xbf16>
    %460 = vector.extract_strided_slice %448 {offsets = [0, 0, 0], sizes = [1, 8, 8], strides = [1, 1, 1]} : vector<1x8x32xf32> to vector<1x8x8xf32>
    %461 = vector.shape_cast %460 : vector<1x8x8xf32> to vector<1x1x8x8xf32>
    %462 = vector.extract_strided_slice %448 {offsets = [0, 0, 8], sizes = [1, 8, 8], strides = [1, 1, 1]} : vector<1x8x32xf32> to vector<1x8x8xf32>
    %463 = vector.shape_cast %462 : vector<1x8x8xf32> to vector<1x1x8x8xf32>
    %464 = vector.extract_strided_slice %448 {offsets = [0, 0, 16], sizes = [1, 8, 8], strides = [1, 1, 1]} : vector<1x8x32xf32> to vector<1x8x8xf32>
    %465 = vector.shape_cast %464 : vector<1x8x8xf32> to vector<1x1x8x8xf32>
    %466 = vector.extract_strided_slice %448 {offsets = [0, 0, 24], sizes = [1, 8, 8], strides = [1, 1, 1]} : vector<1x8x32xf32> to vector<1x8x8xf32>
    %467 = vector.shape_cast %466 : vector<1x8x8xf32> to vector<1x1x8x8xf32>
    %468 = tpu.concatenate %461, %463, %465, %467 in 1 : vector<1x1x8x8xf32>, vector<1x1x8x8xf32>, vector<1x1x8x8xf32>, vector<1x1x8x8xf32> -> vector<1x4x8x8xf32>
    %469 = vector.shape_cast %468 : vector<1x4x8x8xf32> to vector<4x8x8xf32>
    %470 = arith.truncf %469 : vector<4x8x8xf32> to vector<4x8x8xbf16>
    "tpu.trace_start"() <{level = 10 : i32, message = "bqd,bkd->bqk"}> : () -> ()
    %cst_211 = arith.constant dense<0.000000e+00> : vector<4x8x8xf32>
    %471 = tpu.matmul %470, %459, %cst_211 {dimension_numbers = #tpu.dot_dimension_numbers<[2], [2], [1], [1], [0, 0, 0, 1, 1, 1], [0], [0]>} : vector<4x8x8xbf16>, vector<4x8x8xbf16>, vector<4x8x8xf32> -> vector<4x8x8xf32>
    "tpu.trace_stop"() : () -> ()
    %cst_212 = arith.constant 0.353553385 : f32
    %472 = vector.broadcast %cst_212 : f32 to vector<4x8x8xf32>
    %473 = arith.mulf %471, %472 : vector<4x8x8xf32>
    %474 = vector.shape_cast %473 : vector<4x8x8xf32> to vector<1x4x8x8xf32>
    %cst_213 = arith.constant -1.000000e+09 : f32
    %475 = vector.shape_cast %4 : vector<1x1x1x8xi1> to vector<1x1x1x8xi1>
    %476 = vector.broadcast %475 : vector<1x1x1x8xi1> to vector<1x4x8x8xi1>
    %477 = vector.broadcast %cst_213 : f32 to vector<1x4x8x8xf32>
    %478 = arith.select %476, %477, %474 : vector<1x4x8x8xi1>, vector<1x4x8x8xf32>
    %cst_214 = arith.constant dense<0xFF800000> : vector<1x4x8xf32>
    %479 = vector.multi_reduction <maximumf>, %478, %cst_214 [3] : vector<1x4x8x8xf32> to vector<1x4x8xf32>
    %480 = vector.shape_cast %479 : vector<1x4x8xf32> to vector<1x4x8x1xf32>
    %481 = vector.broadcast %480 : vector<1x4x8x1xf32> to vector<1x4x8x8xf32>
    %482 = arith.subf %478, %481 : vector<1x4x8x8xf32>
    %483 = math.exp %482 : vector<1x4x8x8xf32>
    %cst_215 = arith.constant dense<0.000000e+00> : vector<1x4x8xf32>
    %484 = vector.multi_reduction <add>, %483, %cst_215 [3] : vector<1x4x8x8xf32> to vector<1x4x8xf32>
    %485 = vector.shape_cast %484 : vector<1x4x8xf32> to vector<1x4x8x1xf32>
    %486 = tpu.reciprocal %485 {approx = true} : vector<1x4x8x1xf32> -> vector<1x4x8x1xf32>
    %487 = vector.broadcast %486 : vector<1x4x8x1xf32> to vector<1x4x8x8xf32>
    %488 = arith.mulf %483, %487 : vector<1x4x8x8xf32>
    %c0_216 = arith.constant 0 : index
    %c0_217 = arith.constant 0 : index
    %c0_218 = arith.constant 0 : index
    %c0_219 = arith.constant 0 : index
    %489 = vector.load %arg16[%c0_216, %c0_217, %c0_218, %c0_219] : memref<1x4x8x8xf32, #tpu.memory_space<vmem>>, vector<1x4x8x8xf32>
    tpu.vector_store %arg16[%c0_216, %c0_217, %c0_218, %c0_219], %488 {strides = array<i32>} : memref<1x4x8x8xf32, #tpu.memory_space<vmem>>, vector<1x4x8x8xf32>,
    %490 = vector.shape_cast %488 : vector<1x4x8x8xf32> to vector<4x8x8xf32>
    %491 = arith.truncf %490 : vector<4x8x8xf32> to vector<4x8x8xbf16>
    "tpu.trace_start"() <{level = 10 : i32, message = "bqk,bkd->bqd"}> : () -> ()
    %cst_220 = arith.constant dense<0.000000e+00> : vector<4x8x8xf32>
    %492 = tpu.matmul %491, %459, %cst_220 {dimension_numbers = #tpu.dot_dimension_numbers<[2], [1], [1], [2], [0, 0, 0, 1, 1, 2], [0], [0]>} : vector<4x8x8xbf16>, vector<4x8x8xbf16>, vector<4x8x8xf32> -> vector<4x8x8xf32>
    "tpu.trace_stop"() : () -> ()
    %493 = vector.shape_cast %492 : vector<4x8x8xf32> to vector<1x4x8x8xf32>
    %494 = vector.extract_strided_slice %493 {offsets = [0, 0, 0, 0], sizes = [1, 1, 8, 8], strides = [1, 1, 1, 1]} : vector<1x4x8x8xf32> to vector<1x1x8x8xf32>
    %495 = vector.shape_cast %494 : vector<1x1x8x8xf32> to vector<1x8x8xf32>
    %496 = vector.extract_strided_slice %493 {offsets = [0, 1, 0, 0], sizes = [1, 1, 8, 8], strides = [1, 1, 1, 1]} : vector<1x4x8x8xf32> to vector<1x1x8x8xf32>
    %497 = vector.shape_cast %496 : vector<1x1x8x8xf32> to vector<1x8x8xf32>
    %498 = vector.extract_strided_slice %493 {offsets = [0, 2, 0, 0], sizes = [1, 1, 8, 8], strides = [1, 1, 1, 1]} : vector<1x4x8x8xf32> to vector<1x1x8x8xf32>
    %499 = vector.shape_cast %498 : vector<1x1x8x8xf32> to vector<1x8x8xf32>
    %500 = vector.extract_strided_slice %493 {offsets = [0, 3, 0, 0], sizes = [1, 1, 8, 8], strides = [1, 1, 1, 1]} : vector<1x4x8x8xf32> to vector<1x1x8x8xf32>
    %501 = vector.shape_cast %500 : vector<1x1x8x8xf32> to vector<1x8x8xf32>
    %502 = tpu.concatenate %495, %497, %499, %501 in 2 : vector<1x8x8xf32>, vector<1x8x8xf32>, vector<1x8x8xf32>, vector<1x8x8xf32> -> vector<1x8x32xf32>
    %503 = arith.addf %438, %502 : vector<1x8x32xf32>
    %c2_221 = arith.constant 2 : index
    %c0_222 = arith.constant 0 : index
    %c0_223 = arith.constant 0 : index
    %504 = vector.load %arg5[%c2_221, %c0_222, %c0_223] : memref<3x1x32xf32, #tpu.memory_space<vmem>>, vector<1x1x32xf32>
    %505 = vector.shape_cast %504 : vector<1x1x32xf32> to vector<1x32xf32>
    %c2_224 = arith.constant 2 : index
    %c0_225 = arith.constant 0 : index
    %c0_226 = arith.constant 0 : index
    %506 = vector.load %arg6[%c2_224, %c0_225, %c0_226] : memref<3x1x32xf32, #tpu.memory_space<vmem>>, vector<1x1x32xf32>
    %507 = vector.shape_cast %506 : vector<1x1x32xf32> to vector<1x32xf32>
    %cst_227 = arith.constant dense<0.000000e+00> : vector<1x8xf32>
    %508 = vector.multi_reduction <add>, %503, %cst_227 [2] : vector<1x8x32xf32> to vector<1x8xf32>
    %509 = vector.shape_cast %508 : vector<1x8xf32> to vector<1x8x1xf32>
    %cst_228 = arith.constant 3.200000e+01 : f32
    %510 = vector.broadcast %cst_228 : f32 to vector<1x8x1xf32>
    %511 = arith.divf %509, %510 : vector<1x8x1xf32>
    %512 = vector.broadcast %511 : vector<1x8x1xf32> to vector<1x8x32xf32>
    %513 = arith.subf %503, %512 : vector<1x8x32xf32>
    %514 = arith.mulf %513, %513 : vector<1x8x32xf32>
    %cst_229 = arith.constant dense<0.000000e+00> : vector<1x8xf32>
    %515 = vector.multi_reduction <add>, %514, %cst_229 [2] : vector<1x8x32xf32> to vector<1x8xf32>
    %516 = vector.shape_cast %515 : vector<1x8xf32> to vector<1x8x1xf32>
    %cst_230 = arith.constant 3.100000e+01 : f32
    %517 = vector.broadcast %cst_230 : f32 to vector<1x8x1xf32>
    %518 = arith.divf %516, %517 : vector<1x8x1xf32>
    %519 = math.sqrt %518 : vector<1x8x1xf32>
    %cst_231 = arith.constant 9.99999997E-7 : f32
    %520 = vector.broadcast %cst_231 : f32 to vector<1x8x1xf32>
    %521 = arith.addf %519, %520 : vector<1x8x1xf32>
    %522 = tpu.reciprocal %521 {approx = true} : vector<1x8x1xf32> -> vector<1x8x1xf32>
    %523 = vector.broadcast %511 : vector<1x8x1xf32> to vector<1x8x32xf32>
    %524 = arith.subf %503, %523 : vector<1x8x32xf32>
    %525 = vector.shape_cast %505 : vector<1x32xf32> to vector<1x1x32xf32>
    %526 = vector.broadcast %525 : vector<1x1x32xf32> to vector<1x8x32xf32>
    %527 = arith.mulf %526, %524 : vector<1x8x32xf32>
    %528 = vector.broadcast %522 : vector<1x8x1xf32> to vector<1x8x32xf32>
    %529 = arith.mulf %527, %528 : vector<1x8x32xf32>
    %530 = vector.shape_cast %507 : vector<1x32xf32> to vector<1x1x32xf32>
    %531 = vector.broadcast %530 : vector<1x1x32xf32> to vector<1x8x32xf32>
    %532 = arith.addf %529, %531 : vector<1x8x32xf32>
    %c2_232 = arith.constant 2 : index
    %c0_233 = arith.constant 0 : index
    %c0_234 = arith.constant 0 : index
    %533 = vector.load %arg7[%c2_232, %c0_233, %c0_234] : memref<3x1x32xf32, #tpu.memory_space<vmem>>, vector<1x1x32xf32>
    %534 = vector.shape_cast %533 : vector<1x1x32xf32> to vector<1x32xf32>
    %c2_235 = arith.constant 2 : index
    %c0_236 = arith.constant 0 : index
    %c0_237 = arith.constant 0 : index
    %535 = vector.load %arg8[%c2_235, %c0_236, %c0_237] : memref<3x1x32xf32, #tpu.memory_space<vmem>>, vector<1x1x32xf32>
    %536 = vector.shape_cast %535 : vector<1x1x32xf32> to vector<1x32xf32>
    %cst_238 = arith.constant dense<0.000000e+00> : vector<1x8xf32>
    %537 = vector.multi_reduction <add>, %532, %cst_238 [2] : vector<1x8x32xf32> to vector<1x8xf32>
    %538 = vector.shape_cast %537 : vector<1x8xf32> to vector<1x8x1xf32>
    %cst_239 = arith.constant 3.200000e+01 : f32
    %539 = vector.broadcast %cst_239 : f32 to vector<1x8x1xf32>
    %540 = arith.divf %538, %539 : vector<1x8x1xf32>
    %541 = vector.broadcast %540 : vector<1x8x1xf32> to vector<1x8x32xf32>
    %542 = arith.subf %532, %541 : vector<1x8x32xf32>
    %543 = arith.mulf %542, %542 : vector<1x8x32xf32>
    %cst_240 = arith.constant dense<0.000000e+00> : vector<1x8xf32>
    %544 = vector.multi_reduction <add>, %543, %cst_240 [2] : vector<1x8x32xf32> to vector<1x8xf32>
    %545 = vector.shape_cast %544 : vector<1x8xf32> to vector<1x8x1xf32>
    %cst_241 = arith.constant 3.100000e+01 : f32
    %546 = vector.broadcast %cst_241 : f32 to vector<1x8x1xf32>
    %547 = arith.divf %545, %546 : vector<1x8x1xf32>
    %548 = math.sqrt %547 : vector<1x8x1xf32>
    %cst_242 = arith.constant 9.99999997E-7 : f32
    %549 = vector.broadcast %cst_242 : f32 to vector<1x8x1xf32>
    %550 = arith.addf %548, %549 : vector<1x8x1xf32>
    %551 = tpu.reciprocal %550 {approx = true} : vector<1x8x1xf32> -> vector<1x8x1xf32>
    %552 = vector.broadcast %540 : vector<1x8x1xf32> to vector<1x8x32xf32>
    %553 = arith.subf %532, %552 : vector<1x8x32xf32>
    %554 = vector.shape_cast %534 : vector<1x32xf32> to vector<1x1x32xf32>
    %555 = vector.broadcast %554 : vector<1x1x32xf32> to vector<1x8x32xf32>
    %556 = arith.mulf %555, %553 : vector<1x8x32xf32>
    %557 = vector.broadcast %551 : vector<1x8x1xf32> to vector<1x8x32xf32>
    %558 = arith.mulf %556, %557 : vector<1x8x32xf32>
    %559 = vector.shape_cast %536 : vector<1x32xf32> to vector<1x1x32xf32>
    %560 = vector.broadcast %559 : vector<1x1x32xf32> to vector<1x8x32xf32>
    %561 = arith.addf %558, %560 : vector<1x8x32xf32>
    %562 = vector.shape_cast %561 : vector<1x8x32xf32> to vector<8x32xf32>
    %563 = arith.truncf %562 : vector<8x32xf32> to vector<8x32xbf16>
    %cst_243 = arith.constant 0.000000e+00 : f32
    %564 = vector.broadcast %cst_243 : f32 to vector<8x32xf32>
    %c2_244 = arith.constant 2 : index
    %c0_245 = arith.constant 0 : index
    %c0_246 = arith.constant 0 : index
    %565 = vector.load %arg9[%c2_244, %c0_245, %c0_246] : memref<3x32x2048xbf16, #tpu.memory_space<vmem>>, vector<1x32x512xbf16>
    %566 = vector.shape_cast %565 : vector<1x32x512xbf16> to vector<32x512xbf16>
    %cst_247 = arith.constant dense<0.000000e+00> : vector<8x512xf32>
    %567 = tpu.matmul %563, %566, %cst_247 {dimension_numbers = #tpu.dot_dimension_numbers<[1], [0], [0], [1], [0, 0, 1, 1], [], []>} : vector<8x32xbf16>, vector<32x512xbf16>, vector<8x512xf32> -> vector<8x512xf32>
    %c2_248 = arith.constant 2 : index
    %c0_249 = arith.constant 0 : index
    %c0_250 = arith.constant 0 : index
    %568 = vector.load %arg10[%c2_248, %c0_249, %c0_250] : memref<3x1x2048xf32, #tpu.memory_space<vmem>>, vector<1x1x512xf32>
    %569 = vector.shape_cast %568 : vector<1x1x512xf32> to vector<1x512xf32>
    %570 = vector.broadcast %569 : vector<1x512xf32> to vector<8x512xf32>
    %571 = arith.addf %567, %570 : vector<8x512xf32>
    %cst_251 = arith.constant 0.000000e+00 : f32
    %572 = vector.broadcast %cst_251 : f32 to vector<8x512xf32>
    %573 = arith.maximumf %571, %572 : vector<8x512xf32>
    %574 = arith.truncf %573 : vector<8x512xf32> to vector<8x512xbf16>
    %c2_252 = arith.constant 2 : index
    %c0_253 = arith.constant 0 : index
    %c0_254 = arith.constant 0 : index
    %575 = vector.load %arg11[%c2_252, %c0_253, %c0_254] : memref<3x2048x32xbf16, #tpu.memory_space<vmem>>, vector<1x512x32xbf16>
    %576 = vector.shape_cast %575 : vector<1x512x32xbf16> to vector<512x32xbf16>
    %cst_255 = arith.constant dense<0.000000e+00> : vector<8x32xf32>
    %577 = tpu.matmul %574, %576, %cst_255 {dimension_numbers = #tpu.dot_dimension_numbers<[1], [0], [0], [1], [0, 0, 1, 1], [], []>} : vector<8x512xbf16>, vector<512x32xbf16>, vector<8x32xf32> -> vector<8x32xf32>
    %578 = arith.addf %564, %577 : vector<8x32xf32>
    %c2_256 = arith.constant 2 : index
    %c0_257 = arith.constant 0 : index
    %c512_258 = arith.constant 512 : index
    %579 = vector.load %arg9[%c2_256, %c0_257, %c512_258] : memref<3x32x2048xbf16, #tpu.memory_space<vmem>>, vector<1x32x512xbf16>
    %580 = vector.shape_cast %579 : vector<1x32x512xbf16> to vector<32x512xbf16>
    %cst_259 = arith.constant dense<0.000000e+00> : vector<8x512xf32>
    %581 = tpu.matmul %563, %580, %cst_259 {dimension_numbers = #tpu.dot_dimension_numbers<[1], [0], [0], [1], [0, 0, 1, 1], [], []>} : vector<8x32xbf16>, vector<32x512xbf16>, vector<8x512xf32> -> vector<8x512xf32>
    %c2_260 = arith.constant 2 : index
    %c0_261 = arith.constant 0 : index
    %c512_262 = arith.constant 512 : index
    %582 = vector.load %arg10[%c2_260, %c0_261, %c512_262] : memref<3x1x2048xf32, #tpu.memory_space<vmem>>, vector<1x1x512xf32>
    %583 = vector.shape_cast %582 : vector<1x1x512xf32> to vector<1x512xf32>
    %584 = vector.broadcast %583 : vector<1x512xf32> to vector<8x512xf32>
    %585 = arith.addf %581, %584 : vector<8x512xf32>
    %cst_263 = arith.constant 0.000000e+00 : f32
    %586 = vector.broadcast %cst_263 : f32 to vector<8x512xf32>
    %587 = arith.maximumf %585, %586 : vector<8x512xf32>
    %588 = arith.truncf %587 : vector<8x512xf32> to vector<8x512xbf16>
    %c2_264 = arith.constant 2 : index
    %c512_265 = arith.constant 512 : index
    %c0_266 = arith.constant 0 : index
    %589 = vector.load %arg11[%c2_264, %c512_265, %c0_266] : memref<3x2048x32xbf16, #tpu.memory_space<vmem>>, vector<1x512x32xbf16>
    %590 = vector.shape_cast %589 : vector<1x512x32xbf16> to vector<512x32xbf16>
    %cst_267 = arith.constant dense<0.000000e+00> : vector<8x32xf32>
    %591 = tpu.matmul %588, %590, %cst_267 {dimension_numbers = #tpu.dot_dimension_numbers<[1], [0], [0], [1], [0, 0, 1, 1], [], []>} : vector<8x512xbf16>, vector<512x32xbf16>, vector<8x32xf32> -> vector<8x32xf32>
    %592 = arith.addf %578, %591 : vector<8x32xf32>
    %c2_268 = arith.constant 2 : index
    %c0_269 = arith.constant 0 : index
    %c1024_270 = arith.constant 1024 : index
    %593 = vector.load %arg9[%c2_268, %c0_269, %c1024_270] : memref<3x32x2048xbf16, #tpu.memory_space<vmem>>, vector<1x32x512xbf16>
    %594 = vector.shape_cast %593 : vector<1x32x512xbf16> to vector<32x512xbf16>
    %cst_271 = arith.constant dense<0.000000e+00> : vector<8x512xf32>
    %595 = tpu.matmul %563, %594, %cst_271 {dimension_numbers = #tpu.dot_dimension_numbers<[1], [0], [0], [1], [0, 0, 1, 1], [], []>} : vector<8x32xbf16>, vector<32x512xbf16>, vector<8x512xf32> -> vector<8x512xf32>
    %c2_272 = arith.constant 2 : index
    %c0_273 = arith.constant 0 : index
    %c1024_274 = arith.constant 1024 : index
    %596 = vector.load %arg10[%c2_272, %c0_273, %c1024_274] : memref<3x1x2048xf32, #tpu.memory_space<vmem>>, vector<1x1x512xf32>
    %597 = vector.shape_cast %596 : vector<1x1x512xf32> to vector<1x512xf32>
    %598 = vector.broadcast %597 : vector<1x512xf32> to vector<8x512xf32>
    %599 = arith.addf %595, %598 : vector<8x512xf32>
    %cst_275 = arith.constant 0.000000e+00 : f32
    %600 = vector.broadcast %cst_275 : f32 to vector<8x512xf32>
    %601 = arith.maximumf %599, %600 : vector<8x512xf32>
    %602 = arith.truncf %601 : vector<8x512xf32> to vector<8x512xbf16>
    %c2_276 = arith.constant 2 : index
    %c1024_277 = arith.constant 1024 : index
    %c0_278 = arith.constant 0 : index
    %603 = vector.load %arg11[%c2_276, %c1024_277, %c0_278] : memref<3x2048x32xbf16, #tpu.memory_space<vmem>>, vector<1x512x32xbf16>
    %604 = vector.shape_cast %603 : vector<1x512x32xbf16> to vector<512x32xbf16>
    %cst_279 = arith.constant dense<0.000000e+00> : vector<8x32xf32>
    %605 = tpu.matmul %602, %604, %cst_279 {dimension_numbers = #tpu.dot_dimension_numbers<[1], [0], [0], [1], [0, 0, 1, 1], [], []>} : vector<8x512xbf16>, vector<512x32xbf16>, vector<8x32xf32> -> vector<8x32xf32>
    %606 = arith.addf %592, %605 : vector<8x32xf32>
    %c2_280 = arith.constant 2 : index
    %c0_281 = arith.constant 0 : index
    %c1536_282 = arith.constant 1536 : index
    %607 = vector.load %arg9[%c2_280, %c0_281, %c1536_282] : memref<3x32x2048xbf16, #tpu.memory_space<vmem>>, vector<1x32x512xbf16>
    %608 = vector.shape_cast %607 : vector<1x32x512xbf16> to vector<32x512xbf16>
    %cst_283 = arith.constant dense<0.000000e+00> : vector<8x512xf32>
    %609 = tpu.matmul %563, %608, %cst_283 {dimension_numbers = #tpu.dot_dimension_numbers<[1], [0], [0], [1], [0, 0, 1, 1], [], []>} : vector<8x32xbf16>, vector<32x512xbf16>, vector<8x512xf32> -> vector<8x512xf32>
    %c2_284 = arith.constant 2 : index
    %c0_285 = arith.constant 0 : index
    %c1536_286 = arith.constant 1536 : index
    %610 = vector.load %arg10[%c2_284, %c0_285, %c1536_286] : memref<3x1x2048xf32, #tpu.memory_space<vmem>>, vector<1x1x512xf32>
    %611 = vector.shape_cast %610 : vector<1x1x512xf32> to vector<1x512xf32>
    %612 = vector.broadcast %611 : vector<1x512xf32> to vector<8x512xf32>
    %613 = arith.addf %609, %612 : vector<8x512xf32>
    %cst_287 = arith.constant 0.000000e+00 : f32
    %614 = vector.broadcast %cst_287 : f32 to vector<8x512xf32>
    %615 = arith.maximumf %613, %614 : vector<8x512xf32>
    %616 = arith.truncf %615 : vector<8x512xf32> to vector<8x512xbf16>
    %c2_288 = arith.constant 2 : index
    %c1536_289 = arith.constant 1536 : index
    %c0_290 = arith.constant 0 : index
    %617 = vector.load %arg11[%c2_288, %c1536_289, %c0_290] : memref<3x2048x32xbf16, #tpu.memory_space<vmem>>, vector<1x512x32xbf16>
    %618 = vector.shape_cast %617 : vector<1x512x32xbf16> to vector<512x32xbf16>
    %cst_291 = arith.constant dense<0.000000e+00> : vector<8x32xf32>
    %619 = tpu.matmul %616, %618, %cst_291 {dimension_numbers = #tpu.dot_dimension_numbers<[1], [0], [0], [1], [0, 0, 1, 1], [], []>} : vector<8x512xbf16>, vector<512x32xbf16>, vector<8x32xf32> -> vector<8x32xf32>
    %620 = arith.addf %606, %619 : vector<8x32xf32>
    %c2_292 = arith.constant 2 : index
    %c0_293 = arith.constant 0 : index
    %c0_294 = arith.constant 0 : index
    %621 = vector.load %arg12[%c2_292, %c0_293, %c0_294] : memref<3x1x32xf32, #tpu.memory_space<vmem>>, vector<1x1x32xf32>
    %622 = vector.shape_cast %621 : vector<1x1x32xf32> to vector<1x32xf32>
    %623 = vector.broadcast %622 : vector<1x32xf32> to vector<8x32xf32>
    %624 = arith.addf %620, %623 : vector<8x32xf32>
    %625 = vector.shape_cast %624 : vector<8x32xf32> to vector<1x8x32xf32>
    %626 = arith.addf %532, %625 : vector<1x8x32xf32>
    %c2_295 = arith.constant 2 : index
    %c0_296 = arith.constant 0 : index
    %c0_297 = arith.constant 0 : index
    %627 = vector.load %arg5[%c2_295, %c0_296, %c0_297] : memref<3x1x32xf32, #tpu.memory_space<vmem>>, vector<1x1x32xf32>
    %628 = vector.shape_cast %627 : vector<1x1x32xf32> to vector<1x32xf32>
    %c2_298 = arith.constant 2 : index
    %c0_299 = arith.constant 0 : index
    %c0_300 = arith.constant 0 : index
    %629 = vector.load %arg6[%c2_298, %c0_299, %c0_300] : memref<3x1x32xf32, #tpu.memory_space<vmem>>, vector<1x1x32xf32>
    %630 = vector.shape_cast %629 : vector<1x1x32xf32> to vector<1x32xf32>
    %cst_301 = arith.constant dense<0.000000e+00> : vector<1x8xf32>
    %631 = vector.multi_reduction <add>, %626, %cst_301 [2] : vector<1x8x32xf32> to vector<1x8xf32>
    %632 = vector.shape_cast %631 : vector<1x8xf32> to vector<1x8x1xf32>
    %cst_302 = arith.constant 3.200000e+01 : f32
    %633 = vector.broadcast %cst_302 : f32 to vector<1x8x1xf32>
    %634 = arith.divf %632, %633 : vector<1x8x1xf32>
    %635 = vector.broadcast %634 : vector<1x8x1xf32> to vector<1x8x32xf32>
    %636 = arith.subf %626, %635 : vector<1x8x32xf32>
    %637 = arith.mulf %636, %636 : vector<1x8x32xf32>
    %cst_303 = arith.constant dense<0.000000e+00> : vector<1x8xf32>
    %638 = vector.multi_reduction <add>, %637, %cst_303 [2] : vector<1x8x32xf32> to vector<1x8xf32>
    %639 = vector.shape_cast %638 : vector<1x8xf32> to vector<1x8x1xf32>
    %cst_304 = arith.constant 3.100000e+01 : f32
    %640 = vector.broadcast %cst_304 : f32 to vector<1x8x1xf32>
    %641 = arith.divf %639, %640 : vector<1x8x1xf32>
    %642 = math.sqrt %641 : vector<1x8x1xf32>
    %cst_305 = arith.constant 9.99999997E-7 : f32
    %643 = vector.broadcast %cst_305 : f32 to vector<1x8x1xf32>
    %644 = arith.addf %642, %643 : vector<1x8x1xf32>
    %645 = tpu.reciprocal %644 {approx = true} : vector<1x8x1xf32> -> vector<1x8x1xf32>
    %646 = vector.broadcast %634 : vector<1x8x1xf32> to vector<1x8x32xf32>
    %647 = arith.subf %626, %646 : vector<1x8x32xf32>
    %648 = vector.shape_cast %628 : vector<1x32xf32> to vector<1x1x32xf32>
    %649 = vector.broadcast %648 : vector<1x1x32xf32> to vector<1x8x32xf32>
    %650 = arith.mulf %649, %647 : vector<1x8x32xf32>
    %651 = vector.broadcast %645 : vector<1x8x1xf32> to vector<1x8x32xf32>
    %652 = arith.mulf %650, %651 : vector<1x8x32xf32>
    %653 = vector.shape_cast %630 : vector<1x32xf32> to vector<1x1x32xf32>
    %654 = vector.broadcast %653 : vector<1x1x32xf32> to vector<1x8x32xf32>
    %655 = arith.addf %652, %654 : vector<1x8x32xf32>
    %c0_306 = arith.constant 0 : index
    %c0_307 = arith.constant 0 : index
    %c0_308 = arith.constant 0 : index
    %656 = vector.load %arg13[%c0_306, %c0_307, %c0_308] : memref<1x8x32xf32, #tpu.memory_space<vmem>>, vector<1x8x32xf32>
    tpu.vector_store %arg13[%c0_306, %c0_307, %c0_308], %655 {strides = array<i32>} : memref<1x8x32xf32, #tpu.memory_space<vmem>>, vector<1x8x32xf32>,
    return
  }
  func.func @transform_0(%arg0: i32) -> (i32, i32, i32) {
    %c0_i32 = arith.constant 0 : i32
    %c0_i32_0 = arith.constant 0 : i32
    %c0_i32_1 = arith.constant 0 : i32
    return %arg0, %c0_i32, %c0_i32_0 : i32, i32, i32
  }
  func.func @transform_1(%arg0: i32) -> (i32, i32, i32) {
    %c0_i32 = arith.constant 0 : i32
    %c0_i32_0 = arith.constant 0 : i32
    %c0_i32_1 = arith.constant 0 : i32
    return %arg0, %c0_i32, %c0_i32_0 : i32, i32, i32
  }
  func.func @transform_2(%arg0: i32) -> (i32, i32, i32) {
    %c0_i32 = arith.constant 0 : i32
    %c0_i32_0 = arith.constant 0 : i32
    %c0_i32_1 = arith.constant 0 : i32
    %c0_i32_2 = arith.constant 0 : i32
    return %c0_i32, %c0_i32_0, %c0_i32_1 : i32, i32, i32
  }
  func.func @transform_3(%arg0: i32) -> (i32, i32, i32) {
    %c0_i32 = arith.constant 0 : i32
    %c0_i32_0 = arith.constant 0 : i32
    %c0_i32_1 = arith.constant 0 : i32
    %c0_i32_2 = arith.constant 0 : i32
    return %c0_i32, %c0_i32_0, %c0_i32_1 : i32, i32, i32
  }
  func.func @transform_4(%arg0: i32) -> (i32, i32, i32) {
    %c0_i32 = arith.constant 0 : i32
    %c0_i32_0 = arith.constant 0 : i32
    %c0_i32_1 = arith.constant 0 : i32
    %c0_i32_2 = arith.constant 0 : i32
    return %c0_i32, %c0_i32_0, %c0_i32_1 : i32, i32, i32
  }
  func.func @transform_5(%arg0: i32) -> (i32, i32, i32) {
    %c0_i32 = arith.constant 0 : i32
    %c0_i32_0 = arith.constant 0 : i32
    %c0_i32_1 = arith.constant 0 : i32
    %c0_i32_2 = arith.constant 0 : i32
    return %c0_i32, %c0_i32_0, %c0_i32_1 : i32, i32, i32
  }
  func.func @transform_6(%arg0: i32) -> (i32, i32, i32) {
    %c0_i32 = arith.constant 0 : i32
    %c0_i32_0 = arith.constant 0 : i32
    %c0_i32_1 = arith.constant 0 : i32
    %c0_i32_2 = arith.constant 0 : i32
    return %c0_i32, %c0_i32_0, %c0_i32_1 : i32, i32, i32
  }
  func.func @transform_7(%arg0: i32) -> (i32, i32, i32) {
    %c0_i32 = arith.constant 0 : i32
    %c0_i32_0 = arith.constant 0 : i32
    %c0_i32_1 = arith.constant 0 : i32
    %c0_i32_2 = arith.constant 0 : i32
    return %c0_i32, %c0_i32_0, %c0_i32_1 : i32, i32, i32
  }
  func.func @transform_8(%arg0: i32) -> (i32, i32, i32) {
    %c0_i32 = arith.constant 0 : i32
    %c0_i32_0 = arith.constant 0 : i32
    %c0_i32_1 = arith.constant 0 : i32
    %c0_i32_2 = arith.constant 0 : i32
    return %c0_i32, %c0_i32_0, %c0_i32_1 : i32, i32, i32
  }
  func.func @transform_9(%arg0: i32) -> (i32, i32, i32) {
    %c0_i32 = arith.constant 0 : i32
    %c0_i32_0 = arith.constant 0 : i32
    %c0_i32_1 = arith.constant 0 : i32
    %c0_i32_2 = arith.constant 0 : i32
    return %c0_i32, %c0_i32_0, %c0_i32_1 : i32, i32, i32
  }
  func.func @transform_10(%arg0: i32) -> (i32, i32, i32) {
    %c0_i32 = arith.constant 0 : i32
    %c0_i32_0 = arith.constant 0 : i32
    %c0_i32_1 = arith.constant 0 : i32
    %c0_i32_2 = arith.constant 0 : i32
    return %c0_i32, %c0_i32_0, %c0_i32_1 : i32, i32, i32
  }
  func.func @transform_11(%arg0: i32) -> (i32, i32, i32) {
    %c0_i32 = arith.constant 0 : i32
    %c0_i32_0 = arith.constant 0 : i32
    %c0_i32_1 = arith.constant 0 : i32
    %c0_i32_2 = arith.constant 0 : i32
    return %c0_i32, %c0_i32_0, %c0_i32_1 : i32, i32, i32
  }
  func.func @transform_12(%arg0: i32) -> (i32, i32, i32) {
    %c0_i32 = arith.constant 0 : i32
    %c0_i32_0 = arith.constant 0 : i32
    %c0_i32_1 = arith.constant 0 : i32
    return %arg0, %c0_i32, %c0_i32_0 : i32, i32, i32
  }
  func.func @transform_13(%arg0: i32) -> (i32, i32, i32, i32) {
    %c0_i32 = arith.constant 0 : i32
    %c0_i32_0 = arith.constant 0 : i32
    %c0_i32_1 = arith.constant 0 : i32
    %c0_i32_2 = arith.constant 0 : i32
    return %arg0, %c0_i32, %c0_i32_0, %c0_i32_1 : i32, i32, i32, i32
  }
  func.func @transform_14(%arg0: i32) -> (i32, i32, i32, i32) {
    %c0_i32 = arith.constant 0 : i32
    %c0_i32_0 = arith.constant 0 : i32
    %c0_i32_1 = arith.constant 0 : i32
    %c0_i32_2 = arith.constant 0 : i32
    return %arg0, %c0_i32, %c0_i32_0, %c0_i32_1 : i32, i32, i32, i32
  }
  func.func @transform_15(%arg0: i32) -> (i32, i32, i32, i32) {
    %c0_i32 = arith.constant 0 : i32
    %c0_i32_0 = arith.constant 0 : i32
    %c0_i32_1 = arith.constant 0 : i32
    %c0_i32_2 = arith.constant 0 : i32
    return %arg0, %c0_i32, %c0_i32_0, %c0_i32_1 : i32, i32, i32, i32
  }
}

</mosaic_0001>

<bundles_post_ra>
// kernel: tpu_custom_call.1
= control target key start
LH: loop header
LB: loop body
LE: loop exit
PB: predicated region body
PF: predicated region fallthrough
CT: control target
= control target key end

     0   :  { %s13759_s0 = inlined_call_operand.vmem [shape: f32[2,8,32], index: 0, kind: input, shape index: {}]   ;;  %s13760_s1 = inlined_call_operand.vmem [shape: f32[2,1,8], index: 1, kind: input, shape index: {}]   ;;  %s13761_s2 = inlined_call_operand.vmem [shape: bf16[3,32,32], index: 2, kind: input, shape index: {}]   ;;  %s13762_s3 = inlined_call_operand.vmem [shape: f32[3,1,32], index: 3, kind: input, shape index: {}]   ;;  %s13763_s4 = inlined_call_operand.vmem [shape: f32[3,1,32], index: 4, kind: input, shape index: {}]   ;;  %s13764_s5 = inlined_call_operand.vmem [shape: f32[3,1,32], index: 5, kind: input, shape index: {}]   ;;  %s13765_s6 = inlined_call_operand.vmem [shape: f32[3,1,32], index: 6, kind: input, shape index: {}]   ;;  %s13766_s7 = inlined_call_operand.vmem [shape: f32[3,1,32], index: 7, kind: input, shape index: {}]   ;;  %s13767_s8 = inlined_call_operand.vmem [shape: bf16[3,32,2048], index: 8, kind: input, shape index: {}]   ;;  %s13768_s9 = inlined_call_operand.vmem [shape: f32[3,1,2048], index: 9, kind: input, shape index: {}]   ;;  %s13769_s10 = inlined_call_operand.vmem [shape: bf16[3,2048,32], index: 10, kind: input, shape index: {}]   ;;  %s13770_s11 = inlined_call_operand.vmem [shape: f32[3,1,32], index: 11, kind: input, shape index: {}]   ;;  %s13771_s12 = inlined_call_operand.hbm [shape: f32[2,8,32], index: 12, kind: output, shape index: {0}]   ;;  %s13772_s13 = inlined_call_operand.hbm [shape: f32[2,4,8,8], index: 13, kind: output, shape index: {1}]   ;;  %s13773_s14 = inlined_call_operand.hbm [shape: f32[2,4,8,8], index: 14, kind: output, shape index: {2}]   ;;  %s13774_s15 = inlined_call_operand.hbm [shape: f32[2,4,8,8], index: 15, kind: output, shape index: {3}]  }
   0x1   :  { %13805 = sst [smem:[#allocation22_spill]] %s13759_s0 }
   0x2   :  { %13806 = sst [smem:[#allocation23_spill]] %s13760_s1 }
   0x3   :  { %13807 = sst [smem:[#allocation24_spill]] %s13771_s12 }
   0x4   :  { %13808 = sst [smem:[#allocation25_spill]] %s13772_s13 }
   0x5   :  { %13809 = sst [smem:[#allocation26_spill]] %s13773_s14 }
   0x6   :  { %13810 = sst [smem:[#allocation27_spill]] %s13774_s15 }
   0x7   :  { %21 = vsyncpa [#allocation3], 0 }
   0x8   :  { %23 = vsyncpa [#allocation3 + $0x1], 0 }
   0x9   :  { %24 = vsyncpa [#allocation5], 0 }
   0xa   :  { %26 = vsyncpa [#allocation5 + $0x1], 0 }
   0xb   :  { %27 = vsyncpa [#allocation8], 0 }
   0xc   :  { %29 = vsyncpa [#allocation8 + $0x1], 0  ;;  %s11410_s18 = smov 0   ;;  %s11412_s19 = smov 0  }
   0xd   :  { %s11414_s20 = smov 0   ;;  %s11416_s21 = smov 0  }
   0xe LB: > { %13811 = sst [smem:[#allocation12_spill]] %s11302_s18  ;;  %s11431_s22 = sadd.s32 4294967295, %s11314_s21   ;;  %s11314_s21 = sphi %s11416_s21, %s13845_s21   ;;  %s11310_s20 = sphi %s11414_s20, %s13848_s20   ;;  %s11306_s19 = sphi %s11412_s19, %s13847_s19   ;;  %s11302_s18 = sphi %s11410_s18, %s13846_s18  }
   0xf   : > { %13812 = sst [smem:[#allocation13_spill]] %s11306_s19  ;;  %s13775_s23 = sadd.s32 4294967294, %s11314_s21  }
  0x10   : > { %13813 = sst [smem:[#allocation14_spill]] %s11310_s20  ;;  %s11435_s24 = sadd.s32 1, %s11314_s21  }
  0x11   : > { %13814 = sst [smem:[#allocation15_spill]] %s11314_s21  ;;  %s304_s25 = sadd.s32 1, %s11310_s20 }
  0x12   : > { %13815 = sst [smem:[#allocation16_spill]] %s11435_s24  ;;  %s301_s26 = ssub.s32 %s11314_s21, %s11435_s24 }
  0x13   : > { %p314_p0 = scmp.ne.s32.totalorder %s11310_s20, %s11306_s19  ;;  %p302_p1 = scmp.eq.s32.totalorder %s301_s26, 0 }
  0x14   : > { %p315_p2 = scmp.eq.s32.totalorder %s11431_s22, 1  ;;  %p320_p3 = scmp.ne.s32.totalorder %s11306_s19, %s11302_s18 }
  0x15   : > { %p321_p4 = scmp.eq.s32.totalorder %s13775_s23, 1  ;;  %p8689_p7 = scmp.ge.s32.totalorder %s11314_s21, 1 }
  0x16   : > { %s11448_s27 = scalar_select %p302_p1, %s11310_s20, %s304_s25  }
  0x17   : > { %p11450_p5 = por %p315_p2, %p314_p0  ;;  %p11454_p6 = por %p321_p4, %p320_p3 }
  0x18   : > { %13816 = sst [smem:[#allocation17_spill]] %s11448_s27  ;;  %p460_p8 = scmp.lt.s32.totalorder %s11314_s21, 3 }
  0x19   : > { %s13817_s28 = scalar_select %p11450_p5, 1, 0 }
  0x1a   : > { %s13819_s29 = scalar_select %p11454_p6, 1, 0 }
  0x1b   : > { %13818 = sst [smem:[#allocation18_spill]] %s13817_s28  ;;  %p461_p9 = pnand %p8689_p7, %p460_p8 }
  0x1c   : > { %13820 = sst [smem:[#allocation19_spill]] %s13819_s29 }
  0x1d   : > { %464 = sbr.rel (%p461_p9) target bundleno = 9009 (0x2331), region = 68 }
  0x22   : > { %v10687_v0 = vld [vmem:[%s13761_s2 + $0x8] sm:$0xff]   ;;  %v11316_v1 = vmov 0.0   ;;  %v10688_v2 = vld [vmem:[%s13761_s2] sm:$0xff]   ;;  %vm11317_vm0 = vmmov 0   ;;  %p525_p10 = scmp.lt.s32.totalorder %s11431_s22, 1  ;;  %s13821_s0 = sld [smem:[#allocation22_spill]]  ;;  %v820_v29 = vlaneseq }
  0x23   : > { %10455 = vmatprep.subr.bf16.mxu0 %v11316_v1  ;;  %10463 = vmatprep.subr.bf16.mxu1 %v11316_v1  ;;  %vm560_vm1 = vcmask 261120   ;;  %vm631_vm2 = vcmask 64512   ;;  %s13778_s25 = smov 120   ;;  %s13776_s27 = smov 104   ;;  %v8695_v9 = vld [vmem:[%s13762_s3] ss:$0 sm:$0xff] }
  0x24   : > { %10456 = vmatpush3.bf16.msra.mxu0 %v10687_v0  ;;  %10459 = vmatprep.mubr.msk.bf16.mxu0 %vm11317_vm0, %v11316_v1  ;;  %s11475_s26 = scalar_select %p525_p10, %s11431_s22, 1  ;;  %vm884_vm3 = vcmask 1043456   ;;  %v11533_v31 = vshrl.u32 %v820_v29, 7  ;;  %v11321_v33 = vmov 0   ;;  %vm1075_vm6 = vcmask 130048  }
  0x25   : > { %10457 = vmatprep.subr.bf16.mxu0 %v11316_v1  ;;  %10465 = vmatprep.mubr.msk.bf16.mxu1 %vm11317_vm0, %v11316_v1  ;;  %s13780_s23 = smov 112   ;;  %s13822_s1 = sld [smem:[#allocation23_spill]]  ;;  %vm1077_vm7 = vcmask 195584  }
  0x26   : > { %s8694_s30 = sshll.u32 %s11475_s26, 3  ;;  %v11536_v32 = vsub.s32 0, %v11533_v31  ;;  %s13784_s16 = smov 16  }
  0x27   : > { %s13831_s20 = smov 16   ;;  %s13832_s24 = smov 24  }
  0x28   : > { %10458 = vmatpush3.bf16.msra.mxu0 %v10688_v2  ;;  %s11481_s17 = scalar_lea.vmem %s13821_s0, %s8694_s30  ;;  %s13827_s0 = smov 120  }
  0x29   : > { %10469 = vmatprep.subr.bf16.mxu0 %v11316_v1  ;;  %v533_v3 = vld [vmem:[%s11481_s17] sm:$0xff]  ;;  %s8453_s12 = sand.u32 1, %s11431_s22   ;;  %s11325_s14 = smov [#allocation4]  }
  0x2a   : > { %v11485_v4 = vpack.c.bf16 %v533_v3, %v533_v3  ;;  %605 = vrot.lane.b32.xlu0 %v533_v3, %s13778_s25  ;;  %611 = vrot.lane.b32.xlu1 %v533_v3, %s13776_s27  ;;  %s13628_s13 = scalar_lea.sflag [#allocation5], %s8453_s12  ;;  %s11172_s15 = sshll.u32 %s11325_s14, 4  ;;  %s11173_s15 = int_to_ptr.vmem [resolvable:$false] %s11172_s15 }
  0x2c   : > { %10460 = vmatmul.mubr.msk.bf16.vlgmr.msra.gmra.mxu0 %vm560_vm1, %v11485_v4  ;;  %v635_v5 = vsel %vm631_vm2, %v11485_v4, 0 }
  0x2d   : > { %10464 = vmatpush3.bf16.xpose.msra.mxu1 %v635_v5  ;;  %10471 = vmatprep.mubr.msk.bf16.mxu0 %vm11317_vm0, %v11316_v1 }
  0x2e   : > { %608 = vrot.lane.b32.xlu0 %v533_v3, %s13780_s23  ;;  %10475 = vmatprep.subr.bf16.mxu1 %v11316_v1 }
  0x9c   : > { %v606_v6 = vpop.permute.xlu0 %605  ;;  %v612_v19 = vpop.permute.xlu1 %611 }
  0x9d   : > { %v614_v7 = vpack.c.bf16 %v606_v6, %v606_v6  ;;  %v11513_v20 = vpack.c.bf16 %v612_v19, %v612_v19 }
  0x9f   : > { %v681_v8 = vsel %vm631_vm2, %v614_v7, 0  ;;  %v773_v25 = vsel %vm631_vm2, %v11513_v20, 0  ;;  %v930_v28 = vsel %vm884_vm3, %v614_v7, 0 }
  0xa0   : > { %10470 = vmatpush3.bf16.xpose.msra.mxu0 %v681_v8  ;;  %v609_v10 = vpop.permute.xlu0 %608  ;;  %v885_v8 = vsel %vm884_vm3, %v11485_v4, 0 }
  0xa1   : > { %10481 = vmatprep.subr.bf16.mxu0 %v11316_v1  ;;  %v11502_v11 = vpack.c.bf16 %v609_v10, %v609_v10 }
  0xa3   : > { %v727_v16 = vsel %vm631_vm2, %v11502_v11, 0  ;;  %v975_v29 = vsel %vm884_vm3, %v11502_v11, 0 }
  0xec   : > { %v598_v12 = vpop.f32.mrf.mxu0 }
  0xed   : > { %v599_v13 = vadd.f32 %v8695_v9, %v598_v12 }
  0xee   : > { %v10461_v14 = vpop.f32.mrf.mxu0 }
  0xef   : > { %621 = vrot.lane.b32.xlu0 %v599_v13, %s13780_s23  ;;  %618 = vrot.lane.b32.xlu1 %v599_v13, %s13778_s25  ;;  %v627_v15 = vpack.c.bf16 %v599_v13, %v599_v13  ;;  %s13786_s25 = smov 8   ;;  %s13782_s23 = smov 24  }
  0xf0   : > { %v601_v17 = vpop.f32.mrf.mxu0 }
  0xf1   : > { %10466 = vmatmul.mubr.msk.bf16.vlgmr.msra.gmra.mxu1 %vm631_vm2, %v627_v15 }
  0xf2   : > { %v10462_v18 = vpop.f32.mrf.mxu0  ;;  %10476 = vmatpush3.bf16.xpose.msra.mxu1 %v727_v16  ;;  %10477 = vmatprep.mubr.msk.bf16.mxu1 %vm11317_vm0, %v11316_v1 }
  0xf3   : > { %624 = vrot.lane.b32.xlu1 %v599_v13, %s13776_s27  ;;  %10487 = vmatprep.subr.bf16.mxu1 %v11316_v1  ;;  %s531_s27 = scalar_lea.vmem %s13822_s1, %s11475_s26  ;;  %s13828_s1 = smov 104  }
  0xf4   : > { %v534_v30 = vld [vmem:[%s531_s27] sm:$0x1]  ;;  %s11564_s27 = sand.u32 1, %s11306_s19   ;;  %s13830_s19 = smov 8  }
  0xf5   : > { %vm535_vm4 = vcmp.eq.f32.partialorder %v534_v30, 0.0  ;;  %13825 = sst [smem:[#allocation20_spill]] %s11564_s27  ;;  %s11567_s26 = sshll.u32 %s11564_s27, 5 }
  0xf6   : > { %v819_v34 = vsel %vm535_vm4, 1, %v11321_v33  ;;  %s11570_s30 = scalar_lea.vmem [#allocation4], %s11567_s26  ;;  %s12285_s21 = scalar_lea.vmem [#allocation6], %s11567_s26 }
  0xf7   : > { %v823_v35 = vrot.slane %v819_v34, %v11536_v32  ;;  %13829 = sst [smem:[#allocation21_spill]] %s12285_s21  ;;  %s11174_s27 = scalar_lea.vmem %s11173_s15, 1024 }
  0xf9   : > { %vm11540_vm5 = vcmp.eq.s32.totalorder %v823_v35, 1 }
 0x161   : > { %v622_v21 = vpop.permute.xlu0 %621  ;;  %v619_v22 = vpop.permute.xlu1 %618 }
 0x162   : > { %v629_v23 = vpack.c.bf16 %v622_v21, %v622_v21  ;;  %v628_v24 = vpack.c.bf16 %v619_v22, %v619_v22 }
 0x164   : > { %10472 = vmatmul.mubr.msk.bf16.vlgmr.msra.gmra.mxu0 %vm631_vm2, %v628_v24  ;;  %10478 = vmatmul.mubr.msk.bf16.vlgmr.msra.gmra.mxu1 %vm631_vm2, %v629_v23 }
 0x165   : > { %10482 = vmatpush3.bf16.xpose.msra.mxu0 %v773_v25  ;;  %10483 = vmatprep.mubr.msk.bf16.mxu0 %vm11317_vm0, %v11316_v1  ;;  %v625_v26 = vpop.permute.xlu1 %624 }
 0x166   : > { %10493 = vmatprep.subr.bf16.mxu0 %v11316_v1  ;;  %10489 = vmatprep.mubr.msk.bf16.mxu1 %vm11317_vm0, %v11316_v1  ;;  %v630_v27 = vpack.c.bf16 %v625_v26, %v625_v26 }
 0x167   : > { %10488 = vmatpush3.bf16.msra.mxu1 %v885_v8 }
 0x168   : > { %10499 = vmatprep.subr.bf16.mxu1 %v11316_v1 }
 0x16c   : > { %10484 = vmatmul.mubr.msk.bf16.vlgmr.msra.gmra.mxu0 %vm631_vm2, %v630_v27 }
 0x16d   : > { %10494 = vmatpush3.bf16.msra.mxu0 %v930_v28  ;;  %10495 = vmatprep.mubr.msk.bf16.mxu0 %vm11317_vm0, %v11316_v1 }
 0x16e   : > { %10505 = vmatprep.subr.bf16.mxu0 %v11316_v1 }
 0x1b1   : > { %v671_v37 = vpop.f32.mrf.mxu1 }
 0x1b2   : > { %v815_v38 = vmul.f32 0.35355338, %v671_v37 }
 0x1b3   : > { %v10467_v39 = vpop.f32.mrf.mxu1 }
 0x1b4   : > { %v825_v40 = vsel %vm11540_vm5, -1e+09, %v815_v38 }
 0x1b5   : > { %v674_v41 = vpop.f32.mrf.mxu1  ;;  %v829_v42 = vsel %vm631_vm2, %v825_v40, -inf }
 0x1b6   : > { %830 = vmax.xlane.f32.xlu0 %v829_v42  ;;  %v1020_v42 = vsel %vm884_vm3, %v11513_v20, 0 }
 0x1b7   : > { %v10468_v43 = vpop.f32.mrf.mxu1 }
 0x224   : > { %v717_v44 = vpop.f32.mrf.mxu0  ;;  %v763_v45 = vpop.f32.mrf.mxu1 }
 0x225   : > { %v816_v46 = vmul.f32 0.35355338, %v717_v44  ;;  %v817_v47 = vmul.f32 0.35355338, %v763_v45 }
 0x226   : > { %v10473_v48 = vpop.f32.mrf.mxu0  ;;  %v10479_v49 = vpop.f32.mrf.mxu1 }
 0x227   : > { %v827_v50 = vsel %vm11540_vm5, -1e+09, %v817_v47  ;;  %v826_v51 = vsel %vm11540_vm5, -1e+09, %v816_v46 }
 0x228   : > { %v720_v52 = vpop.f32.mrf.mxu0  ;;  %v766_v53 = vpop.f32.mrf.mxu1  ;;  %v835_v54 = vsel %vm631_vm2, %v827_v50, -inf  ;;  %v832_v55 = vsel %vm631_vm2, %v826_v51, -inf }
 0x229   : > { %836 = vmax.xlane.f32.xlu0 %v835_v54  ;;  %833 = vmax.xlane.f32.xlu1 %v832_v55 }
 0x22a   : > { %v10474_v56 = vpop.f32.mrf.mxu0  ;;  %v10480_v57 = vpop.f32.mrf.mxu1 }
 0x22c   : > { %v809_v58 = vpop.f32.mrf.mxu0 }
 0x22d   : > { %v818_v59 = vmul.f32 0.35355338, %v809_v58 }
 0x22e   : > { %v10485_v60 = vpop.f32.mrf.mxu0 }
 0x22f   : > { %v828_v61 = vsel %vm11540_vm5, -1e+09, %v818_v59 }
 0x230   : > { %v812_v62 = vpop.f32.mrf.mxu0  ;;  %v838_v63 = vsel %vm631_vm2, %v828_v61, -inf }
 0x231   : > { %839 = vmax.xlane.f32.xlu0 %v838_v63 }
 0x232   : > { %v10486_v0 = vpop.f32.mrf.mxu0 }
 0x23f   : > { %v831_v2 = vpop.xlane.xlu0 %830 }
 0x240   : > { %v841_v3 = vsub.f32 %v825_v40, %v831_v2 }
 0x242   : > { %v845_v5 = vmul.f32 1.442695, %v841_v3 }
 0x244   : > { %11077 = vpow2.f32 %v845_v5  ;;  %v11161_v5 = vld [vmem:[%s11481_s17] sm:$0xff] }
 0x251   : > { %v11078_v6 = vpop.eup %11077 }
 0x252   : > { %v853_v7 = vsel %vm631_vm2, %v11078_v6, 0.0 }
 0x253   : > { %854 = vadd.xlane.f32.xlu1 %v853_v7 }
 0x2b2   : > { %v837_v9 = vpop.xlane.xlu0 %836  ;;  %v834_v10 = vpop.xlane.xlu1 %833 }
 0x2b3   : > { %v843_v12 = vsub.f32 %v827_v50, %v837_v9  ;;  %v842_v13 = vsub.f32 %v826_v51, %v834_v10 }
 0x2b5   : > { %v849_v14 = vmul.f32 1.442695, %v843_v12  ;;  %v847_v15 = vmul.f32 1.442695, %v842_v13 }
 0x2b7   : > { %11079 = vpow2.f32 %v849_v14 }
 0x2b8   : > { %11081 = vpow2.f32 %v847_v15 }
 0x2ba   : > { %v840_v16 = vpop.xlane.xlu0 %839 }
 0x2bb   : > { %v844_v17 = vsub.f32 %v828_v61, %v840_v16 }
 0x2bd   : > { %v851_v18 = vmul.f32 1.442695, %v844_v17 }
 0x2bf   : > { %11083 = vpow2.f32 %v851_v18 }
 0x2c4   : > { %v11080_v19 = vpop.eup %11079 }
 0x2c5   : > { %v11082_v21 = vpop.eup %11081  ;;  %v859_v4 = vsel %vm631_vm2, %v11080_v19, 0.0 }
 0x2c6   : > { %860 = vadd.xlane.f32.xlu1 %v859_v4  ;;  %v856_v22 = vsel %vm631_vm2, %v11082_v21, 0.0 }
 0x2c7   : > { %857 = vadd.xlane.f32.xlu0 %v856_v22  ;;  %v8707_v22 = vld [vmem:[%s13763_s4] ss:$0 sm:$0xff] }
 0x2cc   : > { %v11084_v23 = vpop.eup %11083 }
 0x2cd   : > { %v862_v24 = vsel %vm631_vm2, %v11084_v23, 0.0 }
 0x2ce   : > { %863 = vadd.xlane.f32.xlu0 %v862_v24 }
 0x2dc   : > { %v855_v25 = vpop.xlane.xlu1 %854 }
 0x2dd   : > { %11085 = vrcp.f32 %v855_v25  ;;  %v8708_v25 = vld [vmem:[%s13764_s5] ss:$0 sm:$0xff] }
 0x2ea   : > { %v11086_v26 = vpop.eup %11085 }
 0x2eb   : > { %v869_v27 = vmul.f32 %v11086_v26, %v11078_v6 }
 0x2ed   : > { %873 = vst.msk [vmem:[%s11570_s30] sm:$0xff] %vm631_vm2, %v869_v27  ;;  %v877_v28 = vpack.c.bf16 %v869_v27, %v869_v27 }
 0x2ef   : > { %10490 = vmatmul.mubr.msk.bf16.vlgmr.msra.gmra.mxu1 %vm631_vm2, %v877_v28 }
 0x2f0   : > { %10500 = vmatpush3.bf16.msra.mxu1 %v975_v29  ;;  %10501 = vmatprep.mubr.msk.bf16.mxu1 %vm11317_vm0, %v11316_v1 }
 0x34f   : > { %v861_v30 = vpop.xlane.xlu1 %860 }
 0x350   : > { %11087 = vrcp.f32 %v861_v30  ;;  %v858_v34 = vpop.xlane.xlu0 %857 }
 0x351   : > { %11089 = vrcp.f32 %v858_v34 }
 0x357   : > { %v864_v35 = vpop.xlane.xlu0 %863 }
 0x358   : > { %11091 = vrcp.f32 %v864_v35 }
 0x35d   : > { %v11088_v37 = vpop.eup %11087 }
 0x35e   : > { %v11090_v38 = vpop.eup %11089  ;;  %v871_v39 = vmul.f32 %v11088_v37, %v11080_v19 }
 0x35f   : > { %v870_v40 = vmul.f32 %v11090_v38, %v11082_v21  ;;  %v1159_v38 = vld [vmem:[%s13767_s8 + $0x80] sm:$0xff] }
 0x360   : > { %875 = vst.msk [vmem:[%s11570_s30 + $0x10] sm:$0xff] %vm631_vm2, %v871_v39  ;;  %v879_v11 = vpack.c.bf16 %v871_v39, %v871_v39  ;;  %v1161_v39 = vld [vmem:[%s13767_s8 + $0xc0] sm:$0xff] }
 0x361   : > { %874 = vst.msk [vmem:[%s11570_s30 + $0x8] sm:$0xff] %vm631_vm2, %v870_v40  ;;  %v878_v41 = vpack.c.bf16 %v870_v40, %v870_v40  ;;  %v1160_v40 = vld [vmem:[%s13767_s8 + $0x88] sm:$0xff] }
 0x362   : > { %10502 = vmatmul.mubr.msk.bf16.vlgmr.msra.gmra.mxu1 %vm631_vm2, %v879_v11  ;;  %v8715_v11 = vcombine.low %v1159_v38, %v1161_v39 }
 0x363   : > { %10496 = vmatmul.mubr.msk.bf16.vlgmr.msra.gmra.mxu0 %vm631_vm2, %v878_v41  ;;  %1260 = vmatprep.mubr.bf16.mxu1 %v11321_v33  ;;  %v8716_v41 = vcombine.high %v1159_v38, %v1161_v39  ;;  %v10700_v38 = vld [vmem:[%s13769_s10 + $0x1a8] sm:$0xff]   ;;  %v10701_v39 = vld [vmem:[%s13769_s10 + $0x160] sm:$0xff]  }
 0x364   : > { %10506 = vmatpush3.bf16.msra.mxu0 %v1020_v42  ;;  %10507 = vmatprep.mubr.msk.bf16.mxu0 %vm11317_vm0, %v11316_v1  ;;  %v1162_v42 = vld [vmem:[%s13767_s8 + $0xc8] sm:$0xff] }
 0x365   : > { %v11092_v43 = vpop.eup %11091  ;;  %1240 = vmatprep.subr.bf16.mxu1 %v8716_v41  ;;  %v10704_v41 = vld [vmem:[%s13769_s10 + $0x1a0] sm:$0xff]  }
 0x366   : > { %v872_v44 = vmul.f32 %v11092_v43, %v11084_v23  ;;  %v1155_v43 = vld [vmem:[%s13767_s8] sm:$0xff]  ;;  %1241 = vmatpush1.bf16.msra.mxu1 %v8715_v11 }
 0x367   : > { %v10703_v11 = vld [vmem:[%s13769_s10 + $0x120] sm:$0xff]  }
 0x368   : > { %876 = vst.msk [vmem:[%s11570_s30 + $0x18] sm:$0xff] %vm631_vm2, %v872_v44  ;;  %v880_v45 = vpack.c.bf16 %v872_v44, %v872_v44  ;;  %v1157_v44 = vld [vmem:[%s13767_s8 + $0x40] sm:$0xff] }
 0x36b   : > { %10508 = vmatmul.mubr.msk.bf16.vlgmr.msra.gmra.mxu0 %vm631_vm2, %v880_v45  ;;  %v8717_v45 = vcombine.low %v1160_v40, %v1162_v42 }
 0x36c   : > { %1301 = vmatprep.mubr.bf16.mxu0 %v11321_v33 }
 0x3af   : > { %v921_v46 = vpop.f32.mrf.mxu1 }
 0x3b1   : > { %v10491_v47 = vpop.f32.mrf.mxu1 }
 0x3b2   : > { %v8712_v47 = vcombine.high %v1155_v43, %v1157_v44 }
 0x3b3   : > { %v924_v20 = vpop.f32.mrf.mxu1 }
 0x3b4   : > { %v1156_v20 = vld [vmem:[%s13767_s8 + $0x8] sm:$0xff]  ;;  %1242 = vmatprep.subr.bf16.mxu1 %v8712_v47  ;;  %v10710_v47 = vld [vmem:[%s13769_s10 + $0x1d0] sm:$0xff]  }
 0x3b5   : > { %v10492_v48 = vpop.f32.mrf.mxu1 }
 0x3b6   : > { %v1158_v48 = vld [vmem:[%s13767_s8 + $0x48] sm:$0xff] }
 0x422   : > { %v1011_v49 = vpop.f32.mrf.mxu1 }
 0x423   : > { %v966_v50 = vpop.f32.mrf.mxu0  ;;  %1067 = vrot.lane.b32.xlu0 %v1011_v49, %s13784_s16  ;;  %v8714_v49 = vcombine.high %v1156_v20, %v1158_v48  ;;  %s8490_s16 = sshll.u32 %s11570_s30, 4  ;;  %s13626_s16 = int_to_ptr.vmem [resolvable:$true] %s8490_s16 }
 0x424   : > { %1063 = vrot.lane.b32.xlu1 %v966_v50, %s13786_s25  ;;  %v10503_v51 = vpop.f32.mrf.mxu1  ;;  %v8711_v50 = vcombine.low %v1155_v43, %v1157_v44  ;;  %v10706_v43 = vld [vmem:[%s13769_s10 + $0x1d8] sm:$0xff]   ;;  %s13826_s25 = smov 112   ;;  %s11168_s28 = scalar_lea.vmem %s13626_s16, 512 }
 0x425   : > { %v10497_v52 = vpop.f32.mrf.mxu0  ;;  %v8713_v51 = vcombine.low %v1156_v20, %v1158_v48  ;;  %v10707_v44 = vld [vmem:[%s13769_s10 + $0x118] sm:$0xff]   ;;  %v10711_v20 = vld [vmem:[%s13769_s10 + $0x110] sm:$0xff]   ;;  %p11169_p11 = scmp.ne.s32.totalorder %s13626_s16, %s11168_s28  ;;  %p11175_p0 = scmp.lt.s32.totalorder %s13626_s16, %s11173_s15 }
 0x426   : > { %v1014_v53 = vpop.f32.mrf.mxu1  ;;  %1243 = vmatpush1.bf16.msra.mxu1 %v8711_v50  ;;  %v1386_v52 = vld [vmem:[%s13767_s8 + $0x90] sm:$0xff]  ;;  %v10714_v50 = vld [vmem:[%s13769_s10 + $0x1c8] sm:$0xff]   ;;  %p11176_p1 = scmp.lt.s32.totalorder %s11174_s27, %s11168_s28 }
 0x427   : > { %v969_v54 = vpop.f32.mrf.mxu0  ;;  %v1388_v53 = vld [vmem:[%s13767_s8 + $0xd0] sm:$0xff]  ;;  %p11170_p12 = pnand %p11169_p11, %p11450_p5 }
 0x428   : > { %v10504_v55 = vpop.f32.mrf.mxu1  ;;  %v1387_v54 = vld [vmem:[%s13767_s8 + $0x98] sm:$0xff]  ;;  %v10712_v48 = vld [vmem:[%s13769_s10 + $0x190] sm:$0xff]   ;;  %p11177_p2 = por %p11176_p1, %p11175_p0 }
 0x429   : > { %v10498_v56 = vpop.f32.mrf.mxu0  ;;  %v8726_v55 = vcombine.high %v1386_v52, %v1388_v53  ;;  %p11171_p13 = pneg %p11170_p12 }
 0x42a   : > { %v1389_v56 = vld [vmem:[%s13767_s8 + $0xd8] sm:$0xff] }
 0x42b   : > { %v1056_v57 = vpop.f32.mrf.mxu0  ;;  %1464 = vmatprep.subr.bf16.mxu1 %v8726_v55  ;;  %v10719_v55 = vld [vmem:[%s13769_s10 + $0x100] sm:$0xff]   ;;  %p11178_p3 = pnand %p11177_p2, %p11171_p13 }
 0x42c   : > { %1071 = vrot.lane.b32.xlu1 %v1056_v57, %s13782_s23  ;;  %v8725_v57 = vcombine.low %v1386_v52, %v1388_v53  ;;  %v10716_v52 = vld [vmem:[%s13769_s10 + $0x188] sm:$0xff]   ;;  %v10717_v53 = vld [vmem:[%s13769_s10 + $0x140] sm:$0xff]  }
 0x42d   : > { %v10509_v58 = vpop.f32.mrf.mxu0 }
 0x42e   : > { %v8727_v58 = vcombine.low %v1387_v54, %v1389_v56 }
 0x42f   : > { %v1059_v59 = vpop.f32.mrf.mxu0 }
 0x430   : > { %v8728_v59 = vcombine.high %v1387_v54, %v1389_v56  ;;  %v10718_v54 = vld [vmem:[%s13769_s10 + $0x1c0] sm:$0xff]  }
 0x431   : > { %v10510_v60 = vpop.f32.mrf.mxu0  ;;  %v10720_v56 = vld [vmem:[%s13769_s10 + $0x180] sm:$0xff]  }
 0x495   : > { %v1068_v62 = vpop.permute.xlu0 %1067 }
 0x496   : > { %v1064_v61 = vpop.permute.xlu1 %1063 }
 0x497   : > { %v1074_v63 = vsel %vm631_vm2, %v921_v46, %v1064_v61  ;;  %v8718_v46 = vcombine.high %v1160_v40, %v1162_v42  ;;  %v10702_v40 = vld [vmem:[%s13769_s10 + $0x1e0] sm:$0xff]   ;;  %v10705_v42 = vld [vmem:[%s13769_s10 + $0x158] sm:$0xff]  }
 0x498   : > { %v1076_v0 = vsel %vm1075_vm6, %v1074_v63, %v1068_v62 }
 0x499   : > { %1281 = vmatprep.subr.bf16.mxu0 %v8718_v46  ;;  %v10709_v46 = vld [vmem:[%s13769_s10 + $0x150] sm:$0xff]  }
 0x49a   : > { %1282 = vmatpush1.bf16.msra.mxu0 %v8717_v45  ;;  %v10708_v45 = vld [vmem:[%s13769_s10 + $0x198] sm:$0xff]  }
 0x49b   : > { %1283 = vmatprep.subr.bf16.mxu0 %v8714_v49  ;;  %v10713_v49 = vld [vmem:[%s13769_s10 + $0x148] sm:$0xff]  }
 0x49e   : > { %v1072_v2 = vpop.permute.xlu1 %1071  ;;  %1284 = vmatpush1.bf16.msra.mxu0 %v8713_v51  ;;  %v10715_v51 = vld [vmem:[%s13769_s10 + $0x108] sm:$0xff]  }
 0x49f   : > { %v1078_v3 = vsel %vm1077_vm7, %v1076_v0, %v1072_v2  ;;  %1505 = vmatprep.subr.bf16.mxu0 %v8728_v59 }
 0x4a0   : > { %v1079_v6 = vadd.f32 %v11161_v5, %v1078_v3 }
 0x4a2   : > { %v1082_v7 = vsel %vm560_vm1, %v1079_v6, 0.0 }
 0x4a3   : > { %1083 = vadd.xlane.f32.xlu1 %v1082_v7 }
 0x52c   : > { %v1084_v8 = vpop.xlane.xlu1 %1083 }
 0x52d   : > { %v1086_v9 = vmul.f32 0.03125, %v1084_v8 }
 0x52f   : > { %v1087_v10 = vsub.f32 %v1079_v6, %v1086_v9  ;;  %v8709_v6 = vld [vmem:[%s13765_s6] ss:$0 sm:$0xff] }
 0x530   : > { %v8710_v9 = vld [vmem:[%s13766_s7] ss:$0 sm:$0xff] }
 0x531   : > { %v1088_v12 = vmul.f32 %v1087_v10, %v1087_v10  ;;  %v1109_v23 = vmul.f32 %v8707_v22, %v1087_v10  ;;  %v10689_v22 = vld [vmem:[%s13769_s10 + $0x178] sm:$0xff]  }
 0x533   : > { %v1089_v13 = vsel %vm560_vm1, %v1088_v12, 0.0  ;;  %v1382_v12 = vld [vmem:[%s13767_s8 + $0x10] sm:$0xff] }
 0x534   : > { %1090 = vadd.xlane.f32.xlu0 %v1089_v13  ;;  %v1384_v13 = vld [vmem:[%s13767_s8 + $0x50] sm:$0xff] }
 0x5bd   : > { %v1091_v14 = vpop.xlane.xlu0 %1090 }
 0x5be   : > { %v1093_v15 = vmul.f32 0.032258064, %v1091_v14  ;;  %v1383_v14 = vld [vmem:[%s13767_s8 + $0x18] sm:$0xff] }
 0x5c0   : > { %11093 = vrsqrt.f32 %v1093_v15  ;;  %vm1096_vm8 = vcmp.eq.f32.partialorder %v1093_v15, inf  ;;  %v1099_v18 = vand.u32 2147483648, %v1093_v15  ;;  %vm1098_vm9 = vcmp.eq.f32.partialorder %v1093_v15, 0.0 }
 0x5cd   : > { %v11094_v16 = vpop.eup %11093 }
 0x5ce   : > { %v1095_v17 = vmul.f32 %v11094_v16, %v1093_v15 }
 0x5d0   : > { %v1097_v19 = vsel %vm1096_vm8, %v1093_v15, %v1095_v17  ;;  %v1385_v15 = vld [vmem:[%s13767_s8 + $0x58] sm:$0xff] }
 0x5d1   : > { %v1100_v21 = vsel %vm1098_vm9, %v1099_v18, %v1097_v19  ;;  %v8722_v18 = vcombine.high %v1382_v12, %v1384_v13  ;;  %v8724_v19 = vcombine.high %v1383_v14, %v1385_v15 }
 0x5d2   : > { %v1101_v4 = vadd.f32 1e-06, %v1100_v21  ;;  %v8721_v21 = vcombine.low %v1382_v12, %v1384_v13 }
 0x5d4   : > { %11095 = vrcp.f32 %v1101_v4  ;;  %v8723_v4 = vcombine.low %v1383_v14, %v1385_v15 }
 0x5e1   : > { %v11096_v24 = vpop.eup %11095 }
 0x5e2   : > { %v1110_v26 = vmul.f32 %v11096_v24, %v1109_v23  ;;  %v10690_v23 = vld [vmem:[%s13769_s10 + $0x1f8] sm:$0xff]  }
 0x5e3   : > { %v10691_v24 = vld [vmem:[%s13769_s10 + $0x138] sm:$0xff]  }
 0x5e4   : > { %v11609_v27 = vadd.f32 %v8708_v25, %v1110_v26  ;;  %v10692_v25 = vld [vmem:[%s13769_s10 + $0x1b8] sm:$0xff]   ;;  %v10693_v26 = vld [vmem:[%s13769_s10 + $0x170] sm:$0xff]  }
 0x5e6   : > { %v1120_v28 = vsel %vm560_vm1, %v11609_v27, 0.0 }
 0x5e7   : > { %1121 = vadd.xlane.f32.xlu0 %v1120_v28  ;;  %v10694_v28 = vld [vmem:[%s13769_s10 + $0x1f0] sm:$0xff]  }
 0x670   : > { %v1122_v29 = vpop.xlane.xlu0 %1121 }
 0x671   : > { %v1123_v30 = vmul.f32 0.03125, %v1122_v29  ;;  %v10695_v29 = vld [vmem:[%s13769_s10 + $0x130] sm:$0xff]  }
 0x673   : > { %v1124_v34 = vsub.f32 %v11609_v27, %v1123_v30  ;;  %v10696_v30 = vld [vmem:[%s13769_s10 + $0x1b0] sm:$0xff]  }
 0x675   : > { %v1125_v35 = vmul.f32 %v1124_v34, %v1124_v34  ;;  %v1145_v7 = vmul.f32 %v8709_v6, %v1124_v34  ;;  %v10697_v34 = vld [vmem:[%s13769_s10 + $0x168] sm:$0xff]  }
 0x677   : > { %v1126_v37 = vsel %vm560_vm1, %v1125_v35, 0.0  ;;  %v10698_v35 = vld [vmem:[%s13769_s10 + $0x1e8] sm:$0xff]  }
 0x678   : > { %1127 = vadd.xlane.f32.xlu1 %v1126_v37  ;;  %v10699_v37 = vld [vmem:[%s13769_s10 + $0x128] sm:$0xff]  }
 0x701   : > { %v1128_v60 = vpop.xlane.xlu1 %1127 }
 0x702   : > { %v1129_v61 = vmul.f32 0.032258064, %v1128_v60 }
 0x704   : > { %11097 = vrsqrt.f32 %v1129_v61  ;;  %vm1132_vm10 = vcmp.eq.f32.partialorder %v1129_v61, inf  ;;  %v1135_v0 = vand.u32 2147483648, %v1129_v61  ;;  %vm1134_vm11 = vcmp.eq.f32.partialorder %v1129_v61, 0.0 }
 0x711   : > { %v11098_v62 = vpop.eup %11097 }
 0x712   : > { %v1131_v63 = vmul.f32 %v11098_v62, %v1129_v61 }
 0x714   : > { %v1133_v2 = vsel %vm1132_vm10, %v1129_v61, %v1131_v63  ;;  %v11788_v61 = vsub.s32 1, %v11533_v31  ;;  %v11791_v63 = vsub.s32 3, %v11533_v31 }
 0x715   : > { %v1136_v3 = vsel %vm1134_vm11, %v1135_v0, %v1133_v2  ;;  %v1390_v2 = vld [vmem:[%s13768_s9 + $0x4] sm:$0xf] }
 0x716   : > { %v1137_v5 = vadd.f32 1e-06, %v1136_v3  ;;  %v11797_v3 = vsub.s32 2, %v11533_v31  ;;  %v1399_v14 = vrot.slane %v1390_v2, %v11788_v61  ;;  %v1407_v15 = vrot.slane %v1390_v2, %v11791_v63 }
 0x718   : > { %11099 = vrcp.f32 %v1137_v5 }
 0x725   : > { %v11100_v8 = vpop.eup %11099 }
 0x726   : > { %v1146_v10 = vmul.f32 %v11100_v8, %v1145_v7  ;;  %v11802_v7 = vld [vmem:[%s13768_s9] sm:$0xf]  ;;  %v1395_v8 = vrot.slane %v1390_v2, %v11536_v32 }
 0x727   : > { %v1180_v12 = vrot.slane %v11802_v7, %v11791_v63 }
 0x728   : > { %v1153_v16 = vadd.f32 %v8710_v9, %v1146_v10  ;;  %v1403_v9 = vrot.slane %v1390_v2, %v11797_v3  ;;  %v1172_v10 = vrot.slane %v11802_v7, %v11788_v61  ;;  %v10738_v2 = vld [vmem:[%s13769_s10 + $0xd8] sm:$0xff]  }
 0x72a   : > { %v11669_v17 = vpack.c.bf16 %v1153_v16, %v1153_v16 }
 0x72c   : > { %8719 = vmatmul.mubr.msk.bf16.vlgmr.msra.gmra.mxu1 %vm560_vm1, %v11669_v17  ;;  %8720 = vmatmul.mubr.msk.bf16.vlgmr.msra.gmra.mxu0 %vm560_vm1, %v11669_v17 }
 0x72d   : > { %1465 = vmatpush1.bf16.msra.mxu1 %v8725_v57  ;;  %1506 = vmatpush1.bf16.msra.mxu0 %v8727_v58  ;;  %v10721_v57 = vld [vmem:[%s13769_s10 + $0x78] sm:$0xff]  }
 0x72e   : > { %1466 = vmatprep.subr.bf16.mxu1 %v8722_v18  ;;  %1507 = vmatprep.subr.bf16.mxu0 %v8724_v19  ;;  %v10722_v58 = vld [vmem:[%s13769_s10 + $0xf8] sm:$0xff]  }
 0x72f   : > { %1484 = vmatprep.mubr.bf16.mxu1 %v11321_v33  ;;  %1525 = vmatprep.mubr.bf16.mxu0 %v11321_v33 }
 0x731   : > { %1467 = vmatpush1.bf16.msra.mxu1 %v8721_v21  ;;  %1508 = vmatpush1.bf16.msra.mxu0 %v8723_v4 }
 0x732   : > { %9889 = vmatprep.subr.bf16.mxu1 %v10689_v22  ;;  %9911 = vmatprep.subr.bf16.mxu0 %v10690_v23 }
 0x734   : > { %8729 = vmatmul.mubr.msk.bf16.vlgmr.msra.gmra.mxu1 %vm560_vm1, %v11669_v17  ;;  %8730 = vmatmul.mubr.msk.bf16.vlgmr.msra.gmra.mxu0 %vm560_vm1, %v11669_v17 }
 0x735   : > { %9890 = vmatpush3.bf16.msra.mxu1 %v10691_v24  ;;  %9912 = vmatpush3.bf16.msra.mxu0 %v10692_v25 }
 0x736   : > { %9891 = vmatprep.subr.bf16.mxu1 %v10693_v26  ;;  %9913 = vmatprep.subr.bf16.mxu0 %v10694_v28 }
 0x739   : > { %9892 = vmatpush3.bf16.msra.mxu1 %v10695_v29  ;;  %9914 = vmatpush3.bf16.msra.mxu0 %v10696_v30 }
 0x73a   : > { %9893 = vmatprep.subr.bf16.mxu1 %v10697_v34  ;;  %9915 = vmatprep.subr.bf16.mxu0 %v10698_v35 }
 0x73d   : > { %9894 = vmatpush3.bf16.msra.mxu1 %v10699_v37  ;;  %9916 = vmatpush3.bf16.msra.mxu0 %v10700_v38 }
 0x73e   : > { %9895 = vmatprep.subr.bf16.mxu1 %v10701_v39  ;;  %9917 = vmatprep.subr.bf16.mxu0 %v10702_v40 }
 0x741   : > { %9896 = vmatpush3.bf16.msra.mxu1 %v10703_v11  ;;  %9918 = vmatpush3.bf16.msra.mxu0 %v10704_v41 }
 0x742   : > { %9897 = vmatprep.subr.bf16.mxu1 %v10705_v42  ;;  %9919 = vmatprep.subr.bf16.mxu0 %v10706_v43  ;;  %v10723_v43 = vld [vmem:[%s13769_s10 + $0x38] sm:$0xff]  }
 0x745   : > { %9898 = vmatpush3.bf16.msra.mxu1 %v10707_v44  ;;  %9920 = vmatpush3.bf16.msra.mxu0 %v10708_v45  ;;  %v10724_v44 = vld [vmem:[%s13769_s10 + $0xb8] sm:$0xff]  }
 0x746   : > { %9899 = vmatprep.subr.bf16.mxu1 %v10709_v46  ;;  %9921 = vmatprep.subr.bf16.mxu0 %v10710_v47  ;;  %v10725_v47 = vld [vmem:[%s13769_s10 + $0x70] sm:$0xff]  }
 0x749   : > { %9900 = vmatpush3.bf16.msra.mxu1 %v10711_v20  ;;  %9922 = vmatpush3.bf16.msra.mxu0 %v10712_v48  ;;  %v10726_v20 = vld [vmem:[%s13769_s10 + $0xf0] sm:$0xff]  }
 0x74a   : > { %9901 = vmatprep.subr.bf16.mxu1 %v10713_v49  ;;  %9923 = vmatprep.subr.bf16.mxu0 %v10714_v50  ;;  %v10727_v50 = vld [vmem:[%s13769_s10 + $0x30] sm:$0xff]  }
 0x74d   : > { %9902 = vmatpush3.bf16.msra.mxu1 %v10715_v51  ;;  %9924 = vmatpush3.bf16.msra.mxu0 %v10716_v52  ;;  %v10728_v51 = vld [vmem:[%s13769_s10 + $0xb0] sm:$0xff]   ;;  %v10729_v52 = vld [vmem:[%s13769_s10 + $0x68] sm:$0xff]  }
 0x74e   : > { %9903 = vmatprep.subr.bf16.mxu1 %v10717_v53  ;;  %9925 = vmatprep.subr.bf16.mxu0 %v10718_v54  ;;  %v10730_v53 = vld [vmem:[%s13769_s10 + $0xe8] sm:$0xff]  }
 0x74f   : > { %v10731_v54 = vld [vmem:[%s13769_s10 + $0x28] sm:$0xff]  }
 0x751   : > { %9904 = vmatpush3.bf16.msra.mxu1 %v10719_v55  ;;  %9926 = vmatpush3.bf16.msra.mxu0 %v10720_v56  ;;  %v10732_v55 = vld [vmem:[%s13769_s10 + $0xa8] sm:$0xff]   ;;  %v10733_v56 = vld [vmem:[%s13769_s10 + $0x60] sm:$0xff]  }
 0x752   : > { %9933 = vmatprep.subr.bf16.mxu1 %v10721_v57  ;;  %9955 = vmatprep.subr.bf16.mxu0 %v10722_v58  ;;  %v10734_v57 = vld [vmem:[%s13769_s10 + $0xe0] sm:$0xff]  }
 0x753   : > { %v10735_v58 = vld [vmem:[%s13769_s10 + $0x20] sm:$0xff]  }
 0x7ec   : > { %v11783_v59 = vpop.f32.mrf.mxu1  ;;  %v11785_v60 = vpop.f32.mrf.mxu0 }
 0x7ee   : > { %v1264_v62 = vpop.f32.mrf.mxu1  ;;  %v1305_v0 = vpop.f32.mrf.mxu0 }
 0x7ef   : > { %v1265_v4 = vadd.f32 %v1264_v62, %v1172_v10  ;;  %v1306_v22 = vadd.f32 %v1305_v0, %v1180_v12  ;;  %v10736_v62 = vld [vmem:[%s13769_s10 + $0xa0] sm:$0xff]   ;;  %v10737_v0 = vld [vmem:[%s13769_s10 + $0x58] sm:$0xff]   ;;  %v10743_v10 = vld [vmem:[%s13769_s10 + $0x10] sm:$0xff]  }
 0x7f0   : > { %v1266_v5 = vpop.f32.mrf.mxu1  ;;  %v1307_v6 = vpop.f32.mrf.mxu0  ;;  %v10744_v12 = vld [vmem:[%s13769_s10 + $0x90] sm:$0xff]  }
 0x7f1   : > { %v1311_v38 = vmax.f32 %v1265_v4, 0.0  ;;  %v1313_v39 = vmax.f32 %v1306_v22, 0.0  ;;  %v10739_v5 = vld [vmem:[%s13769_s10 + $0x18] sm:$0xff]   ;;  %v10750_v4 = vld [vmem:[%s13769_s10 + $0xc0] sm:$0xff]  }
 0x7f2   : > { %v1267_v13 = vpop.f32.mrf.mxu1  ;;  %v1308_v31 = vpop.f32.mrf.mxu0  ;;  %v10740_v6 = vld [vmem:[%s13769_s10 + $0x98] sm:$0xff]   ;;  %v2154_v22 = vld [vmem:[%s13767_s8 + $0xa0] sm:$0xff] }
 0x7f3   : > { %v1315_v48 = vpack.c.bf16 %v1311_v38, %v1311_v38  ;;  %v1317_v49 = vpack.c.bf16 %v1313_v39, %v1313_v39  ;;  %v1168_v13 = vrot.slane %v11802_v7, %v11536_v32  ;;  %v1176_v31 = vrot.slane %v11802_v7, %v11797_v3  ;;  %v10748_v7 = vld [vmem:[%s13769_s10 + $0x88] sm:$0xff]  }
 0x7f4   : > { %v1486_v16 = vpop.f32.mrf.mxu1  ;;  %v1527_v18 = vpop.f32.mrf.mxu0  ;;  %v2153_v38 = vld [vmem:[%s13767_s8 + $0x68] sm:$0xff] }
 0x7f5   : > { %v1487_v19 = vadd.f32 %v1486_v16, %v1395_v8  ;;  %v1528_v21 = vadd.f32 %v1527_v18, %v1403_v9  ;;  %v10741_v8 = vld [vmem:[%s13769_s10 + $0x50] sm:$0xff]   ;;  %v10747_v16 = vld [vmem:[%s13769_s10 + $0x8] sm:$0xff]   ;;  %v1263_v18 = vadd.f32 %v11783_v59, %v1168_v13  ;;  %v2156_v59 = vld [vmem:[%s13767_s8 + $0xe0] sm:$0xff] }
 0x7f6   : > { %v1488_v23 = vpop.f32.mrf.mxu1  ;;  %v1529_v24 = vpop.f32.mrf.mxu0  ;;  %v10742_v9 = vld [vmem:[%s13769_s10 + $0xd0] sm:$0xff]   ;;  %v8799_v39 = vcombine.low %v2154_v22, %v2156_v59 }
 0x7f7   : > { %v1489_v25 = vadd.f32 %v1488_v23, %v1399_v14  ;;  %v1530_v26 = vadd.f32 %v1529_v24, %v1407_v15  ;;  %v1534_v28 = vmax.f32 %v1487_v19, 0.0  ;;  %v1536_v29 = vmax.f32 %v1528_v21, 0.0  ;;  %v10745_v14 = vld [vmem:[%s13769_s10 + $0x48] sm:$0xff]   ;;  %v10749_v21 = vld [vmem:[%s13769_s10 + $0x40] sm:$0xff]   ;;  %v10776_v13 = vld [vmem:[%s13769_s10 + $0x290] sm:$0xff]  }
 0x7f8   : > { %v1490_v30 = vpop.f32.mrf.mxu1  ;;  %v1531_v34 = vpop.f32.mrf.mxu0  ;;  %v10746_v15 = vld [vmem:[%s13769_s10 + $0xc8] sm:$0xff]   ;;  %v1304_v19 = vadd.f32 %v11785_v60, %v1176_v31  ;;  %v10751_v24 = vld [vmem:[%s13769_s10] sm:$0xff]  }
 0x7f9   : > { %v1535_v35 = vmax.f32 %v1489_v25, 0.0  ;;  %v1537_v37 = vmax.f32 %v1530_v26, 0.0  ;;  %v1538_v45 = vpack.c.bf16 %v1534_v28, %v1534_v28  ;;  %v1540_v46 = vpack.c.bf16 %v1536_v29, %v1536_v29  ;;  %v2155_v60 = vld [vmem:[%s13767_s8 + $0xa8] sm:$0xff]  ;;  %v10752_v25 = vld [vmem:[%s13769_s10 + $0x80] sm:$0xff]  }
 0x7fa   : > { %v1491_v40 = vpop.f32.mrf.mxu1  ;;  %v1532_v11 = vpop.f32.mrf.mxu0  ;;  %v2157_v23 = vld [vmem:[%s13767_s8 + $0xe8] sm:$0xff]  ;;  %v1310_v26 = vmax.f32 %v1263_v18, 0.0  ;;  %v1312_v28 = vmax.f32 %v1304_v19, 0.0  ;;  %v8800_v29 = vcombine.high %v2154_v22, %v2156_v59  ;;  %v2150_v34 = vld [vmem:[%s13767_s8 + $0x20] sm:$0xff]  ;;  %v12042_v22 = vld [vmem:[%s13767_s8 + $0xf0] sm:$0xff] }
 0x7fb   : > { %v1539_v41 = vpack.c.bf16 %v1535_v35, %v1535_v35  ;;  %v1541_v42 = vpack.c.bf16 %v1537_v37, %v1537_v37  ;;  %v8802_v30 = vcombine.high %v2155_v60, %v2157_v23  ;;  %v2152_v35 = vld [vmem:[%s13767_s8 + $0x60] sm:$0xff]  ;;  %v2151_v37 = vld [vmem:[%s13767_s8 + $0x28] sm:$0xff]  ;;  %v8801_v40 = vcombine.low %v2155_v60, %v2157_v23  ;;  %v12047_v59 = vld [vmem:[%s13767_s8 + $0xb8] sm:$0xff] }
 0x7fc   : > { %v8796_v11 = vcombine.high %v2150_v34, %v2152_v35  ;;  %v10777_v31 = vld [vmem:[%s13769_s10 + $0x248] sm:$0xff]   ;;  %v10782_v18 = vld [vmem:[%s13769_s10 + $0x2c0] sm:$0xff]   ;;  %v12054_v23 = vld [vmem:[%s13767_s8 + $0xf8] sm:$0xff] }
 0x7fd   : > { %1830 = vmatprep.mubr.bf16.mxu1 %v1539_v41  ;;  %1870 = vmatprep.mubr.bf16.mxu0 %v1541_v42  ;;  %v1314_v41 = vpack.c.bf16 %v1310_v26, %v1310_v26  ;;  %v1316_v42 = vpack.c.bf16 %v1312_v28, %v1312_v28  ;;  %v10783_v19 = vld [vmem:[%s13769_s10 + $0x200] sm:$0xff]   ;;  %v8844_v26 = vcombine.high %v12047_v59, %v12054_v23 }
 0x7fe   : > { %1831 = vmatmul.mubr.bf16.vlgmr.msra.gmra.mxu1 %v1538_v45  ;;  %1871 = vmatmul.mubr.bf16.vlgmr.msra.gmra.mxu0 %v1540_v46  ;;  %v8797_v45 = vcombine.low %v2151_v37, %v2153_v38  ;;  %v10753_v46 = vld [vmem:[%s13769_s10 + $0x278] sm:$0xff]  }
 0x7ff   : > { %9934 = vmatpush3.bf16.msra.mxu1 %v10723_v43  ;;  %9956 = vmatpush3.bf16.msra.mxu0 %v10724_v44  ;;  %v8798_v43 = vcombine.high %v2151_v37, %v2153_v38  ;;  %v8795_v44 = vcombine.low %v2150_v34, %v2152_v35 }
 0x800   : > { %2102 = vmatprep.mubr.bf16.mxu1 %v1315_v48  ;;  %2142 = vmatprep.mubr.bf16.mxu0 %v1317_v49  ;;  %v10756_v48 = vld [vmem:[%s13769_s10 + $0x2b8] sm:$0xff]   ;;  %v10757_v49 = vld [vmem:[%s13769_s10 + $0x270] sm:$0xff]  }
 0x801   : > { %9935 = vmatprep.subr.bf16.mxu1 %v10725_v47  ;;  %9957 = vmatprep.subr.bf16.mxu0 %v10726_v20  ;;  %v10754_v47 = vld [vmem:[%s13769_s10 + $0x2f8] sm:$0xff]  }
 0x802   : > { %v10755_v20 = vld [vmem:[%s13769_s10 + $0x238] sm:$0xff]  }
 0x803   : > { %9936 = vmatpush3.bf16.msra.mxu1 %v10727_v50  ;;  %9958 = vmatpush3.bf16.msra.mxu0 %v10728_v51  ;;  %v10758_v50 = vld [vmem:[%s13769_s10 + $0x2f0] sm:$0xff]  }
 0x804   : > { %9937 = vmatprep.subr.bf16.mxu1 %v10729_v52  ;;  %9959 = vmatprep.subr.bf16.mxu0 %v10730_v53  ;;  %v10759_v51 = vld [vmem:[%s13769_s10 + $0x230] sm:$0xff]   ;;  %v10761_v53 = vld [vmem:[%s13769_s10 + $0x268] sm:$0xff]  }
 0x805   : > { %v10760_v52 = vld [vmem:[%s13769_s10 + $0x2b0] sm:$0xff]  }
 0x807   : > { %9938 = vmatpush3.bf16.msra.mxu1 %v10731_v54  ;;  %9960 = vmatpush3.bf16.msra.mxu0 %v10732_v55  ;;  %v10762_v54 = vld [vmem:[%s13769_s10 + $0x2e8] sm:$0xff]  }
 0x808   : > { %9939 = vmatprep.subr.bf16.mxu1 %v10733_v56  ;;  %9961 = vmatprep.subr.bf16.mxu0 %v10734_v57  ;;  %v10763_v55 = vld [vmem:[%s13769_s10 + $0x228] sm:$0xff]   ;;  %v10765_v57 = vld [vmem:[%s13769_s10 + $0x260] sm:$0xff]  }
 0x809   : > { %v10764_v56 = vld [vmem:[%s13769_s10 + $0x2a8] sm:$0xff]  }
 0x80b   : > { %9940 = vmatpush3.bf16.msra.mxu1 %v10735_v58  ;;  %9962 = vmatpush3.bf16.msra.mxu0 %v10736_v62  ;;  %v10766_v58 = vld [vmem:[%s13769_s10 + $0x2e0] sm:$0xff]  }
 0x80c   : > { %9941 = vmatprep.subr.bf16.mxu1 %v10737_v0  ;;  %9963 = vmatprep.subr.bf16.mxu0 %v10738_v2  ;;  %v10767_v62 = vld [vmem:[%s13769_s10 + $0x220] sm:$0xff]   ;;  %v10769_v2 = vld [vmem:[%s13769_s10 + $0x258] sm:$0xff]  }
 0x80d   : > { %v10768_v0 = vld [vmem:[%s13769_s10 + $0x2a0] sm:$0xff]  }
 0x80f   : > { %9942 = vmatpush3.bf16.msra.mxu1 %v10739_v5  ;;  %9964 = vmatpush3.bf16.msra.mxu0 %v10740_v6  ;;  %v10770_v5 = vld [vmem:[%s13769_s10 + $0x2d8] sm:$0xff]  }
 0x810   : > { %9943 = vmatprep.subr.bf16.mxu1 %v10741_v8  ;;  %9965 = vmatprep.subr.bf16.mxu0 %v10742_v9  ;;  %v10771_v6 = vld [vmem:[%s13769_s10 + $0x218] sm:$0xff]   ;;  %v10773_v9 = vld [vmem:[%s13769_s10 + $0x250] sm:$0xff]  }
 0x811   : > { %v10772_v8 = vld [vmem:[%s13769_s10 + $0x298] sm:$0xff]  }
 0x813   : > { %9944 = vmatpush3.bf16.msra.mxu1 %v10743_v10  ;;  %9966 = vmatpush3.bf16.msra.mxu0 %v10744_v12  ;;  %v10774_v10 = vld [vmem:[%s13769_s10 + $0x2d0] sm:$0xff]  }
 0x814   : > { %9945 = vmatprep.subr.bf16.mxu1 %v10745_v14  ;;  %9967 = vmatprep.subr.bf16.mxu0 %v10746_v15  ;;  %v10775_v12 = vld [vmem:[%s13769_s10 + $0x210] sm:$0xff]   ;;  %v10778_v14 = vld [vmem:[%s13769_s10 + $0x2c8] sm:$0xff]  }
 0x815   : > { %v10779_v15 = vld [vmem:[%s13769_s10 + $0x208] sm:$0xff]  }
 0x817   : > { %9946 = vmatpush3.bf16.msra.mxu1 %v10747_v16  ;;  %9968 = vmatpush3.bf16.msra.mxu0 %v10748_v7  ;;  %v10780_v16 = vld [vmem:[%s13769_s10 + $0x288] sm:$0xff]   ;;  %v10781_v7 = vld [vmem:[%s13769_s10 + $0x240] sm:$0xff]  }
 0x818   : > { %9947 = vmatprep.subr.bf16.mxu1 %v10749_v21  ;;  %9969 = vmatprep.subr.bf16.mxu0 %v10750_v4  ;;  %v10784_v21 = vld [vmem:[%s13769_s10 + $0x280] sm:$0xff]   ;;  %v12037_v4 = vld [vmem:[%s13767_s8 + $0xb0] sm:$0xff] }
 0x819   : > { %v8842_v60 = vcombine.high %v12037_v4, %v12042_v22 }
 0x81b   : > { %9948 = vmatpush3.bf16.msra.mxu1 %v10751_v24  ;;  %9970 = vmatpush3.bf16.msra.mxu0 %v10752_v25  ;;  %v8841_v24 = vcombine.low %v12037_v4, %v12042_v22  ;;  %v8843_v25 = vcombine.low %v12047_v59, %v12054_v23 }
 0x81c   : > { %2232 = vmatprep.subr.bf16.mxu1 %v8800_v29  ;;  %2273 = vmatprep.subr.bf16.mxu0 %v8802_v30 }
 0x81e   : > { %2103 = vmatmul.mubr.bf16.vlgmr.msra.gmra.mxu1 %v1314_v41  ;;  %2143 = vmatmul.mubr.bf16.vlgmr.msra.gmra.mxu0 %v1316_v42 }
 0x81f   : > { %2233 = vmatpush1.bf16.msra.mxu1 %v8799_v39  ;;  %2274 = vmatpush1.bf16.msra.mxu0 %v8801_v40 }
 0x820   : > { %2234 = vmatprep.subr.bf16.mxu1 %v8796_v11  ;;  %2275 = vmatprep.subr.bf16.mxu0 %v8798_v43 }
 0x821   : > { %2252 = vmatprep.mubr.bf16.mxu1 %v11321_v33  ;;  %2293 = vmatprep.mubr.bf16.mxu0 %v11321_v33 }
 0x823   : > { %2235 = vmatpush1.bf16.msra.mxu1 %v8795_v44  ;;  %2276 = vmatpush1.bf16.msra.mxu0 %v8797_v45 }
 0x824   : > { %9977 = vmatprep.subr.bf16.mxu1 %v10753_v46  ;;  %9999 = vmatprep.subr.bf16.mxu0 %v10754_v47  ;;  %v2158_v46 = vld [vmem:[%s13768_s9 + $0x8] sm:$0xf] }
 0x826   : > { %8803 = vmatmul.mubr.msk.bf16.vlgmr.msra.gmra.mxu1 %vm560_vm1, %v11669_v17  ;;  %8804 = vmatmul.mubr.msk.bf16.vlgmr.msra.gmra.mxu0 %vm560_vm1, %v11669_v17 }
 0x827   : > { %9978 = vmatpush3.bf16.msra.mxu1 %v10755_v20  ;;  %10000 = vmatpush3.bf16.msra.mxu0 %v10756_v48 }
 0x828   : > { %9979 = vmatprep.subr.bf16.mxu1 %v10757_v49  ;;  %10001 = vmatprep.subr.bf16.mxu0 %v10758_v50 }
 0x82b   : > { %9980 = vmatpush3.bf16.msra.mxu1 %v10759_v51  ;;  %10002 = vmatpush3.bf16.msra.mxu0 %v10760_v52  ;;  %v2163_v51 = vrot.slane %v2158_v46, %v11536_v32  ;;  %v2171_v52 = vrot.slane %v2158_v46, %v11797_v3 }
 0x82c   : > { %9981 = vmatprep.subr.bf16.mxu1 %v10761_v53  ;;  %10003 = vmatprep.subr.bf16.mxu0 %v10762_v54 }
 0x82f   : > { %9982 = vmatpush3.bf16.msra.mxu1 %v10763_v55  ;;  %10004 = vmatpush3.bf16.msra.mxu0 %v10764_v56  ;;  %v2167_v56 = vrot.slane %v2158_v46, %v11788_v61 }
 0x830   : > { %9983 = vmatprep.subr.bf16.mxu1 %v10765_v57  ;;  %10005 = vmatprep.subr.bf16.mxu0 %v10766_v58  ;;  %v2175_v57 = vrot.slane %v2158_v46, %v11791_v63  ;;  %v10800_v46 = vld [vmem:[%s13769_s10 + $0x3a0] sm:$0xff]  }
 0x833   : > { %9984 = vmatpush3.bf16.msra.mxu1 %v10767_v62  ;;  %10006 = vmatpush3.bf16.msra.mxu0 %v10768_v0 }
 0x834   : > { %9985 = vmatprep.subr.bf16.mxu1 %v10769_v2  ;;  %10007 = vmatprep.subr.bf16.mxu0 %v10770_v5 }
 0x837   : > { %9986 = vmatpush3.bf16.msra.mxu1 %v10771_v6  ;;  %10008 = vmatpush3.bf16.msra.mxu0 %v10772_v8 }
 0x838   : > { %9987 = vmatprep.subr.bf16.mxu1 %v10773_v9  ;;  %10009 = vmatprep.subr.bf16.mxu0 %v10774_v10 }
 0x83b   : > { %9988 = vmatpush3.bf16.msra.mxu1 %v10775_v12  ;;  %10010 = vmatpush3.bf16.msra.mxu0 %v10776_v13 }
 0x83c   : > { %9989 = vmatprep.subr.bf16.mxu1 %v10777_v31  ;;  %10011 = vmatprep.subr.bf16.mxu0 %v10778_v14  ;;  %v2647_v14 = vld [vmem:[%s13767_s8 + $0x30] sm:$0xff] }
 0x83f   : > { %9990 = vmatpush3.bf16.msra.mxu1 %v10779_v15  ;;  %10012 = vmatpush3.bf16.msra.mxu0 %v10780_v16 }
 0x840   : > { %9991 = vmatprep.subr.bf16.mxu1 %v10781_v7  ;;  %10013 = vmatprep.subr.bf16.mxu0 %v10782_v18  ;;  %v2649_v7 = vld [vmem:[%s13767_s8 + $0x70] sm:$0xff]  ;;  %v2648_v18 = vld [vmem:[%s13767_s8 + $0x38] sm:$0xff] }
 0x843   : > { %9992 = vmatpush3.bf16.msra.mxu1 %v10783_v19  ;;  %10014 = vmatpush3.bf16.msra.mxu0 %v10784_v21  ;;  %v2650_v19 = vld [vmem:[%s13767_s8 + $0x78] sm:$0xff] }
 0x844   : > { %2729 = vmatprep.subr.bf16.mxu1 %v8842_v60  ;;  %2770 = vmatprep.subr.bf16.mxu0 %v8844_v26  ;;  %v8838_v26 = vcombine.high %v2647_v14, %v2649_v7 }
 0x8be   : > { %v9905_v28 = vpop.f32.mrf.mxu1  ;;  %v9927_v29 = vpop.f32.mrf.mxu0 }
 0x8c0   : > { %v9906_v30 = vpop.f32.mrf.mxu1  ;;  %v9928_v34 = vpop.f32.mrf.mxu0 }
 0x8c1   : > { %v9907_v35 = vadd.f32 %v9906_v30, %v9905_v28  ;;  %v9929_v37 = vadd.f32 %v9928_v34, %v9927_v29  ;;  %v8840_v28 = vcombine.high %v2648_v18, %v2650_v19  ;;  %v8837_v29 = vcombine.low %v2647_v14, %v2649_v7  ;;  %v10785_v34 = vld [vmem:[%s13769_s10 + $0x378] sm:$0xff]  }
 0x8c2   : > { %v9908_v38 = vpop.f32.mrf.mxu1  ;;  %v9930_v39 = vpop.f32.mrf.mxu0  ;;  %v8839_v30 = vcombine.low %v2648_v18, %v2650_v19 }
 0x8c3   : > { %v1873_v40 = vadd.f32 %v9929_v37, %v9907_v35  ;;  %v10786_v35 = vld [vmem:[%s13769_s10 + $0x3f8] sm:$0xff]   ;;  %v10789_v37 = vld [vmem:[%s13769_s10 + $0x370] sm:$0xff]  }
 0x8c4   : > { %v9909_v11 = vpop.f32.mrf.mxu1  ;;  %v9931_v41 = vpop.f32.mrf.mxu0  ;;  %v10790_v38 = vld [vmem:[%s13769_s10 + $0x3f0] sm:$0xff]  }
 0x8c5   : > { %v10791_v39 = vld [vmem:[%s13769_s10 + $0x330] sm:$0xff]   ;;  %v10793_v11 = vld [vmem:[%s13769_s10 + $0x368] sm:$0xff]  }
 0x8c6   : > { %v10795_v41 = vld [vmem:[%s13769_s10 + $0x328] sm:$0xff]  }
 0x8de   : > { %v9949_v42 = vpop.f32.mrf.mxu1  ;;  %v9971_v43 = vpop.f32.mrf.mxu0 }
 0x8e0   : > { %v9950_v44 = vpop.f32.mrf.mxu1  ;;  %v9972_v45 = vpop.f32.mrf.mxu0 }
 0x8e1   : > { %v9951_v47 = vadd.f32 %v9950_v44, %v9949_v42  ;;  %v9973_v20 = vadd.f32 %v9972_v45, %v9971_v43  ;;  %v10796_v42 = vld [vmem:[%s13769_s10 + $0x3a8] sm:$0xff]   ;;  %v10797_v43 = vld [vmem:[%s13769_s10 + $0x360] sm:$0xff]  }
 0x8e2   : > { %v9952_v48 = vpop.f32.mrf.mxu1  ;;  %v9974_v49 = vpop.f32.mrf.mxu0  ;;  %v10798_v44 = vld [vmem:[%s13769_s10 + $0x3e0] sm:$0xff]  }
 0x8e3   : > { %v2105_v50 = vadd.f32 %v9951_v47, %v1873_v40  ;;  %v10792_v40 = vld [vmem:[%s13769_s10 + $0x3b0] sm:$0xff]   ;;  %v10799_v45 = vld [vmem:[%s13769_s10 + $0x320] sm:$0xff]   ;;  %v10801_v47 = vld [vmem:[%s13769_s10 + $0x358] sm:$0xff]  }
 0x8e4   : > { %v9953_v53 = vpop.f32.mrf.mxu1  ;;  %v9975_v54 = vpop.f32.mrf.mxu0  ;;  %v10803_v48 = vld [vmem:[%s13769_s10 + $0x318] sm:$0xff]  }
 0x8e5   : > { %v12067_v55 = vadd.f32 %v9973_v20, %v2105_v50  ;;  %v10802_v20 = vld [vmem:[%s13769_s10 + $0x3d8] sm:$0xff]   ;;  %v10805_v50 = vld [vmem:[%s13769_s10 + $0x350] sm:$0xff]   ;;  %v10809_v54 = vld [vmem:[%s13769_s10 + $0x348] sm:$0xff]  }
 0x8e6   : > { %v2254_v58 = vpop.f32.mrf.mxu1  ;;  %v2295_v62 = vpop.f32.mrf.mxu0  ;;  %v10804_v49 = vld [vmem:[%s13769_s10 + $0x398] sm:$0xff]   ;;  %v10808_v53 = vld [vmem:[%s13769_s10 + $0x390] sm:$0xff]  }
 0x8e7   : > { %v2255_v0 = vadd.f32 %v2254_v58, %v2163_v51  ;;  %v2296_v2 = vadd.f32 %v2295_v62, %v2171_v52  ;;  %v10806_v51 = vld [vmem:[%s13769_s10 + $0x3d0] sm:$0xff]   ;;  %v10812_v58 = vld [vmem:[%s13769_s10 + $0x388] sm:$0xff]   ;;  %v10813_v62 = vld [vmem:[%s13769_s10 + $0x340] sm:$0xff]  }
 0x8e8   : > { %v2256_v5 = vpop.f32.mrf.mxu1  ;;  %v2297_v6 = vpop.f32.mrf.mxu0  ;;  %v10807_v52 = vld [vmem:[%s13769_s10 + $0x310] sm:$0xff]  }
 0x8e9   : > { %v2257_v8 = vadd.f32 %v2256_v5, %v2167_v56  ;;  %v2298_v9 = vadd.f32 %v2297_v6, %v2175_v57  ;;  %v2302_v10 = vmax.f32 %v2255_v0, 0.0  ;;  %v2304_v12 = vmax.f32 %v2296_v2, 0.0  ;;  %v10810_v56 = vld [vmem:[%s13769_s10 + $0x3c8] sm:$0xff]   ;;  %v10814_v0 = vld [vmem:[%s13769_s10 + $0x3c0] sm:$0xff]  }
 0x8ea   : > { %v2258_v13 = vpop.f32.mrf.mxu1  ;;  %v2299_v31 = vpop.f32.mrf.mxu0  ;;  %v10811_v57 = vld [vmem:[%s13769_s10 + $0x308] sm:$0xff]   ;;  %v10815_v2 = vld [vmem:[%s13769_s10 + $0x300] sm:$0xff]  }
 0x8eb   : > { %v2303_v15 = vmax.f32 %v2257_v8, 0.0  ;;  %v2305_v16 = vmax.f32 %v2298_v9, 0.0  ;;  %v2306_v60 = vpack.c.bf16 %v2302_v10, %v2302_v10  ;;  %v2308_v23 = vpack.c.bf16 %v2304_v12, %v2304_v12  ;;  %v10816_v5 = vld [vmem:[%s13769_s10 + $0x380] sm:$0xff]   ;;  %v2655_v12 = vld [vmem:[%s13768_s9 + $0xc] sm:$0xf] }
 0x8ec   : > { %v2259_v21 = vpop.f32.mrf.mxu1  ;;  %v2300_v4 = vpop.f32.mrf.mxu0  ;;  %v2660_v7 = vrot.slane %v2655_v12, %v11536_v32  ;;  %v2668_v18 = vrot.slane %v2655_v12, %v11797_v3 }
 0x8ed   : > { %v2307_v22 = vpack.c.bf16 %v2303_v15, %v2303_v15  ;;  %v2309_v59 = vpack.c.bf16 %v2305_v16, %v2305_v16 }
 0x8ef   : > { %2598 = vmatprep.mubr.bf16.mxu1 %v2307_v22  ;;  %2638 = vmatprep.mubr.bf16.mxu0 %v2309_v59  ;;  %v2664_v22 = vrot.slane %v2655_v12, %v11788_v61  ;;  %v2672_v59 = vrot.slane %v2655_v12, %v11791_v63 }
 0x8f0   : > { %2599 = vmatmul.mubr.bf16.vlgmr.msra.gmra.mxu1 %v2306_v60  ;;  %2639 = vmatmul.mubr.bf16.vlgmr.msra.gmra.mxu0 %v2308_v23 }
 0x8f1   : > { %2730 = vmatpush1.bf16.msra.mxu1 %v8841_v24  ;;  %2771 = vmatpush1.bf16.msra.mxu0 %v8843_v25  ;;  %v10787_v24 = vld [vmem:[%s13769_s10 + $0x338] sm:$0xff]  }
 0x8f2   : > { %2731 = vmatprep.subr.bf16.mxu1 %v8838_v26  ;;  %2772 = vmatprep.subr.bf16.mxu0 %v8840_v28  ;;  %v10788_v25 = vld [vmem:[%s13769_s10 + $0x3b8] sm:$0xff]  }
 0x8f3   : > { %2749 = vmatprep.mubr.bf16.mxu1 %v11321_v33  ;;  %2790 = vmatprep.mubr.bf16.mxu0 %v11321_v33 }
 0x8f5   : > { %2732 = vmatpush1.bf16.msra.mxu1 %v8837_v29  ;;  %2773 = vmatpush1.bf16.msra.mxu0 %v8839_v30 }
 0x8f6   : > { %10021 = vmatprep.subr.bf16.mxu1 %v10785_v34  ;;  %10043 = vmatprep.subr.bf16.mxu0 %v10786_v35 }
 0x8f8   : > { %8845 = vmatmul.mubr.msk.bf16.vlgmr.msra.gmra.mxu1 %vm560_vm1, %v11669_v17  ;;  %8846 = vmatmul.mubr.msk.bf16.vlgmr.msra.gmra.mxu0 %vm560_vm1, %v11669_v17  ;;  %v10794_v17 = vld [vmem:[%s13769_s10 + $0x3e8] sm:$0xff]  }
 0x8f9   : > { %10022 = vmatpush3.bf16.msra.mxu1 %v10787_v24  ;;  %10044 = vmatpush3.bf16.msra.mxu0 %v10788_v25 }
 0x8fa   : > { %10023 = vmatprep.subr.bf16.mxu1 %v10789_v37  ;;  %10045 = vmatprep.subr.bf16.mxu0 %v10790_v38 }
 0x8fd   : > { %10024 = vmatpush3.bf16.msra.mxu1 %v10791_v39  ;;  %10046 = vmatpush3.bf16.msra.mxu0 %v10792_v40 }
 0x8fe   : > { %10025 = vmatprep.subr.bf16.mxu1 %v10793_v11  ;;  %10047 = vmatprep.subr.bf16.mxu0 %v10794_v17 }
 0x901   : > { %10026 = vmatpush3.bf16.msra.mxu1 %v10795_v41  ;;  %10048 = vmatpush3.bf16.msra.mxu0 %v10796_v42 }
 0x902   : > { %10027 = vmatprep.subr.bf16.mxu1 %v10797_v43  ;;  %10049 = vmatprep.subr.bf16.mxu0 %v10798_v44 }
 0x905   : > { %10028 = vmatpush3.bf16.msra.mxu1 %v10799_v45  ;;  %10050 = vmatpush3.bf16.msra.mxu0 %v10800_v46 }
 0x906   : > { %10029 = vmatprep.subr.bf16.mxu1 %v10801_v47  ;;  %10051 = vmatprep.subr.bf16.mxu0 %v10802_v20 }
 0x909   : > { %10030 = vmatpush3.bf16.msra.mxu1 %v10803_v48  ;;  %10052 = vmatpush3.bf16.msra.mxu0 %v10804_v49 }
 0x90a   : > { %10031 = vmatprep.subr.bf16.mxu1 %v10805_v50  ;;  %10053 = vmatprep.subr.bf16.mxu0 %v10806_v51 }
 0x90d   : > { %10032 = vmatpush3.bf16.msra.mxu1 %v10807_v52  ;;  %10054 = vmatpush3.bf16.msra.mxu0 %v10808_v53 }
 0x90e   : > { %10033 = vmatprep.subr.bf16.mxu1 %v10809_v54  ;;  %10055 = vmatprep.subr.bf16.mxu0 %v10810_v56  ;;  %v8879_v54 = vld [vmem:[%s13770_s11] ss:$0 sm:$0xff] }
 0x911   : > { %10034 = vmatpush3.bf16.msra.mxu1 %v10811_v57  ;;  %10056 = vmatpush3.bf16.msra.mxu0 %v10812_v58 }
 0x912   : > { %10035 = vmatprep.subr.bf16.mxu1 %v10813_v62  ;;  %10057 = vmatprep.subr.bf16.mxu0 %v10814_v0 }
 0x915   : > { %10036 = vmatpush3.bf16.msra.mxu1 %v10815_v2  ;;  %10058 = vmatpush3.bf16.msra.mxu0 %v10816_v5 }
 0x916   : > { %10511 = vmatprep.subr.bf16.mxu1 %v11316_v1  ;;  %10519 = vmatprep.subr.bf16.mxu0 %v11316_v1 }
 0x9b0   : > { %v9993_v6 = vpop.f32.mrf.mxu1  ;;  %v10015_v8 = vpop.f32.mrf.mxu0 }
 0x9b2   : > { %v9994_v9 = vpop.f32.mrf.mxu1  ;;  %v10016_v10 = vpop.f32.mrf.mxu0 }
 0x9b3   : > { %v9995_v13 = vadd.f32 %v9994_v9, %v9993_v6  ;;  %v10017_v31 = vadd.f32 %v10016_v10, %v10015_v8  ;;  %v10817_v9 = vld [vmem:[%s13761_s2 + $0x18] sm:$0xff]   ;;  %v10818_v10 = vld [vmem:[%s13761_s2 + $0x10] sm:$0xff]  }
 0x9b4   : > { %v9996_v14 = vpop.f32.mrf.mxu1  ;;  %v10018_v15 = vpop.f32.mrf.mxu0 }
 0x9b5   : > { %v2641_v16 = vadd.f32 %v10017_v31, %v9995_v13 }
 0x9b6   : > { %v9997_v19 = vpop.f32.mrf.mxu1  ;;  %v10019_v21 = vpop.f32.mrf.mxu0 }
 0x9b7   : > { %v2646_v4 = vadd.f32 %v2641_v16, %v12067_v55 }
 0x9b8   : > { %v2751_v60 = vpop.f32.mrf.mxu1  ;;  %v2792_v23 = vpop.f32.mrf.mxu0 }
 0x9b9   : > { %v2752_v26 = vadd.f32 %v2751_v60, %v2660_v7  ;;  %v2793_v28 = vadd.f32 %v2792_v23, %v2668_v18  ;;  %v11162_v18 = vld [vmem:[%s13763_s4] ss:$0 sm:$0xff] }
 0x9ba   : > { %v2753_v29 = vpop.f32.mrf.mxu1  ;;  %v2794_v30 = vpop.f32.mrf.mxu0 }
 0x9bb   : > { %v2754_v34 = vadd.f32 %v2753_v29, %v2664_v22  ;;  %v2795_v35 = vadd.f32 %v2794_v30, %v2672_v59  ;;  %v2799_v24 = vmax.f32 %v2752_v26, 0.0  ;;  %v2801_v25 = vmax.f32 %v2793_v28, 0.0  ;;  %v11163_v22 = vld [vmem:[%s13764_s5] ss:$0 sm:$0xff] }
 0x9bc   : > { %v2755_v37 = vpop.f32.mrf.mxu1  ;;  %v2796_v38 = vpop.f32.mrf.mxu0 }
 0x9bd   : > { %v2800_v39 = vmax.f32 %v2754_v34, 0.0  ;;  %v2802_v40 = vmax.f32 %v2795_v35, 0.0  ;;  %v2803_v42 = vpack.c.bf16 %v2799_v24, %v2799_v24  ;;  %v2805_v43 = vpack.c.bf16 %v2801_v25, %v2801_v25  ;;  %v8885_v34 = vld [vmem:[%s13762_s3 + $0x1] ss:$0 sm:$0xff] }
 0x9be   : > { %v2756_v11 = vpop.f32.mrf.mxu1  ;;  %v2797_v55 = vpop.f32.mrf.mxu0 }
 0x9bf   : > { %v2804_v17 = vpack.c.bf16 %v2800_v39, %v2800_v39  ;;  %v2806_v41 = vpack.c.bf16 %v2802_v40, %v2802_v40 }
 0x9c1   : > { %3095 = vmatprep.mubr.bf16.mxu1 %v2804_v17  ;;  %3135 = vmatprep.mubr.bf16.mxu0 %v2806_v41 }
 0x9c2   : > { %3096 = vmatmul.mubr.bf16.vlgmr.msra.gmra.mxu1 %v2803_v42  ;;  %3136 = vmatmul.mubr.bf16.vlgmr.msra.gmra.mxu0 %v2805_v43 }
 0x9c3   : > { %10515 = vmatprep.mubr.msk.bf16.mxu1 %vm11317_vm0, %v11316_v1  ;;  %10521 = vmatprep.mubr.msk.bf16.mxu0 %vm11317_vm0, %v11316_v1 }
 0x9c4   : > { %10512 = vmatpush3.bf16.msra.mxu1 %v10817_v9 }
 0x9c5   : > { %10513 = vmatprep.subr.bf16.mxu1 %v11316_v1 }
 0x9c8   : > { %10514 = vmatpush3.bf16.msra.mxu1 %v10818_v10 }
 0x9c9   : > { %10525 = vmatprep.subr.bf16.mxu1 %v11316_v1 }
 0xa82   : > { %v10037_v44 = vpop.f32.mrf.mxu1  ;;  %v10059_v45 = vpop.f32.mrf.mxu0 }
 0xa84   : > { %v10038_v46 = vpop.f32.mrf.mxu1  ;;  %v10060_v47 = vpop.f32.mrf.mxu0 }
 0xa85   : > { %v10039_v20 = vadd.f32 %v10038_v46, %v10037_v44  ;;  %v10061_v48 = vadd.f32 %v10060_v47, %v10059_v45 }
 0xa86   : > { %v10040_v49 = vpop.f32.mrf.mxu1  ;;  %v10062_v50 = vpop.f32.mrf.mxu0 }
 0xa87   : > { %v3138_v51 = vadd.f32 %v10061_v48, %v10039_v20 }
 0xa88   : > { %v10041_v52 = vpop.f32.mrf.mxu1  ;;  %v10063_v53 = vpop.f32.mrf.mxu0 }
 0xa89   : > { %v3143_v56 = vadd.f32 %v3138_v51, %v2646_v4 }
 0xa8b   : > { %v3151_v57 = vadd.f32 %v8879_v54, %v3143_v56 }
 0xa8d   : > { %v3152_v58 = vadd.f32 %v3151_v57, %v11609_v27 }
 0xa8f   : > { %v3153_v62 = vsel %vm560_vm1, %v3152_v58, 0.0 }
 0xa90   : > { %3154 = vadd.xlane.f32.xlu0 %v3153_v62 }
 0xb19   : > { %v3155_v0 = vpop.xlane.xlu0 %3154 }
 0xb1a   : > { %v3156_v2 = vmul.f32 0.03125, %v3155_v0 }
 0xb1c   : > { %v3157_v5 = vsub.f32 %v3152_v58, %v3156_v2 }
 0xb1e   : > { %v3158_v6 = vmul.f32 %v3157_v5, %v3157_v5  ;;  %v3172_v19 = vmul.f32 %v11162_v18, %v3157_v5 }
 0xb20   : > { %v3159_v8 = vsel %vm560_vm1, %v3158_v6, 0.0 }
 0xb21   : > { %3160 = vadd.xlane.f32.xlu1 %v3159_v8 }
 0xbaa   : > { %v3161_v27 = vpop.xlane.xlu1 %3160 }
 0xbab   : > { %v3162_v12 = vmul.f32 0.032258064, %v3161_v27 }
 0xbad   : > { %11101 = vrsqrt.f32 %v3162_v12  ;;  %vm3165_vm12 = vcmp.eq.f32.partialorder %v3162_v12, inf  ;;  %v3168_v14 = vand.u32 2147483648, %v3162_v12  ;;  %vm3167_vm13 = vcmp.eq.f32.partialorder %v3162_v12, 0.0 }
 0xbba   : > { %v11102_v13 = vpop.eup %11101 }
 0xbbb   : > { %v3164_v31 = vmul.f32 %v11102_v13, %v3162_v12 }
 0xbbd   : > { %v3166_v15 = vsel %vm3165_vm12, %v3162_v12, %v3164_v31 }
 0xbbe   : > { %v3169_v16 = vsel %vm3167_vm13, %v3168_v14, %v3166_v15 }
 0xbbf   : > { %v3170_v7 = vadd.f32 1e-06, %v3169_v16 }
 0xbc1   : > { %11103 = vrcp.f32 %v3170_v7 }
 0xbce   : > { %v11104_v21 = vpop.eup %11103 }
 0xbcf   : > { %v3173_v4 = vmul.f32 %v11104_v21, %v3172_v19 }
 0xbd1   : > { %v12219_v59 = vadd.f32 %v11163_v22, %v3173_v4 }
 0xbd3   : > { %3248 = vrot.lane.b32.xlu1 %v12219_v59, %s13826_s25  ;;  %3245 = vrot.lane.b32.xlu0 %v12219_v59, %s13827_s0  ;;  %v3175_v60 = vpack.c.bf16 %v12219_v59, %v12219_v59 }
 0xbd5   : > { %10516 = vmatmul.mubr.msk.bf16.vlgmr.msra.gmra.mxu1 %vm560_vm1, %v3175_v60  ;;  %v3274_v23 = vsel %vm631_vm2, %v3175_v60, 0  ;;  %v3517_v46 = vsel %vm884_vm3, %v3175_v60, 0 }
 0xbd6   : > { %10520 = vmatpush3.bf16.xpose.msra.mxu0 %v3274_v23  ;;  %10527 = vmatprep.mubr.msk.bf16.mxu1 %vm11317_vm0, %v11316_v1 }
 0xbd7   : > { %3251 = vrot.lane.b32.xlu1 %v12219_v59, %s13828_s1  ;;  %10531 = vmatprep.subr.bf16.mxu0 %v11316_v1 }
 0xc45   : > { %v3246_v26 = vpop.permute.xlu0 %3245  ;;  %v3249_v30 = vpop.permute.xlu1 %3248 }
 0xc46   : > { %v3254_v28 = vpack.c.bf16 %v3246_v26, %v3246_v26  ;;  %v12239_v24 = vpack.c.bf16 %v3249_v30, %v3249_v30 }
 0xc48   : > { %v3320_v29 = vsel %vm631_vm2, %v3254_v28, 0  ;;  %v3366_v40 = vsel %vm631_vm2, %v12239_v24, 0  ;;  %v3562_v48 = vsel %vm884_vm3, %v3254_v28, 0 }
 0xc49   : > { %10526 = vmatpush3.bf16.xpose.msra.mxu1 %v3320_v29  ;;  %v3252_v55 = vpop.permute.xlu1 %3251 }
 0xc4a   : > { %10537 = vmatprep.subr.bf16.mxu1 %v11316_v1  ;;  %v12250_v17 = vpack.c.bf16 %v3252_v55, %v3252_v55 }
 0xc4c   : > { %v3412_v45 = vsel %vm631_vm2, %v12250_v17, 0 }
 0xc95   : > { %v3238_v35 = vpop.f32.mrf.mxu1 }
 0xc96   : > { %v3239_v25 = vadd.f32 %v8885_v34, %v3238_v35 }
 0xc97   : > { %v10517_v37 = vpop.f32.mrf.mxu1 }
 0xc98   : > { %v3267_v38 = vpack.c.bf16 %v3239_v25, %v3239_v25  ;;  %3261 = vrot.lane.b32.xlu1 %v3239_v25, %s13826_s25  ;;  %3258 = vrot.lane.b32.xlu0 %v3239_v25, %s13827_s0 }
 0xc99   : > { %v3241_v39 = vpop.f32.mrf.mxu1 }
 0xc9a   : > { %10522 = vmatmul.mubr.msk.bf16.vlgmr.msra.gmra.mxu0 %vm631_vm2, %v3267_v38 }
 0xc9b   : > { %10532 = vmatpush3.bf16.xpose.msra.mxu0 %v3366_v40  ;;  %v10518_v11 = vpop.f32.mrf.mxu1  ;;  %10533 = vmatprep.mubr.msk.bf16.mxu0 %vm11317_vm0, %v11316_v1 }
 0xc9c   : > { %3264 = vrot.lane.b32.xlu0 %v3239_v25, %s13828_s1  ;;  %10543 = vmatprep.subr.bf16.mxu0 %v11316_v1 }
 0xd0a   : > { %v3262_v41 = vpop.permute.xlu1 %3261  ;;  %v3259_v42 = vpop.permute.xlu0 %3258 }
 0xd0b   : > { %v3269_v43 = vpack.c.bf16 %v3262_v41, %v3262_v41  ;;  %v3268_v44 = vpack.c.bf16 %v3259_v42, %v3259_v42 }
 0xd0d   : > { %10528 = vmatmul.mubr.msk.bf16.vlgmr.msra.gmra.mxu1 %vm631_vm2, %v3268_v44  ;;  %10534 = vmatmul.mubr.msk.bf16.vlgmr.msra.gmra.mxu0 %vm631_vm2, %v3269_v43 }
 0xd0e   : > { %10538 = vmatpush3.bf16.xpose.msra.mxu1 %v3412_v45  ;;  %10544 = vmatpush3.bf16.msra.mxu0 %v3517_v46  ;;  %v3265_v47 = vpop.permute.xlu0 %3264 }
 0xd0f   : > { %10539 = vmatprep.mubr.msk.bf16.mxu1 %vm11317_vm0, %v11316_v1  ;;  %10549 = vmatprep.subr.bf16.mxu1 %v11316_v1  ;;  %v3270_v20 = vpack.c.bf16 %v3265_v47, %v3265_v47 }
 0xd10   : > { %10545 = vmatprep.mubr.msk.bf16.mxu0 %vm11317_vm0, %v11316_v1  ;;  %10555 = vmatprep.subr.bf16.mxu0 %v11316_v1 }
 0xd15   : > { %10540 = vmatmul.mubr.msk.bf16.vlgmr.msra.gmra.mxu1 %vm631_vm2, %v3270_v20  ;;  %v3607_v20 = vsel %vm884_vm3, %v12239_v24, 0 }
 0xd16   : > { %10550 = vmatpush3.bf16.msra.mxu1 %v3562_v48  ;;  %10551 = vmatprep.mubr.msk.bf16.mxu1 %vm11317_vm0, %v11316_v1 }
 0xd17   : > { %10561 = vmatprep.subr.bf16.mxu1 %v11316_v1 }
 0xd5a   : > { %v3310_v49 = vpop.f32.mrf.mxu0 }
 0xd5b   : > { %v3454_v50 = vmul.f32 0.35355338, %v3310_v49 }
 0xd5c   : > { %v10523_v51 = vpop.f32.mrf.mxu0 }
 0xd5d   : > { %v3458_v52 = vsel %vm11540_vm5, -1e+09, %v3454_v50 }
 0xd5e   : > { %v3313_v53 = vpop.f32.mrf.mxu0  ;;  %v3462_v54 = vsel %vm631_vm2, %v3458_v52, -inf }
 0xd5f   : > { %3463 = vmax.xlane.f32.xlu1 %v3462_v54  ;;  %v3652_v54 = vsel %vm884_vm3, %v12250_v17, 0 }
 0xd60   : > { %v10524_v56 = vpop.f32.mrf.mxu0 }
 0xdcd   : > { %v3356_v57 = vpop.f32.mrf.mxu1  ;;  %v3402_v58 = vpop.f32.mrf.mxu0 }
 0xdce   : > { %v3455_v62 = vmul.f32 0.35355338, %v3356_v57  ;;  %v3456_v0 = vmul.f32 0.35355338, %v3402_v58 }
 0xdcf   : > { %v10529_v2 = vpop.f32.mrf.mxu1  ;;  %v10535_v5 = vpop.f32.mrf.mxu0 }
 0xdd0   : > { %v3459_v6 = vsel %vm11540_vm5, -1e+09, %v3455_v62  ;;  %v3460_v27 = vsel %vm11540_vm5, -1e+09, %v3456_v0 }
 0xdd1   : > { %v3359_v8 = vpop.f32.mrf.mxu1  ;;  %v3405_v9 = vpop.f32.mrf.mxu0  ;;  %v3465_v10 = vsel %vm631_vm2, %v3459_v6, -inf  ;;  %v3468_v14 = vsel %vm631_vm2, %v3460_v27, -inf }
 0xdd2   : > { %3466 = vmax.xlane.f32.xlu0 %v3465_v10 }
 0xdd3   : > { %v10530_v12 = vpop.f32.mrf.mxu1  ;;  %v10536_v13 = vpop.f32.mrf.mxu0 }
 0xdd5   : > { %v3448_v31 = vpop.f32.mrf.mxu1 }
 0xdd6   : > { %v3457_v15 = vmul.f32 0.35355338, %v3448_v31  ;;  %3469 = vmax.xlane.f32.xlu0 %v3468_v14 }
 0xdd7   : > { %v10541_v16 = vpop.f32.mrf.mxu1 }
 0xdd8   : > { %v3461_v7 = vsel %vm11540_vm5, -1e+09, %v3457_v15 }
 0xdd9   : > { %v3451_v18 = vpop.f32.mrf.mxu1  ;;  %v3471_v19 = vsel %vm631_vm2, %v3461_v7, -inf }
 0xdda   : > { %3472 = vmax.xlane.f32.xlu1 %v3471_v19 }
 0xddb   : > { %v10542_v21 = vpop.f32.mrf.mxu1 }
 0xde8   : > { %v3464_v4 = vpop.xlane.xlu1 %3463 }
 0xde9   : > { %v3474_v22 = vsub.f32 %v3458_v52, %v3464_v4 }
 0xdeb   : > { %v3478_v60 = vmul.f32 1.442695, %v3474_v22 }
 0xded   : > { %11105 = vpow2.f32 %v3478_v60 }
 0xdfa   : > { %v11106_v23 = vpop.eup %11105 }
 0xdfb   : > { %v3486_v26 = vsel %vm631_vm2, %v11106_v23, 0.0 }
 0xdfc   : > { %3487 = vadd.xlane.f32.xlu0 %v3486_v26 }
 0xe5b   : > { %v3467_v28 = vpop.xlane.xlu0 %3466 }
 0xe5c   : > { %v3475_v29 = vsub.f32 %v3459_v6, %v3467_v28 }
 0xe5e   : > { %v3480_v30 = vmul.f32 1.442695, %v3475_v29 }
 0xe5f   : > { %v3470_v34 = vpop.xlane.xlu0 %3469 }
 0xe60   : > { %11107 = vpow2.f32 %v3480_v30  ;;  %v3476_v35 = vsub.f32 %v3460_v27, %v3470_v34 }
 0xe62   : > { %v3482_v25 = vmul.f32 1.442695, %v3476_v35 }
 0xe63   : > { %v3473_v37 = vpop.xlane.xlu1 %3472 }
 0xe64   : > { %11109 = vpow2.f32 %v3482_v25  ;;  %v3477_v38 = vsub.f32 %v3461_v7, %v3473_v37 }
 0xe66   : > { %v3484_v39 = vmul.f32 1.442695, %v3477_v38 }
 0xe68   : > { %11111 = vpow2.f32 %v3484_v39 }
 0xe6d   : > { %v11108_v40 = vpop.eup %11107 }
 0xe6e   : > { %v3489_v11 = vsel %vm631_vm2, %v11108_v40, 0.0 }
 0xe6f   : > { %3490 = vadd.xlane.f32.xlu1 %v3489_v11 }
 0xe71   : > { %v11110_v55 = vpop.eup %11109 }
 0xe72   : > { %v3492_v41 = vsel %vm631_vm2, %v11110_v55, 0.0 }
 0xe73   : > { %3493 = vadd.xlane.f32.xlu0 %v3492_v41 }
 0xe75   : > { %v11112_v42 = vpop.eup %11111 }
 0xe76   : > { %v3495_v43 = vsel %vm631_vm2, %v11112_v42, 0.0 }
 0xe77   : > { %3496 = vadd.xlane.f32.xlu1 %v3495_v43 }
 0xe85   : > { %v3488_v44 = vpop.xlane.xlu0 %3487 }
 0xe86   : > { %11113 = vrcp.f32 %v3488_v44 }
 0xe93   : > { %v11114_v45 = vpop.eup %11113 }
 0xe94   : > { %v3502_v46 = vmul.f32 %v11114_v45, %v11106_v23  ;;  %v8900_v45 = vld [vmem:[%s13764_s5 + $0x1] ss:$0 sm:$0xff] }
 0xe96   : > { %3506 = vst.msk [vmem:[%s12285_s21] sm:$0xff] %vm631_vm2, %v3502_v46  ;;  %v3510_v47 = vpack.c.bf16 %v3502_v46, %v3502_v46 }
 0xe98   : > { %10546 = vmatmul.mubr.msk.bf16.vlgmr.msra.gmra.mxu0 %vm631_vm2, %v3510_v47 }
 0xe99   : > { %10556 = vmatpush3.bf16.msra.mxu0 %v3607_v20  ;;  %10557 = vmatprep.mubr.msk.bf16.mxu0 %vm11317_vm0, %v11316_v1 }
 0xef8   : > { %v3491_v48 = vpop.xlane.xlu1 %3490 }
 0xef9   : > { %11115 = vrcp.f32 %v3491_v48 }
 0xefc   : > { %v3494_v49 = vpop.xlane.xlu0 %3493 }
 0xefd   : > { %11117 = vrcp.f32 %v3494_v49 }
 0xf00   : > { %v3497_v50 = vpop.xlane.xlu1 %3496 }
 0xf01   : > { %11119 = vrcp.f32 %v3497_v50 }
 0xf06   : > { %v11116_v51 = vpop.eup %11115 }
 0xf07   : > { %v3503_v52 = vmul.f32 %v11116_v51, %v11108_v40 }
 0xf09   : > { %3507 = vst.msk [vmem:[%s12285_s21 + $0x8] sm:$0xff] %vm631_vm2, %v3503_v52  ;;  %v3511_v53 = vpack.c.bf16 %v3503_v52, %v3503_v52 }
 0xf0a   : > { %v11118_v24 = vpop.eup %11117 }
 0xf0b   : > { %10552 = vmatmul.mubr.msk.bf16.vlgmr.msra.gmra.mxu1 %vm631_vm2, %v3511_v53  ;;  %v3504_v56 = vmul.f32 %v11118_v24, %v11110_v55  ;;  %v8909_v53 = vld [vmem:[%s13767_s8 + $0x180] sm:$0xff] }
 0xf0c   : > { %10562 = vmatpush3.bf16.msra.mxu1 %v3652_v54  ;;  %10563 = vmatprep.mubr.msk.bf16.mxu1 %vm11317_vm0, %v11316_v1  ;;  %v8911_v24 = vld [vmem:[%s13767_s8 + $0x1c0] sm:$0xff]  ;;  %v8910_v54 = vld [vmem:[%s13767_s8 + $0x188] sm:$0xff] }
 0xf0d   : > { %3508 = vst.msk [vmem:[%s12285_s21 + $0x10] sm:$0xff] %vm631_vm2, %v3504_v56  ;;  %v3512_v57 = vpack.c.bf16 %v3504_v56, %v3504_v56  ;;  %v8918_v56 = vcombine.low %v8909_v53, %v8911_v24 }
 0xf0e   : > { %v11120_v58 = vpop.eup %11119 }
 0xf0f   : > { %10558 = vmatmul.mubr.msk.bf16.vlgmr.msra.gmra.mxu0 %vm631_vm2, %v3512_v57  ;;  %v3505_v62 = vmul.f32 %v11120_v58, %v11112_v42  ;;  %v8899_v42 = vld [vmem:[%s13763_s4 + $0x1] ss:$0 sm:$0xff]  ;;  %v8919_v57 = vcombine.high %v8909_v53, %v8911_v24  ;;  %v8912_v58 = vld [vmem:[%s13767_s8 + $0x1c8] sm:$0xff] }
 0xf10   : > { %3894 = vmatprep.mubr.bf16.mxu0 %v11321_v33  ;;  %v10828_v53 = vld [vmem:[%s13769_s10 + $0x5e8] sm:$0xff]  }
 0xf11   : > { %3509 = vst.msk [vmem:[%s12285_s21 + $0x18] sm:$0xff] %vm631_vm2, %v3505_v62  ;;  %v3513_v0 = vpack.c.bf16 %v3505_v62, %v3505_v62  ;;  %v8905_v62 = vld [vmem:[%s13767_s8 + $0x100] sm:$0xff]  ;;  %3874 = vmatprep.subr.bf16.mxu0 %v8919_v57  ;;  %v10829_v24 = vld [vmem:[%s13769_s10 + $0x528] sm:$0xff]  }
 0xf12   : > { %3875 = vmatpush1.bf16.msra.mxu0 %v8918_v56  ;;  %v10831_v56 = vld [vmem:[%s13769_s10 + $0x560] sm:$0xff]  }
 0xf13   : > { %10564 = vmatmul.mubr.msk.bf16.vlgmr.msra.gmra.mxu1 %vm631_vm2, %v3513_v0  ;;  %v8907_v0 = vld [vmem:[%s13767_s8 + $0x140] sm:$0xff] }
 0xf14   : > { %3935 = vmatprep.mubr.bf16.mxu1 %v11321_v33  ;;  %v10832_v57 = vld [vmem:[%s13769_s10 + $0x5e0] sm:$0xff]  }
 0xf58   : > { %v3553_v17 = vpop.f32.mrf.mxu0 }
 0xf5a   : > { %v10547_v2 = vpop.f32.mrf.mxu0 }
 0xf5b   : > { %v8921_v2 = vcombine.high %v8910_v54, %v8912_v58 }
 0xf5c   : > { %v3556_v5 = vpop.f32.mrf.mxu0 }
 0xf5d   : > { %v8915_v5 = vcombine.high %v8905_v62, %v8907_v0  ;;  %3915 = vmatprep.subr.bf16.mxu1 %v8921_v2  ;;  %v10837_v2 = vld [vmem:[%s13769_s10 + $0x518] sm:$0xff]  }
 0xf5e   : > { %v10548_v6 = vpop.f32.mrf.mxu0 }
 0xf5f   : > { %v8906_v6 = vld [vmem:[%s13767_s8 + $0x108] sm:$0xff]  ;;  %3876 = vmatprep.subr.bf16.mxu0 %v8915_v5  ;;  %v10838_v5 = vld [vmem:[%s13769_s10 + $0x598] sm:$0xff]  }
 0xfcb   : > { %v3598_v8 = vpop.f32.mrf.mxu1 }
 0xfcc   : > { %3695 = vrot.lane.b32.xlu0 %v3598_v8, %s13830_s19  ;;  %v8908_v8 = vld [vmem:[%s13767_s8 + $0x148] sm:$0xff] }
 0xfcd   : > { %v10553_v9 = vpop.f32.mrf.mxu1 }
 0xfce   : > { %v8917_v9 = vcombine.high %v8906_v6, %v8908_v8 }
 0xfcf   : > { %v3601_v10 = vpop.f32.mrf.mxu1  ;;  %v3643_v27 = vpop.f32.mrf.mxu0 }
 0xfd0   : > { %3699 = vrot.lane.b32.xlu1 %v3643_v27, %s13831_s20  ;;  %v8914_v10 = vcombine.low %v8905_v62, %v8907_v0  ;;  %v8916_v27 = vcombine.low %v8906_v6, %v8908_v8  ;;  %v10834_v62 = vld [vmem:[%s13769_s10 + $0x5a0] sm:$0xff]   ;;  %v10835_v0 = vld [vmem:[%s13769_s10 + $0x558] sm:$0xff]   ;;  %v10839_v6 = vld [vmem:[%s13769_s10 + $0x550] sm:$0xff]  }
 0xfd1   : > { %v10554_v12 = vpop.f32.mrf.mxu1  ;;  %v10559_v13 = vpop.f32.mrf.mxu0  ;;  %v10840_v8 = vld [vmem:[%s13769_s10 + $0x5d0] sm:$0xff]  }
 0xfd2   : > { %3877 = vmatpush1.bf16.msra.mxu0 %v8914_v10  ;;  %v8992_v12 = vld [vmem:[%s13767_s8 + $0x190] sm:$0xff] }
 0xfd3   : > { %v3646_v31 = vpop.f32.mrf.mxu0  ;;  %v3688_v14 = vpop.f32.mrf.mxu1  ;;  %v8994_v13 = vld [vmem:[%s13767_s8 + $0x1d0] sm:$0xff] }
 0xfd4   : > { %3703 = vrot.lane.b32.xlu1 %v3688_v14, %s13832_s24  ;;  %v8993_v31 = vld [vmem:[%s13767_s8 + $0x198] sm:$0xff]  ;;  %v9002_v14 = vcombine.high %v8992_v12, %v8994_v13  ;;  %v10842_v10 = vld [vmem:[%s13769_s10 + $0x590] sm:$0xff]  }
 0xfd5   : > { %v10560_v15 = vpop.f32.mrf.mxu0  ;;  %v10565_v16 = vpop.f32.mrf.mxu1 }
 0xfd6   : > { %v8995_v15 = vld [vmem:[%s13767_s8 + $0x1d8] sm:$0xff]  ;;  %v9001_v16 = vcombine.low %v8992_v12, %v8994_v13  ;;  %4099 = vmatprep.subr.bf16.mxu0 %v9002_v14  ;;  %v10844_v12 = vld [vmem:[%s13769_s10 + $0x5c8] sm:$0xff]   ;;  %v10847_v14 = vld [vmem:[%s13769_s10 + $0x540] sm:$0xff]  }
 0xfd7   : > { %v3691_v7 = vpop.f32.mrf.mxu1  ;;  %v10845_v13 = vld [vmem:[%s13769_s10 + $0x508] sm:$0xff]  }
 0xfd8   : > { %v9003_v7 = vcombine.low %v8993_v31, %v8995_v15 }
 0xfd9   : > { %v10566_v18 = vpop.f32.mrf.mxu1 }
 0xfda   : > { %v9004_v18 = vcombine.high %v8993_v31, %v8995_v15  ;;  %v10846_v31 = vld [vmem:[%s13769_s10 + $0x588] sm:$0xff]   ;;  %v10848_v15 = vld [vmem:[%s13769_s10 + $0x5c0] sm:$0xff]  }
0x103e   : > { %v3696_v19 = vpop.permute.xlu0 %3695 }
0x103f   : > { %v3706_v4 = vsel %vm631_vm2, %v3553_v17, %v3696_v19  ;;  %v8920_v17 = vcombine.low %v8910_v54, %v8912_v58  ;;  %v10830_v54 = vld [vmem:[%s13769_s10 + $0x5a8] sm:$0xff]   ;;  %v10833_v58 = vld [vmem:[%s13769_s10 + $0x520] sm:$0xff]  }
0x1041   : > { %3916 = vmatpush1.bf16.msra.mxu1 %v8920_v17  ;;  %v10836_v17 = vld [vmem:[%s13769_s10 + $0x5d8] sm:$0xff]  }
0x1042   : > { %v3700_v21 = vpop.permute.xlu1 %3699  ;;  %3917 = vmatprep.subr.bf16.mxu1 %v8917_v9  ;;  %v10841_v9 = vld [vmem:[%s13769_s10 + $0x510] sm:$0xff]  }
0x1043   : > { %v3707_v22 = vsel %vm1075_vm6, %v3706_v4, %v3700_v21 }
0x1045   : > { %3918 = vmatpush1.bf16.msra.mxu1 %v8916_v27  ;;  %v10843_v27 = vld [vmem:[%s13769_s10 + $0x548] sm:$0xff]  }
0x1046   : > { %v3704_v60 = vpop.permute.xlu1 %3703  ;;  %4140 = vmatprep.subr.bf16.mxu1 %v9004_v18  ;;  %v10851_v18 = vld [vmem:[%s13769_s10 + $0x478] sm:$0xff]  }
0x1047   : > { %v3708_v23 = vsel %vm1077_vm7, %v3707_v22, %v3704_v60 }
0x1048   : > { %v3709_v26 = vadd.f32 %v3708_v23, %v12219_v59 }
0x104a   : > { %v3714_v28 = vsel %vm560_vm1, %v3709_v26, 0.0 }
0x104b   : > { %3715 = vadd.xlane.f32.xlu0 %v3714_v28 }
0x10d4   : > { %v3716_v29 = vpop.xlane.xlu0 %3715 }
0x10d5   : > { %v3717_v30 = vmul.f32 0.03125, %v3716_v29  ;;  %v8903_v29 = vld [vmem:[%s13765_s6 + $0x1] ss:$0 sm:$0xff] }
0x10d7   : > { %v3718_v34 = vsub.f32 %v3709_v26, %v3717_v30 }
0x10d9   : > { %v3719_v35 = vmul.f32 %v3718_v34, %v3718_v34  ;;  %v3739_v43 = vmul.f32 %v8899_v42, %v3718_v34 }
0x10db   : > { %v3720_v25 = vsel %vm560_vm1, %v3719_v35, 0.0  ;;  %v8904_v35 = vld [vmem:[%s13766_s7 + $0x1] ss:$0 sm:$0xff] }
0x10dc   : > { %3721 = vadd.xlane.f32.xlu1 %v3720_v25 }
0x1165   : > { %v3722_v37 = vpop.xlane.xlu1 %3721 }
0x1166   : > { %v3723_v38 = vmul.f32 0.032258064, %v3722_v37  ;;  %v8988_v37 = vld [vmem:[%s13767_s8 + $0x110] sm:$0xff] }
0x1168   : > { %11121 = vrsqrt.f32 %v3723_v38  ;;  %vm3726_vm14 = vcmp.eq.f32.partialorder %v3723_v38, inf  ;;  %v3729_v11 = vand.u32 2147483648, %v3723_v38  ;;  %vm3728_vm15 = vcmp.eq.f32.partialorder %v3723_v38, 0.0 }
0x1175   : > { %v11122_v39 = vpop.eup %11121 }
0x1176   : > { %v3725_v40 = vmul.f32 %v11122_v39, %v3723_v38  ;;  %v8989_v39 = vld [vmem:[%s13767_s8 + $0x118] sm:$0xff] }
0x1178   : > { %v3727_v55 = vsel %vm3726_vm14, %v3723_v38, %v3725_v40  ;;  %v8990_v38 = vld [vmem:[%s13767_s8 + $0x150] sm:$0xff]  ;;  %v8991_v40 = vld [vmem:[%s13767_s8 + $0x158] sm:$0xff] }
0x1179   : > { %v3730_v59 = vsel %vm3728_vm15, %v3729_v11, %v3727_v55  ;;  %v8997_v42 = vcombine.low %v8988_v37, %v8990_v38 }
0x117a   : > { %v3731_v41 = vadd.f32 1e-06, %v3730_v59  ;;  %v8998_v59 = vcombine.high %v8988_v37, %v8990_v38 }
0x117c   : > { %11123 = vrcp.f32 %v3731_v41  ;;  %v9000_v41 = vcombine.high %v8989_v39, %v8991_v40 }
0x1189   : > { %v11124_v44 = vpop.eup %11123 }
0x118a   : > { %v3740_v46 = vmul.f32 %v11124_v44, %v3739_v43  ;;  %v8999_v43 = vcombine.low %v8989_v39, %v8991_v40  ;;  %v10819_v44 = vld [vmem:[%s13769_s10 + $0x578] sm:$0xff]  }
0x118c   : > { %v12324_v47 = vadd.f32 %v8900_v45, %v3740_v46  ;;  %v10820_v45 = vld [vmem:[%s13769_s10 + $0x5f8] sm:$0xff]  }
0x118d   : > { %v10821_v46 = vld [vmem:[%s13769_s10 + $0x538] sm:$0xff]  }
0x118e   : > { %v3752_v20 = vsel %vm560_vm1, %v12324_v47, 0.0 }
0x118f   : > { %3753 = vadd.xlane.f32.xlu0 %v3752_v20  ;;  %v10822_v20 = vld [vmem:[%s13769_s10 + $0x5b8] sm:$0xff]  }
0x1218   : > { %v3754_v48 = vpop.xlane.xlu0 %3753 }
0x1219   : > { %v3755_v49 = vmul.f32 0.03125, %v3754_v48  ;;  %v10823_v48 = vld [vmem:[%s13769_s10 + $0x570] sm:$0xff]  }
0x121b   : > { %v3756_v50 = vsub.f32 %v12324_v47, %v3755_v49  ;;  %v10824_v49 = vld [vmem:[%s13769_s10 + $0x5f0] sm:$0xff]  }
0x121d   : > { %v3757_v51 = vmul.f32 %v3756_v50, %v3756_v50  ;;  %v3777_v30 = vmul.f32 %v8903_v29, %v3756_v50  ;;  %v10825_v50 = vld [vmem:[%s13769_s10 + $0x530] sm:$0xff]  }
0x121e   : > { %v12508_v29 = vld [vmem:[%s13768_s9 + $0x10] sm:$0xf] }
0x121f   : > { %v3758_v52 = vsel %vm560_vm1, %v3757_v51, 0.0  ;;  %v10826_v51 = vld [vmem:[%s13769_s10 + $0x5b0] sm:$0xff]  }
0x1220   : > { %3759 = vadd.xlane.f32.xlu0 %v3758_v52  ;;  %v10827_v52 = vld [vmem:[%s13769_s10 + $0x568] sm:$0xff]  }
0x12a9   : > { %v3760_v19 = vpop.xlane.xlu0 %3759 }
0x12aa   : > { %v3761_v21 = vmul.f32 0.032258064, %v3760_v19  ;;  %v10852_v19 = vld [vmem:[%s13769_s10 + $0x4f8] sm:$0xff]  }
0x12ac   : > { %11125 = vrsqrt.f32 %v3761_v21  ;;  %vm3764_vm4 = vcmp.eq.f32.partialorder %v3761_v21, inf  ;;  %v3767_v60 = vand.u32 2147483648, %v3761_v21  ;;  %vm3766_vm8 = vcmp.eq.f32.partialorder %v3761_v21, 0.0 }
0x12b9   : > { %v11126_v4 = vpop.eup %11125 }
0x12ba   : > { %v3763_v22 = vmul.f32 %v11126_v4, %v3761_v21 }
0x12bc   : > { %v3765_v23 = vsel %vm3764_vm4, %v3761_v21, %v3763_v22 }
0x12bd   : > { %v3768_v26 = vsel %vm3766_vm8, %v3767_v60, %v3765_v23  ;;  %v8996_v23 = vld [vmem:[%s13768_s9 + $0x14] sm:$0xf] }
0x12be   : > { %v3769_v28 = vadd.f32 1e-06, %v3768_v26  ;;  %v4034_v39 = vrot.slane %v8996_v23, %v11788_v61  ;;  %v4042_v40 = vrot.slane %v8996_v23, %v11791_v63 }
0x12c0   : > { %11127 = vrcp.f32 %v3769_v28 }
0x12cd   : > { %v11128_v34 = vpop.eup %11127 }
0x12ce   : > { %v3778_v25 = vmul.f32 %v11128_v34, %v3777_v30  ;;  %v4030_v30 = vrot.slane %v8996_v23, %v11536_v32  ;;  %v4038_v34 = vrot.slane %v8996_v23, %v11797_v3  ;;  %v10868_v23 = vld [vmem:[%s13769_s10 + $0x4d8] sm:$0xff]  }
0x12d0   : > { %v3785_v11 = vadd.f32 %v8904_v35, %v3778_v25  ;;  %v3806_v35 = vrot.slane %v12508_v29, %v11788_v61  ;;  %v3814_v25 = vrot.slane %v12508_v29, %v11791_v63 }
0x12d2   : > { %v12384_v55 = vpack.c.bf16 %v3785_v11, %v3785_v11 }
0x12d4   : > { %8922 = vmatmul.mubr.msk.bf16.vlgmr.msra.gmra.mxu0 %vm560_vm1, %v12384_v55  ;;  %8923 = vmatmul.mubr.msk.bf16.vlgmr.msra.gmra.mxu1 %vm560_vm1, %v12384_v55 }
0x12d5   : > { %4100 = vmatpush1.bf16.msra.mxu0 %v9001_v16  ;;  %4141 = vmatpush1.bf16.msra.mxu1 %v9003_v7  ;;  %v10849_v16 = vld [vmem:[%s13769_s10 + $0x500] sm:$0xff]  }
0x12d6   : > { %4101 = vmatprep.subr.bf16.mxu0 %v8998_v59  ;;  %4142 = vmatprep.subr.bf16.mxu1 %v9000_v41  ;;  %v10850_v7 = vld [vmem:[%s13769_s10 + $0x580] sm:$0xff]  }
0x12d7   : > { %4119 = vmatprep.mubr.bf16.mxu0 %v11321_v33  ;;  %4160 = vmatprep.mubr.bf16.mxu1 %v11321_v33 }
0x12d9   : > { %4102 = vmatpush1.bf16.msra.mxu0 %v8997_v42  ;;  %4143 = vmatpush1.bf16.msra.mxu1 %v8999_v43 }
0x12da   : > { %10084 = vmatprep.subr.bf16.mxu0 %v10819_v44  ;;  %10106 = vmatprep.subr.bf16.mxu1 %v10820_v45 }
0x12dc   : > { %9005 = vmatmul.mubr.msk.bf16.vlgmr.msra.gmra.mxu0 %vm560_vm1, %v12384_v55  ;;  %9006 = vmatmul.mubr.msk.bf16.vlgmr.msra.gmra.mxu1 %vm560_vm1, %v12384_v55 }
0x12dd   : > { %10085 = vmatpush3.bf16.msra.mxu0 %v10821_v46  ;;  %10107 = vmatpush3.bf16.msra.mxu1 %v10822_v20 }
0x12de   : > { %10086 = vmatprep.subr.bf16.mxu0 %v10823_v48  ;;  %10108 = vmatprep.subr.bf16.mxu1 %v10824_v49 }
0x12e1   : > { %10087 = vmatpush3.bf16.msra.mxu0 %v10825_v50  ;;  %10109 = vmatpush3.bf16.msra.mxu1 %v10826_v51 }
0x12e2   : > { %10088 = vmatprep.subr.bf16.mxu0 %v10827_v52  ;;  %10110 = vmatprep.subr.bf16.mxu1 %v10828_v53 }
0x12e5   : > { %10089 = vmatpush3.bf16.msra.mxu0 %v10829_v24  ;;  %10111 = vmatpush3.bf16.msra.mxu1 %v10830_v54 }
0x12e6   : > { %10090 = vmatprep.subr.bf16.mxu0 %v10831_v56  ;;  %10112 = vmatprep.subr.bf16.mxu1 %v10832_v57 }
0x12e9   : > { %10091 = vmatpush3.bf16.msra.mxu0 %v10833_v58  ;;  %10113 = vmatpush3.bf16.msra.mxu1 %v10834_v62 }
0x12ea   : > { %10092 = vmatprep.subr.bf16.mxu0 %v10835_v0  ;;  %10114 = vmatprep.subr.bf16.mxu1 %v10836_v17  ;;  %v10853_v17 = vld [vmem:[%s13769_s10 + $0x438] sm:$0xff]  }
0x12ed   : > { %10093 = vmatpush3.bf16.msra.mxu0 %v10837_v2  ;;  %10115 = vmatpush3.bf16.msra.mxu1 %v10838_v5  ;;  %v10854_v2 = vld [vmem:[%s13769_s10 + $0x4b8] sm:$0xff]  }
0x12ee   : > { %10094 = vmatprep.subr.bf16.mxu0 %v10839_v6  ;;  %10116 = vmatprep.subr.bf16.mxu1 %v10840_v8  ;;  %v10855_v8 = vld [vmem:[%s13769_s10 + $0x470] sm:$0xff]  }
0x12f1   : > { %10095 = vmatpush3.bf16.msra.mxu0 %v10841_v9  ;;  %10117 = vmatpush3.bf16.msra.mxu1 %v10842_v10  ;;  %v10856_v9 = vld [vmem:[%s13769_s10 + $0x4f0] sm:$0xff]  }
0x12f2   : > { %10096 = vmatprep.subr.bf16.mxu0 %v10843_v27  ;;  %10118 = vmatprep.subr.bf16.mxu1 %v10844_v12  ;;  %v10857_v12 = vld [vmem:[%s13769_s10 + $0x430] sm:$0xff]  }
0x12f5   : > { %10097 = vmatpush3.bf16.msra.mxu0 %v10845_v13  ;;  %10119 = vmatpush3.bf16.msra.mxu1 %v10846_v31  ;;  %v10858_v13 = vld [vmem:[%s13769_s10 + $0x4b0] sm:$0xff]   ;;  %v10859_v31 = vld [vmem:[%s13769_s10 + $0x468] sm:$0xff]  }
0x12f6   : > { %10098 = vmatprep.subr.bf16.mxu0 %v10847_v14  ;;  %10120 = vmatprep.subr.bf16.mxu1 %v10848_v15  ;;  %v10860_v14 = vld [vmem:[%s13769_s10 + $0x4e8] sm:$0xff]  }
0x12f7   : > { %v10861_v15 = vld [vmem:[%s13769_s10 + $0x428] sm:$0xff]  }
0x12f9   : > { %10099 = vmatpush3.bf16.msra.mxu0 %v10849_v16  ;;  %10121 = vmatpush3.bf16.msra.mxu1 %v10850_v7  ;;  %v10862_v16 = vld [vmem:[%s13769_s10 + $0x4a8] sm:$0xff]   ;;  %v10863_v7 = vld [vmem:[%s13769_s10 + $0x460] sm:$0xff]  }
0x12fa   : > { %10128 = vmatprep.subr.bf16.mxu0 %v10851_v18  ;;  %10150 = vmatprep.subr.bf16.mxu1 %v10852_v19  ;;  %v10864_v18 = vld [vmem:[%s13769_s10 + $0x4e0] sm:$0xff]  }
0x12fb   : > { %v10865_v19 = vld [vmem:[%s13769_s10 + $0x420] sm:$0xff]  }
0x1394   : > { %v12498_v21 = vpop.f32.mrf.mxu0  ;;  %v12500_v4 = vpop.f32.mrf.mxu1 }
0x1396   : > { %v3898_v22 = vpop.f32.mrf.mxu0  ;;  %v3939_v60 = vpop.f32.mrf.mxu1 }
0x1397   : > { %v3899_v43 = vadd.f32 %v3898_v22, %v3806_v35  ;;  %v3940_v44 = vadd.f32 %v3939_v60, %v3814_v25  ;;  %v10866_v22 = vld [vmem:[%s13769_s10 + $0x4a0] sm:$0xff]   ;;  %v10867_v60 = vld [vmem:[%s13769_s10 + $0x458] sm:$0xff]   ;;  %v10873_v35 = vld [vmem:[%s13769_s10 + $0x410] sm:$0xff]  }
0x1398   : > { %v3900_v26 = vpop.f32.mrf.mxu0  ;;  %v3941_v28 = vpop.f32.mrf.mxu1  ;;  %v10874_v25 = vld [vmem:[%s13769_s10 + $0x490] sm:$0xff]  }
0x1399   : > { %v3945_v54 = vmax.f32 %v3899_v43, 0.0  ;;  %v3947_v56 = vmax.f32 %v3940_v44, 0.0  ;;  %v10869_v26 = vld [vmem:[%s13769_s10 + $0x418] sm:$0xff]   ;;  %v10880_v43 = vld [vmem:[%s13769_s10 + $0x4c0] sm:$0xff]  }
0x139a   : > { %v3901_v37 = vpop.f32.mrf.mxu0  ;;  %v3942_v38 = vpop.f32.mrf.mxu1  ;;  %v10870_v28 = vld [vmem:[%s13769_s10 + $0x498] sm:$0xff]   ;;  %v9139_v44 = vld [vmem:[%s13767_s8 + $0x1a0] sm:$0xff] }
0x139b   : > { %v3949_v10 = vpack.c.bf16 %v3945_v54, %v3945_v54  ;;  %v3951_v27 = vpack.c.bf16 %v3947_v56, %v3947_v56  ;;  %v3802_v37 = vrot.slane %v12508_v29, %v11536_v32  ;;  %v3810_v38 = vrot.slane %v12508_v29, %v11797_v3  ;;  %v10878_v29 = vld [vmem:[%s13769_s10 + $0x488] sm:$0xff]  }
0x139c   : > { %v4121_v11 = vpop.f32.mrf.mxu0  ;;  %v4162_v59 = vpop.f32.mrf.mxu1  ;;  %v9138_v54 = vld [vmem:[%s13767_s8 + $0x168] sm:$0xff] }
0x139d   : > { %v4122_v41 = vadd.f32 %v4121_v11, %v4030_v30  ;;  %v4163_v42 = vadd.f32 %v4162_v59, %v4038_v34  ;;  %v10871_v30 = vld [vmem:[%s13769_s10 + $0x450] sm:$0xff]   ;;  %v10877_v11 = vld [vmem:[%s13769_s10 + $0x408] sm:$0xff]   ;;  %v3897_v59 = vadd.f32 %v12498_v21, %v3802_v37  ;;  %v9141_v21 = vld [vmem:[%s13767_s8 + $0x1e0] sm:$0xff] }
0x139e   : > { %v4123_v45 = vpop.f32.mrf.mxu0  ;;  %v4164_v46 = vpop.f32.mrf.mxu1  ;;  %v10872_v34 = vld [vmem:[%s13769_s10 + $0x4d0] sm:$0xff]   ;;  %v9148_v56 = vcombine.low %v9139_v44, %v9141_v21 }
0x139f   : > { %v4124_v20 = vadd.f32 %v4123_v45, %v4034_v39  ;;  %v4165_v48 = vadd.f32 %v4164_v46, %v4042_v40  ;;  %v4169_v49 = vmax.f32 %v4122_v41, 0.0  ;;  %v4171_v50 = vmax.f32 %v4163_v42, 0.0  ;;  %v10875_v39 = vld [vmem:[%s13769_s10 + $0x448] sm:$0xff]   ;;  %v10879_v42 = vld [vmem:[%s13769_s10 + $0x440] sm:$0xff]   ;;  %v10906_v37 = vld [vmem:[%s13769_s10 + $0x690] sm:$0xff]  }
0x13a0   : > { %v4125_v51 = vpop.f32.mrf.mxu0  ;;  %v4166_v52 = vpop.f32.mrf.mxu1  ;;  %v10876_v40 = vld [vmem:[%s13769_s10 + $0x4c8] sm:$0xff]   ;;  %v3938_v41 = vadd.f32 %v12500_v4, %v3810_v38  ;;  %v10881_v46 = vld [vmem:[%s13769_s10 + $0x400] sm:$0xff]  }
0x13a1   : > { %v4170_v53 = vmax.f32 %v4124_v20, 0.0  ;;  %v4172_v24 = vmax.f32 %v4165_v48, 0.0  ;;  %v4173_v5 = vpack.c.bf16 %v4169_v49, %v4169_v49  ;;  %v4175_v6 = vpack.c.bf16 %v4171_v50, %v4171_v50  ;;  %v9140_v4 = vld [vmem:[%s13767_s8 + $0x1a8] sm:$0xff]  ;;  %v10882_v20 = vld [vmem:[%s13769_s10 + $0x480] sm:$0xff]  }
0x13a2   : > { %v4126_v57 = vpop.f32.mrf.mxu0  ;;  %v4167_v58 = vpop.f32.mrf.mxu1  ;;  %v9142_v45 = vld [vmem:[%s13767_s8 + $0x1e8] sm:$0xff]  ;;  %v3944_v48 = vmax.f32 %v3897_v59, 0.0  ;;  %v3946_v49 = vmax.f32 %v3938_v41, 0.0  ;;  %v9149_v50 = vcombine.high %v9139_v44, %v9141_v21  ;;  %v9135_v52 = vld [vmem:[%s13767_s8 + $0x120] sm:$0xff]  ;;  %v12748_v44 = vld [vmem:[%s13767_s8 + $0x1f0] sm:$0xff] }
0x13a3   : > { %v4174_v62 = vpack.c.bf16 %v4170_v53, %v4170_v53  ;;  %v4176_v0 = vpack.c.bf16 %v4172_v24, %v4172_v24  ;;  %v9151_v51 = vcombine.high %v9140_v4, %v9142_v45  ;;  %v9137_v53 = vld [vmem:[%s13767_s8 + $0x160] sm:$0xff]  ;;  %v9136_v24 = vld [vmem:[%s13767_s8 + $0x128] sm:$0xff]  ;;  %v9150_v57 = vcombine.low %v9140_v4, %v9142_v45  ;;  %v12753_v21 = vld [vmem:[%s13767_s8 + $0x1b8] sm:$0xff] }
0x13a4   : > { %v9145_v58 = vcombine.high %v9135_v52, %v9137_v53  ;;  %v10907_v38 = vld [vmem:[%s13769_s10 + $0x648] sm:$0xff]   ;;  %v10912_v59 = vld [vmem:[%s13769_s10 + $0x6c0] sm:$0xff]   ;;  %v12760_v45 = vld [vmem:[%s13767_s8 + $0x1f8] sm:$0xff] }
0x13a5   : > { %4465 = vmatprep.mubr.bf16.mxu0 %v4174_v62  ;;  %4505 = vmatprep.mubr.bf16.mxu1 %v4176_v0  ;;  %v3948_v62 = vpack.c.bf16 %v3944_v48, %v3944_v48  ;;  %v3950_v0 = vpack.c.bf16 %v3946_v49, %v3946_v49  ;;  %v10913_v41 = vld [vmem:[%s13769_s10 + $0x600] sm:$0xff]   ;;  %v9266_v48 = vcombine.high %v12753_v21, %v12760_v45 }
0x13a6   : > { %4466 = vmatmul.mubr.bf16.vlgmr.msra.gmra.mxu0 %v4173_v5  ;;  %4506 = vmatmul.mubr.bf16.vlgmr.msra.gmra.mxu1 %v4175_v6  ;;  %v9146_v5 = vcombine.low %v9136_v24, %v9138_v54  ;;  %v10883_v6 = vld [vmem:[%s13769_s10 + $0x678] sm:$0xff]  }
0x13a7   : > { %10129 = vmatpush3.bf16.msra.mxu0 %v10853_v17  ;;  %10151 = vmatpush3.bf16.msra.mxu1 %v10854_v2  ;;  %v9147_v17 = vcombine.high %v9136_v24, %v9138_v54  ;;  %v9144_v2 = vcombine.low %v9135_v52, %v9137_v53 }
0x13a8   : > { %4737 = vmatprep.mubr.bf16.mxu0 %v3949_v10  ;;  %4777 = vmatprep.mubr.bf16.mxu1 %v3951_v27  ;;  %v10886_v10 = vld [vmem:[%s13769_s10 + $0x6b8] sm:$0xff]   ;;  %v10887_v27 = vld [vmem:[%s13769_s10 + $0x670] sm:$0xff]  }
0x13a9   : > { %10130 = vmatprep.subr.bf16.mxu0 %v10855_v8  ;;  %10152 = vmatprep.subr.bf16.mxu1 %v10856_v9  ;;  %v10884_v8 = vld [vmem:[%s13769_s10 + $0x6f8] sm:$0xff]  }
0x13aa   : > { %v10885_v9 = vld [vmem:[%s13769_s10 + $0x638] sm:$0xff]  }
0x13ab   : > { %10131 = vmatpush3.bf16.msra.mxu0 %v10857_v12  ;;  %10153 = vmatpush3.bf16.msra.mxu1 %v10858_v13  ;;  %v10888_v12 = vld [vmem:[%s13769_s10 + $0x6f0] sm:$0xff]  }
0x13ac   : > { %10132 = vmatprep.subr.bf16.mxu0 %v10859_v31  ;;  %10154 = vmatprep.subr.bf16.mxu1 %v10860_v14  ;;  %v10889_v13 = vld [vmem:[%s13769_s10 + $0x630] sm:$0xff]   ;;  %v10891_v14 = vld [vmem:[%s13769_s10 + $0x668] sm:$0xff]  }
0x13ad   : > { %v10890_v31 = vld [vmem:[%s13769_s10 + $0x6b0] sm:$0xff]  }
0x13af   : > { %10133 = vmatpush3.bf16.msra.mxu0 %v10861_v15  ;;  %10155 = vmatpush3.bf16.msra.mxu1 %v10862_v16  ;;  %v10892_v15 = vld [vmem:[%s13769_s10 + $0x6e8] sm:$0xff]  }
0x13b0   : > { %10134 = vmatprep.subr.bf16.mxu0 %v10863_v7  ;;  %10156 = vmatprep.subr.bf16.mxu1 %v10864_v18  ;;  %v10893_v16 = vld [vmem:[%s13769_s10 + $0x628] sm:$0xff]   ;;  %v10895_v18 = vld [vmem:[%s13769_s10 + $0x660] sm:$0xff]  }
0x13b1   : > { %v10894_v7 = vld [vmem:[%s13769_s10 + $0x6a8] sm:$0xff]  }
0x13b3   : > { %10135 = vmatpush3.bf16.msra.mxu0 %v10865_v19  ;;  %10157 = vmatpush3.bf16.msra.mxu1 %v10866_v22  ;;  %v10896_v19 = vld [vmem:[%s13769_s10 + $0x6e0] sm:$0xff]  }
0x13b4   : > { %10136 = vmatprep.subr.bf16.mxu0 %v10867_v60  ;;  %10158 = vmatprep.subr.bf16.mxu1 %v10868_v23  ;;  %v10897_v22 = vld [vmem:[%s13769_s10 + $0x620] sm:$0xff]   ;;  %v10899_v23 = vld [vmem:[%s13769_s10 + $0x658] sm:$0xff]  }
0x13b5   : > { %v10898_v60 = vld [vmem:[%s13769_s10 + $0x6a0] sm:$0xff]  }
0x13b7   : > { %10137 = vmatpush3.bf16.msra.mxu0 %v10869_v26  ;;  %10159 = vmatpush3.bf16.msra.mxu1 %v10870_v28  ;;  %v10900_v26 = vld [vmem:[%s13769_s10 + $0x6d8] sm:$0xff]  }
0x13b8   : > { %10138 = vmatprep.subr.bf16.mxu0 %v10871_v30  ;;  %10160 = vmatprep.subr.bf16.mxu1 %v10872_v34  ;;  %v10901_v28 = vld [vmem:[%s13769_s10 + $0x618] sm:$0xff]   ;;  %v10903_v34 = vld [vmem:[%s13769_s10 + $0x650] sm:$0xff]  }
0x13b9   : > { %v10902_v30 = vld [vmem:[%s13769_s10 + $0x698] sm:$0xff]  }
0x13bb   : > { %10139 = vmatpush3.bf16.msra.mxu0 %v10873_v35  ;;  %10161 = vmatpush3.bf16.msra.mxu1 %v10874_v25  ;;  %v10904_v35 = vld [vmem:[%s13769_s10 + $0x6d0] sm:$0xff]  }
0x13bc   : > { %10140 = vmatprep.subr.bf16.mxu0 %v10875_v39  ;;  %10162 = vmatprep.subr.bf16.mxu1 %v10876_v40  ;;  %v10905_v25 = vld [vmem:[%s13769_s10 + $0x610] sm:$0xff]   ;;  %v10908_v39 = vld [vmem:[%s13769_s10 + $0x6c8] sm:$0xff]  }
0x13bd   : > { %v10909_v40 = vld [vmem:[%s13769_s10 + $0x608] sm:$0xff]  }
0x13bf   : > { %10141 = vmatpush3.bf16.msra.mxu0 %v10877_v11  ;;  %10163 = vmatpush3.bf16.msra.mxu1 %v10878_v29  ;;  %v10910_v11 = vld [vmem:[%s13769_s10 + $0x688] sm:$0xff]   ;;  %v10911_v29 = vld [vmem:[%s13769_s10 + $0x640] sm:$0xff]  }
0x13c0   : > { %10142 = vmatprep.subr.bf16.mxu0 %v10879_v42  ;;  %10164 = vmatprep.subr.bf16.mxu1 %v10880_v43  ;;  %v10914_v42 = vld [vmem:[%s13769_s10 + $0x680] sm:$0xff]   ;;  %v12743_v43 = vld [vmem:[%s13767_s8 + $0x1b0] sm:$0xff] }
0x13c1   : > { %v9264_v4 = vcombine.high %v12743_v43, %v12748_v44 }
0x13c3   : > { %10143 = vmatpush3.bf16.msra.mxu0 %v10881_v46  ;;  %10165 = vmatpush3.bf16.msra.mxu1 %v10882_v20  ;;  %v9263_v46 = vcombine.low %v12743_v43, %v12748_v44  ;;  %v9265_v20 = vcombine.low %v12753_v21, %v12760_v45 }
0x13c4   : > { %4867 = vmatprep.subr.bf16.mxu0 %v9149_v50  ;;  %4908 = vmatprep.subr.bf16.mxu1 %v9151_v51 }
0x13c6   : > { %4738 = vmatmul.mubr.bf16.vlgmr.msra.gmra.mxu0 %v3948_v62  ;;  %4778 = vmatmul.mubr.bf16.vlgmr.msra.gmra.mxu1 %v3950_v0 }
0x13c7   : > { %4868 = vmatpush1.bf16.msra.mxu0 %v9148_v56  ;;  %4909 = vmatpush1.bf16.msra.mxu1 %v9150_v57 }
0x13c8   : > { %4869 = vmatprep.subr.bf16.mxu0 %v9145_v58  ;;  %4910 = vmatprep.subr.bf16.mxu1 %v9147_v17 }
0x13c9   : > { %4887 = vmatprep.mubr.bf16.mxu0 %v11321_v33  ;;  %4928 = vmatprep.mubr.bf16.mxu1 %v11321_v33 }
0x13cb   : > { %4870 = vmatpush1.bf16.msra.mxu0 %v9144_v2  ;;  %4911 = vmatpush1.bf16.msra.mxu1 %v9146_v5 }
0x13cc   : > { %10172 = vmatprep.subr.bf16.mxu0 %v10883_v6  ;;  %10194 = vmatprep.subr.bf16.mxu1 %v10884_v8  ;;  %v9143_v6 = vld [vmem:[%s13768_s9 + $0x18] sm:$0xf] }
0x13ce   : > { %9152 = vmatmul.mubr.msk.bf16.vlgmr.msra.gmra.mxu0 %vm560_vm1, %v12384_v55  ;;  %9153 = vmatmul.mubr.msk.bf16.vlgmr.msra.gmra.mxu1 %vm560_vm1, %v12384_v55 }
0x13cf   : > { %10173 = vmatpush3.bf16.msra.mxu0 %v10885_v9  ;;  %10195 = vmatpush3.bf16.msra.mxu1 %v10886_v10 }
0x13d0   : > { %10174 = vmatprep.subr.bf16.mxu0 %v10887_v27  ;;  %10196 = vmatprep.subr.bf16.mxu1 %v10888_v12 }
0x13d3   : > { %10175 = vmatpush3.bf16.msra.mxu0 %v10889_v13  ;;  %10197 = vmatpush3.bf16.msra.mxu1 %v10890_v31  ;;  %v4798_v13 = vrot.slane %v9143_v6, %v11536_v32  ;;  %v4806_v31 = vrot.slane %v9143_v6, %v11797_v3 }
0x13d4   : > { %10176 = vmatprep.subr.bf16.mxu0 %v10891_v14  ;;  %10198 = vmatprep.subr.bf16.mxu1 %v10892_v15 }
0x13d7   : > { %10177 = vmatpush3.bf16.msra.mxu0 %v10893_v16  ;;  %10199 = vmatpush3.bf16.msra.mxu1 %v10894_v7  ;;  %v4802_v7 = vrot.slane %v9143_v6, %v11788_v61 }
0x13d8   : > { %10178 = vmatprep.subr.bf16.mxu0 %v10895_v18  ;;  %10200 = vmatprep.subr.bf16.mxu1 %v10896_v19  ;;  %v4810_v18 = vrot.slane %v9143_v6, %v11791_v63  ;;  %v10930_v6 = vld [vmem:[%s13769_s10 + $0x7a0] sm:$0xff]  }
0x13db   : > { %10179 = vmatpush3.bf16.msra.mxu0 %v10897_v22  ;;  %10201 = vmatpush3.bf16.msra.mxu1 %v10898_v60 }
0x13dc   : > { %10180 = vmatprep.subr.bf16.mxu0 %v10899_v23  ;;  %10202 = vmatprep.subr.bf16.mxu1 %v10900_v26 }
0x13df   : > { %10181 = vmatpush3.bf16.msra.mxu0 %v10901_v28  ;;  %10203 = vmatpush3.bf16.msra.mxu1 %v10902_v30 }
0x13e0   : > { %10182 = vmatprep.subr.bf16.mxu0 %v10903_v34  ;;  %10204 = vmatprep.subr.bf16.mxu1 %v10904_v35 }
0x13e3   : > { %10183 = vmatpush3.bf16.msra.mxu0 %v10905_v25  ;;  %10205 = vmatpush3.bf16.msra.mxu1 %v10906_v37 }
0x13e4   : > { %10184 = vmatprep.subr.bf16.mxu0 %v10907_v38  ;;  %10206 = vmatprep.subr.bf16.mxu1 %v10908_v39  ;;  %v9250_v39 = vld [vmem:[%s13767_s8 + $0x130] sm:$0xff] }
0x13e7   : > { %10185 = vmatpush3.bf16.msra.mxu0 %v10909_v40  ;;  %10207 = vmatpush3.bf16.msra.mxu1 %v10910_v11 }
0x13e8   : > { %10186 = vmatprep.subr.bf16.mxu0 %v10911_v29  ;;  %10208 = vmatprep.subr.bf16.mxu1 %v10912_v59  ;;  %v9252_v29 = vld [vmem:[%s13767_s8 + $0x170] sm:$0xff]  ;;  %v9251_v59 = vld [vmem:[%s13767_s8 + $0x138] sm:$0xff] }
0x13eb   : > { %10187 = vmatpush3.bf16.msra.mxu0 %v10913_v41  ;;  %10209 = vmatpush3.bf16.msra.mxu1 %v10914_v42  ;;  %v9253_v41 = vld [vmem:[%s13767_s8 + $0x178] sm:$0xff] }
0x13ec   : > { %5364 = vmatprep.subr.bf16.mxu0 %v9264_v4  ;;  %5405 = vmatprep.subr.bf16.mxu1 %v9266_v48  ;;  %v9260_v48 = vcombine.high %v9250_v39, %v9252_v29 }
0x1466   : > { %v10100_v49 = vpop.f32.mrf.mxu0  ;;  %v10122_v50 = vpop.f32.mrf.mxu1 }
0x1468   : > { %v10101_v51 = vpop.f32.mrf.mxu0  ;;  %v10123_v52 = vpop.f32.mrf.mxu1 }
0x1469   : > { %v10102_v53 = vadd.f32 %v10101_v51, %v10100_v49  ;;  %v10124_v24 = vadd.f32 %v10123_v52, %v10122_v50  ;;  %v9262_v49 = vcombine.high %v9251_v59, %v9253_v41  ;;  %v9259_v50 = vcombine.low %v9250_v39, %v9252_v29  ;;  %v10915_v52 = vld [vmem:[%s13769_s10 + $0x778] sm:$0xff]  }
0x146a   : > { %v10103_v54 = vpop.f32.mrf.mxu0  ;;  %v10125_v56 = vpop.f32.mrf.mxu1  ;;  %v9261_v51 = vcombine.low %v9251_v59, %v9253_v41 }
0x146b   : > { %v4508_v57 = vadd.f32 %v10124_v24, %v10102_v53  ;;  %v10916_v53 = vld [vmem:[%s13769_s10 + $0x7f8] sm:$0xff]   ;;  %v10919_v24 = vld [vmem:[%s13769_s10 + $0x770] sm:$0xff]  }
0x146c   : > { %v10104_v58 = vpop.f32.mrf.mxu0  ;;  %v10126_v62 = vpop.f32.mrf.mxu1  ;;  %v10920_v54 = vld [vmem:[%s13769_s10 + $0x7f0] sm:$0xff]  }
0x146d   : > { %v10921_v56 = vld [vmem:[%s13769_s10 + $0x730] sm:$0xff]   ;;  %v10923_v58 = vld [vmem:[%s13769_s10 + $0x768] sm:$0xff]  }
0x146e   : > { %v10925_v62 = vld [vmem:[%s13769_s10 + $0x728] sm:$0xff]  }
0x1486   : > { %v10144_v0 = vpop.f32.mrf.mxu0  ;;  %v10166_v17 = vpop.f32.mrf.mxu1 }
0x1488   : > { %v10145_v2 = vpop.f32.mrf.mxu0  ;;  %v10167_v5 = vpop.f32.mrf.mxu1 }
0x1489   : > { %v10146_v8 = vadd.f32 %v10145_v2, %v10144_v0  ;;  %v10168_v9 = vadd.f32 %v10167_v5, %v10166_v17  ;;  %v10926_v0 = vld [vmem:[%s13769_s10 + $0x7a8] sm:$0xff]   ;;  %v10927_v17 = vld [vmem:[%s13769_s10 + $0x760] sm:$0xff]  }
0x148a   : > { %v10147_v10 = vpop.f32.mrf.mxu0  ;;  %v10169_v27 = vpop.f32.mrf.mxu1  ;;  %v10928_v2 = vld [vmem:[%s13769_s10 + $0x7e0] sm:$0xff]  }
0x148b   : > { %v4740_v12 = vadd.f32 %v10146_v8, %v4508_v57  ;;  %v10922_v57 = vld [vmem:[%s13769_s10 + $0x7b0] sm:$0xff]   ;;  %v10929_v5 = vld [vmem:[%s13769_s10 + $0x720] sm:$0xff]   ;;  %v10931_v8 = vld [vmem:[%s13769_s10 + $0x758] sm:$0xff]  }
0x148c   : > { %v10148_v14 = vpop.f32.mrf.mxu0  ;;  %v10170_v15 = vpop.f32.mrf.mxu1  ;;  %v10933_v10 = vld [vmem:[%s13769_s10 + $0x718] sm:$0xff]  }
0x148d   : > { %v12773_v16 = vadd.f32 %v10168_v9, %v4740_v12  ;;  %v10932_v9 = vld [vmem:[%s13769_s10 + $0x7d8] sm:$0xff]   ;;  %v10935_v12 = vld [vmem:[%s13769_s10 + $0x750] sm:$0xff]   ;;  %v10939_v15 = vld [vmem:[%s13769_s10 + $0x748] sm:$0xff]  }
0x148e   : > { %v4889_v19 = vpop.f32.mrf.mxu0  ;;  %v4930_v22 = vpop.f32.mrf.mxu1  ;;  %v10934_v27 = vld [vmem:[%s13769_s10 + $0x798] sm:$0xff]   ;;  %v10938_v14 = vld [vmem:[%s13769_s10 + $0x790] sm:$0xff]  }
0x148f   : > { %v4890_v60 = vadd.f32 %v4889_v19, %v4798_v13  ;;  %v4931_v23 = vadd.f32 %v4930_v22, %v4806_v31  ;;  %v10936_v13 = vld [vmem:[%s13769_s10 + $0x7d0] sm:$0xff]   ;;  %v10942_v19 = vld [vmem:[%s13769_s10 + $0x788] sm:$0xff]   ;;  %v10943_v22 = vld [vmem:[%s13769_s10 + $0x740] sm:$0xff]  }
0x1490   : > { %v4891_v26 = vpop.f32.mrf.mxu0  ;;  %v4932_v28 = vpop.f32.mrf.mxu1  ;;  %v10937_v31 = vld [vmem:[%s13769_s10 + $0x710] sm:$0xff]  }
0x1491   : > { %v4892_v30 = vadd.f32 %v4891_v26, %v4802_v7  ;;  %v4933_v34 = vadd.f32 %v4932_v28, %v4810_v18  ;;  %v4937_v35 = vmax.f32 %v4890_v60, 0.0  ;;  %v4939_v25 = vmax.f32 %v4931_v23, 0.0  ;;  %v10940_v7 = vld [vmem:[%s13769_s10 + $0x7c8] sm:$0xff]   ;;  %v10944_v60 = vld [vmem:[%s13769_s10 + $0x7c0] sm:$0xff]  }
0x1492   : > { %v4893_v37 = vpop.f32.mrf.mxu0  ;;  %v4934_v38 = vpop.f32.mrf.mxu1  ;;  %v10941_v18 = vld [vmem:[%s13769_s10 + $0x708] sm:$0xff]   ;;  %v10945_v23 = vld [vmem:[%s13769_s10 + $0x700] sm:$0xff]  }
0x1493   : > { %v4938_v40 = vmax.f32 %v4892_v30, 0.0  ;;  %v4940_v11 = vmax.f32 %v4933_v34, 0.0  ;;  %v4941_v4 = vpack.c.bf16 %v4937_v35, %v4937_v35  ;;  %v4943_v45 = vpack.c.bf16 %v4939_v25, %v4939_v25  ;;  %v10946_v26 = vld [vmem:[%s13769_s10 + $0x780] sm:$0xff]   ;;  %v9258_v25 = vld [vmem:[%s13768_s9 + $0x1c] sm:$0xf] }
0x1494   : > { %v4894_v42 = vpop.f32.mrf.mxu0  ;;  %v4935_v43 = vpop.f32.mrf.mxu1  ;;  %v5295_v29 = vrot.slane %v9258_v25, %v11536_v32  ;;  %v5303_v59 = vrot.slane %v9258_v25, %v11797_v3 }
0x1495   : > { %v4942_v44 = vpack.c.bf16 %v4938_v40, %v4938_v40  ;;  %v4944_v21 = vpack.c.bf16 %v4940_v11, %v4940_v11 }
0x1497   : > { %5233 = vmatprep.mubr.bf16.mxu0 %v4942_v44  ;;  %5273 = vmatprep.mubr.bf16.mxu1 %v4944_v21  ;;  %v5299_v44 = vrot.slane %v9258_v25, %v11788_v61  ;;  %v5307_v21 = vrot.slane %v9258_v25, %v11791_v63 }
0x1498   : > { %5234 = vmatmul.mubr.bf16.vlgmr.msra.gmra.mxu0 %v4941_v4  ;;  %5274 = vmatmul.mubr.bf16.vlgmr.msra.gmra.mxu1 %v4943_v45 }
0x1499   : > { %5365 = vmatpush1.bf16.msra.mxu0 %v9263_v46  ;;  %5406 = vmatpush1.bf16.msra.mxu1 %v9265_v20  ;;  %v10917_v46 = vld [vmem:[%s13769_s10 + $0x738] sm:$0xff]  }
0x149a   : > { %5366 = vmatprep.subr.bf16.mxu0 %v9260_v48  ;;  %5407 = vmatprep.subr.bf16.mxu1 %v9262_v49  ;;  %v10918_v20 = vld [vmem:[%s13769_s10 + $0x7b8] sm:$0xff]  }
0x149b   : > { %5384 = vmatprep.mubr.bf16.mxu0 %v11321_v33  ;;  %5425 = vmatprep.mubr.bf16.mxu1 %v11321_v33 }
0x149d   : > { %5367 = vmatpush1.bf16.msra.mxu0 %v9259_v50  ;;  %5408 = vmatpush1.bf16.msra.mxu1 %v9261_v51 }
0x149e   : > { %10216 = vmatprep.subr.bf16.mxu0 %v10915_v52  ;;  %10238 = vmatprep.subr.bf16.mxu1 %v10916_v53 }
0x14a0   : > { %9267 = vmatmul.mubr.msk.bf16.vlgmr.msra.gmra.mxu0 %vm560_vm1, %v12384_v55  ;;  %9268 = vmatmul.mubr.msk.bf16.vlgmr.msra.gmra.mxu1 %vm560_vm1, %v12384_v55  ;;  %v10924_v55 = vld [vmem:[%s13769_s10 + $0x7e8] sm:$0xff]  }
0x14a1   : > { %10217 = vmatpush3.bf16.msra.mxu0 %v10917_v46  ;;  %10239 = vmatpush3.bf16.msra.mxu1 %v10918_v20 }
0x14a2   : > { %10218 = vmatprep.subr.bf16.mxu0 %v10919_v24  ;;  %10240 = vmatprep.subr.bf16.mxu1 %v10920_v54 }
0x14a5   : > { %10219 = vmatpush3.bf16.msra.mxu0 %v10921_v56  ;;  %10241 = vmatpush3.bf16.msra.mxu1 %v10922_v57 }
0x14a6   : > { %10220 = vmatprep.subr.bf16.mxu0 %v10923_v58  ;;  %10242 = vmatprep.subr.bf16.mxu1 %v10924_v55 }
0x14a9   : > { %10221 = vmatpush3.bf16.msra.mxu0 %v10925_v62  ;;  %10243 = vmatpush3.bf16.msra.mxu1 %v10926_v0 }
0x14aa   : > { %10222 = vmatprep.subr.bf16.mxu0 %v10927_v17  ;;  %10244 = vmatprep.subr.bf16.mxu1 %v10928_v2 }
0x14ad   : > { %10223 = vmatpush3.bf16.msra.mxu0 %v10929_v5  ;;  %10245 = vmatpush3.bf16.msra.mxu1 %v10930_v6 }
0x14ae   : > { %10224 = vmatprep.subr.bf16.mxu0 %v10931_v8  ;;  %10246 = vmatprep.subr.bf16.mxu1 %v10932_v9 }
0x14b1   : > { %10225 = vmatpush3.bf16.msra.mxu0 %v10933_v10  ;;  %10247 = vmatpush3.bf16.msra.mxu1 %v10934_v27 }
0x14b2   : > { %10226 = vmatprep.subr.bf16.mxu0 %v10935_v12  ;;  %10248 = vmatprep.subr.bf16.mxu1 %v10936_v13 }
0x14b5   : > { %10227 = vmatpush3.bf16.msra.mxu0 %v10937_v31  ;;  %10249 = vmatpush3.bf16.msra.mxu1 %v10938_v14 }
0x14b6   : > { %10228 = vmatprep.subr.bf16.mxu0 %v10939_v15  ;;  %10250 = vmatprep.subr.bf16.mxu1 %v10940_v7  ;;  %v9366_v15 = vld [vmem:[%s13770_s11 + $0x1] ss:$0 sm:$0xff] }
0x14b9   : > { %10229 = vmatpush3.bf16.msra.mxu0 %v10941_v18  ;;  %10251 = vmatpush3.bf16.msra.mxu1 %v10942_v19 }
0x14ba   : > { %10230 = vmatprep.subr.bf16.mxu0 %v10943_v22  ;;  %10252 = vmatprep.subr.bf16.mxu1 %v10944_v60 }
0x14bd   : > { %10231 = vmatpush3.bf16.msra.mxu0 %v10945_v23  ;;  %10253 = vmatpush3.bf16.msra.mxu1 %v10946_v26 }
0x14be   : > { %10567 = vmatprep.subr.bf16.mxu0 %v11316_v1  ;;  %10575 = vmatprep.subr.bf16.mxu1 %v11316_v1 }
0x1558   : > { %v10188_v28 = vpop.f32.mrf.mxu0  ;;  %v10210_v30 = vpop.f32.mrf.mxu1 }
0x155a   : > { %v10189_v34 = vpop.f32.mrf.mxu0  ;;  %v10211_v35 = vpop.f32.mrf.mxu1 }
0x155b   : > { %v10190_v37 = vadd.f32 %v10189_v34, %v10188_v28  ;;  %v10212_v38 = vadd.f32 %v10211_v35, %v10210_v30  ;;  %v10947_v34 = vld [vmem:[%s13761_s2 + $0x28] sm:$0xff]   ;;  %v10948_v35 = vld [vmem:[%s13761_s2 + $0x20] sm:$0xff]  }
0x155c   : > { %v10191_v39 = vpop.f32.mrf.mxu0  ;;  %v10213_v40 = vpop.f32.mrf.mxu1 }
0x155d   : > { %v5276_v11 = vadd.f32 %v10212_v38, %v10190_v37 }
0x155e   : > { %v10192_v41 = vpop.f32.mrf.mxu0  ;;  %v10214_v42 = vpop.f32.mrf.mxu1 }
0x155f   : > { %v5281_v43 = vadd.f32 %v5276_v11, %v12773_v16 }
0x1560   : > { %v5386_v4 = vpop.f32.mrf.mxu0  ;;  %v5427_v45 = vpop.f32.mrf.mxu1 }
0x1561   : > { %v5387_v48 = vadd.f32 %v5386_v4, %v5295_v29  ;;  %v5428_v49 = vadd.f32 %v5427_v45, %v5303_v59  ;;  %v11164_v59 = vld [vmem:[%s13763_s4 + $0x1] ss:$0 sm:$0xff] }
0x1562   : > { %v5388_v50 = vpop.f32.mrf.mxu0  ;;  %v5429_v51 = vpop.f32.mrf.mxu1 }
0x1563   : > { %v5389_v52 = vadd.f32 %v5388_v50, %v5299_v44  ;;  %v5430_v53 = vadd.f32 %v5429_v51, %v5307_v21  ;;  %v5434_v46 = vmax.f32 %v5387_v48, 0.0  ;;  %v5436_v20 = vmax.f32 %v5428_v49, 0.0  ;;  %v11165_v44 = vld [vmem:[%s13764_s5 + $0x1] ss:$0 sm:$0xff] }
0x1564   : > { %v5390_v24 = vpop.f32.mrf.mxu0  ;;  %v5431_v54 = vpop.f32.mrf.mxu1 }
0x1565   : > { %v5435_v56 = vmax.f32 %v5389_v52, 0.0  ;;  %v5437_v57 = vmax.f32 %v5430_v53, 0.0  ;;  %v5438_v0 = vpack.c.bf16 %v5434_v46, %v5434_v46  ;;  %v5440_v17 = vpack.c.bf16 %v5436_v20, %v5436_v20  ;;  %v9372_v52 = vld [vmem:[%s13762_s3 + $0x2] ss:$0 sm:$0xff] }
0x1566   : > { %v5391_v58 = vpop.f32.mrf.mxu0  ;;  %v5432_v16 = vpop.f32.mrf.mxu1 }
0x1567   : > { %v5439_v55 = vpack.c.bf16 %v5435_v56, %v5435_v56  ;;  %v5441_v62 = vpack.c.bf16 %v5437_v57, %v5437_v57 }
0x1569   : > { %5730 = vmatprep.mubr.bf16.mxu0 %v5439_v55  ;;  %5770 = vmatprep.mubr.bf16.mxu1 %v5441_v62 }
0x156a   : > { %5731 = vmatmul.mubr.bf16.vlgmr.msra.gmra.mxu0 %v5438_v0  ;;  %5771 = vmatmul.mubr.bf16.vlgmr.msra.gmra.mxu1 %v5440_v17 }
0x156b   : > { %10571 = vmatprep.mubr.msk.bf16.mxu0 %vm11317_vm0, %v11316_v1  ;;  %10577 = vmatprep.mubr.msk.bf16.mxu1 %vm11317_vm0, %v11316_v1 }
0x156c   : > { %10568 = vmatpush3.bf16.msra.mxu0 %v10947_v34 }
0x156d   : > { %10569 = vmatprep.subr.bf16.mxu0 %v11316_v1 }
0x1570   : > { %10570 = vmatpush3.bf16.msra.mxu0 %v10948_v35 }
0x1571   : > { %10581 = vmatprep.subr.bf16.mxu0 %v11316_v1 }
0x162a   : > { %v10232_v2 = vpop.f32.mrf.mxu0  ;;  %v10254_v5 = vpop.f32.mrf.mxu1 }
0x162c   : > { %v10233_v6 = vpop.f32.mrf.mxu0  ;;  %v10255_v8 = vpop.f32.mrf.mxu1 }
0x162d   : > { %v10234_v9 = vadd.f32 %v10233_v6, %v10232_v2  ;;  %v10256_v10 = vadd.f32 %v10255_v8, %v10254_v5 }
0x162e   : > { %v10235_v27 = vpop.f32.mrf.mxu0  ;;  %v10257_v12 = vpop.f32.mrf.mxu1 }
0x162f   : > { %v5773_v13 = vadd.f32 %v10256_v10, %v10234_v9 }
0x1630   : > { %v10236_v31 = vpop.f32.mrf.mxu0  ;;  %v10258_v14 = vpop.f32.mrf.mxu1 }
0x1631   : > { %v5778_v7 = vadd.f32 %v5773_v13, %v5281_v43 }
0x1633   : > { %v5787_v18 = vadd.f32 %v9366_v15, %v5778_v7 }
0x1635   : > { %v5788_v19 = vadd.f32 %v5787_v18, %v12324_v47 }
0x1637   : > { %v5789_v22 = vsel %vm560_vm1, %v5788_v19, 0.0 }
0x1638   : > { %5790 = vadd.xlane.f32.xlu1 %v5789_v22 }
0x16c1   : > { %v5791_v60 = vpop.xlane.xlu1 %5790 }
0x16c2   : > { %v5792_v23 = vmul.f32 0.03125, %v5791_v60 }
0x16c4   : > { %v5793_v26 = vsub.f32 %v5788_v19, %v5792_v23 }
0x16c6   : > { %v5794_v28 = vmul.f32 %v5793_v26, %v5793_v26  ;;  %v5808_v41 = vmul.f32 %v11164_v59, %v5793_v26 }
0x16c8   : > { %v5795_v30 = vsel %vm560_vm1, %v5794_v28, 0.0 }
0x16c9   : > { %5796 = vadd.xlane.f32.xlu0 %v5795_v30 }
0x1752   : > { %v5797_v47 = vpop.xlane.xlu0 %5796 }
0x1753   : > { %v5798_v25 = vmul.f32 0.032258064, %v5797_v47 }
0x1755   : > { %11129 = vrsqrt.f32 %v5798_v25  ;;  %vm5801_vm9 = vcmp.eq.f32.partialorder %v5798_v25, inf  ;;  %v5804_v39 = vand.u32 2147483648, %v5798_v25  ;;  %vm5803_vm10 = vcmp.eq.f32.partialorder %v5798_v25, 0.0 }
0x1762   : > { %v11130_v37 = vpop.eup %11129 }
0x1763   : > { %v5800_v38 = vmul.f32 %v11130_v37, %v5798_v25 }
0x1765   : > { %v5802_v40 = vsel %vm5801_vm9, %v5798_v25, %v5800_v38 }
0x1766   : > { %v5805_v11 = vsel %vm5803_vm10, %v5804_v39, %v5802_v40 }
0x1767   : > { %v5806_v29 = vadd.f32 1e-06, %v5805_v11 }
0x1769   : > { %11131 = vrcp.f32 %v5806_v29 }
0x1776   : > { %v11132_v42 = vpop.eup %11131 }
0x1777   : > { %v5809_v43 = vmul.f32 %v11132_v42, %v5808_v41 }
0x1779   : > { %v12925_v21 = vadd.f32 %v11165_v44, %v5809_v43 }
0x177b   : > { %5884 = vrot.lane.b32.xlu0 %v12925_v21, %s13826_s25  ;;  %5881 = vrot.lane.b32.xlu1 %v12925_v21, %s13827_s0  ;;  %v5811_v4 = vpack.c.bf16 %v12925_v21, %v12925_v21 }
0x177d   : > { %10572 = vmatmul.mubr.msk.bf16.vlgmr.msra.gmra.mxu0 %vm560_vm1, %v5811_v4  ;;  %v5910_v45 = vsel %vm631_vm2, %v5811_v4, 0  ;;  %v6153_v6 = vsel %vm884_vm3, %v5811_v4, 0 }
0x177e   : > { %10576 = vmatpush3.bf16.xpose.msra.mxu1 %v5910_v45  ;;  %10583 = vmatprep.mubr.msk.bf16.mxu0 %vm11317_vm0, %v11316_v1 }
0x177f   : > { %5887 = vrot.lane.b32.xlu1 %v12925_v21, %s13828_s1  ;;  %10587 = vmatprep.subr.bf16.mxu1 %v11316_v1 }
0x17ed   : > { %v5882_v48 = vpop.permute.xlu1 %5881  ;;  %v5885_v51 = vpop.permute.xlu0 %5884 }
0x17ee   : > { %v5890_v49 = vpack.c.bf16 %v5882_v48, %v5882_v48  ;;  %v12945_v46 = vpack.c.bf16 %v5885_v51, %v5885_v51 }
0x17f0   : > { %v5956_v50 = vsel %vm631_vm2, %v5890_v49, 0  ;;  %v6002_v57 = vsel %vm631_vm2, %v12945_v46, 0  ;;  %v6198_v10 = vsel %vm884_vm3, %v5890_v49, 0 }
0x17f1   : > { %10582 = vmatpush3.bf16.xpose.msra.mxu0 %v5956_v50  ;;  %v5888_v16 = vpop.permute.xlu1 %5887 }
0x17f2   : > { %10593 = vmatprep.subr.bf16.mxu0 %v11316_v1  ;;  %v12956_v55 = vpack.c.bf16 %v5888_v16, %v5888_v16 }
0x17f4   : > { %v6048_v5 = vsel %vm631_vm2, %v12956_v55, 0 }
0x183d   : > { %v5874_v53 = vpop.f32.mrf.mxu0 }
0x183e   : > { %v5875_v20 = vadd.f32 %v9372_v52, %v5874_v53 }
0x183f   : > { %v10573_v24 = vpop.f32.mrf.mxu0 }
0x1840   : > { %v5903_v54 = vpack.c.bf16 %v5875_v20, %v5875_v20  ;;  %5897 = vrot.lane.b32.xlu0 %v5875_v20, %s13826_s25  ;;  %5894 = vrot.lane.b32.xlu1 %v5875_v20, %s13827_s0  ;;  %s12991_s25 = scalar_lea.vmem [#allocation7], %s11567_s26  ;;  %s13617_s26 = sshll.u32 %s11431_s22, 9 }
0x1841   : > { %v5877_v56 = vpop.f32.mrf.mxu0 }
0x1842   : > { %10578 = vmatmul.mubr.msk.bf16.vlgmr.msra.gmra.mxu1 %vm631_vm2, %v5903_v54 }
0x1843   : > { %10588 = vmatpush3.bf16.xpose.msra.mxu1 %v6002_v57  ;;  %v10574_v58 = vpop.f32.mrf.mxu0  ;;  %10589 = vmatprep.mubr.msk.bf16.mxu1 %vm11317_vm0, %v11316_v1 }
0x1844   : > { %5900 = vrot.lane.b32.xlu1 %v5875_v20, %s13828_s1  ;;  %10599 = vmatprep.subr.bf16.mxu1 %v11316_v1 }
0x18b2   : > { %v5898_v62 = vpop.permute.xlu0 %5897  ;;  %v5895_v0 = vpop.permute.xlu1 %5894 }
0x18b3   : > { %v5905_v17 = vpack.c.bf16 %v5898_v62, %v5898_v62  ;;  %v5904_v2 = vpack.c.bf16 %v5895_v0, %v5895_v0 }
0x18b5   : > { %10584 = vmatmul.mubr.msk.bf16.vlgmr.msra.gmra.mxu0 %vm631_vm2, %v5904_v2  ;;  %10590 = vmatmul.mubr.msk.bf16.vlgmr.msra.gmra.mxu1 %vm631_vm2, %v5905_v17 }
0x18b6   : > { %10594 = vmatpush3.bf16.xpose.msra.mxu0 %v6048_v5  ;;  %10600 = vmatpush3.bf16.msra.mxu1 %v6153_v6  ;;  %v5901_v8 = vpop.permute.xlu1 %5900 }
0x18b7   : > { %10595 = vmatprep.mubr.msk.bf16.mxu0 %vm11317_vm0, %v11316_v1  ;;  %10605 = vmatprep.subr.bf16.mxu0 %v11316_v1  ;;  %v5906_v9 = vpack.c.bf16 %v5901_v8, %v5901_v8  ;;  %v6243_v8 = vsel %vm884_vm3, %v12945_v46, 0 }
0x18b8   : > { %10601 = vmatprep.mubr.msk.bf16.mxu1 %vm11317_vm0, %v11316_v1  ;;  %10611 = vmatprep.subr.bf16.mxu1 %v11316_v1 }
0x18bd   : > { %10596 = vmatmul.mubr.msk.bf16.vlgmr.msra.gmra.mxu0 %vm631_vm2, %v5906_v9 }
0x18be   : > { %10606 = vmatpush3.bf16.msra.mxu0 %v6198_v10  ;;  %10607 = vmatprep.mubr.msk.bf16.mxu0 %vm11317_vm0, %v11316_v1 }
0x18bf   : > { %10617 = vmatprep.subr.bf16.mxu0 %v11316_v1 }
0x1902   : > { %v5946_v27 = vpop.f32.mrf.mxu1 }
0x1903   : > { %v6090_v12 = vmul.f32 0.35355338, %v5946_v27 }
0x1904   : > { %v10579_v13 = vpop.f32.mrf.mxu1 }
0x1905   : > { %v6094_v31 = vsel %vm11540_vm5, -1e+09, %v6090_v12 }
0x1906   : > { %v5949_v14 = vpop.f32.mrf.mxu1  ;;  %v6098_v15 = vsel %vm631_vm2, %v6094_v31, -inf }
0x1907   : > { %6099 = vmax.xlane.f32.xlu0 %v6098_v15 }
0x1908   : > { %v10580_v7 = vpop.f32.mrf.mxu1 }
0x1909   : > { %v6288_v7 = vsel %vm884_vm3, %v12956_v55, 0 }
0x1975   : > { %v5992_v18 = vpop.f32.mrf.mxu0  ;;  %v6038_v19 = vpop.f32.mrf.mxu1 }
0x1976   : > { %v6091_v22 = vmul.f32 0.35355338, %v5992_v18  ;;  %v6092_v60 = vmul.f32 0.35355338, %v6038_v19 }
0x1977   : > { %v10585_v23 = vpop.f32.mrf.mxu0  ;;  %v10591_v26 = vpop.f32.mrf.mxu1 }
0x1978   : > { %v6096_v28 = vsel %vm11540_vm5, -1e+09, %v6092_v60  ;;  %v6095_v30 = vsel %vm11540_vm5, -1e+09, %v6091_v22 }
0x1979   : > { %v5995_v34 = vpop.f32.mrf.mxu0  ;;  %v6041_v35 = vpop.f32.mrf.mxu1  ;;  %v6104_v47 = vsel %vm631_vm2, %v6096_v28, -inf  ;;  %v6101_v25 = vsel %vm631_vm2, %v6095_v30, -inf }
0x197a   : > { %6105 = vmax.xlane.f32.xlu0 %v6104_v47  ;;  %6102 = vmax.xlane.f32.xlu1 %v6101_v25 }
0x197b   : > { %v10586_v37 = vpop.f32.mrf.mxu0  ;;  %v10592_v38 = vpop.f32.mrf.mxu1 }
0x197d   : > { %v6084_v39 = vpop.f32.mrf.mxu0 }
0x197e   : > { %v6093_v40 = vmul.f32 0.35355338, %v6084_v39 }
0x197f   : > { %v10597_v11 = vpop.f32.mrf.mxu0 }
0x1980   : > { %v6097_v29 = vsel %vm11540_vm5, -1e+09, %v6093_v40 }
0x1981   : > { %v6087_v59 = vpop.f32.mrf.mxu0  ;;  %v6107_v41 = vsel %vm631_vm2, %v6097_v29, -inf }
0x1982   : > { %6108 = vmax.xlane.f32.xlu0 %v6107_v41 }
0x1983   : > { %v10598_v42 = vpop.f32.mrf.mxu0 }
0x1990   : > { %v6100_v43 = vpop.xlane.xlu0 %6099 }
0x1991   : > { %v6110_v44 = vsub.f32 %v6094_v31, %v6100_v43 }
0x1993   : > { %v6114_v4 = vmul.f32 1.442695, %v6110_v44 }
0x1995   : > { %11133 = vpow2.f32 %v6114_v4 }
0x19a2   : > { %v11134_v45 = vpop.eup %11133 }
0x19a3   : > { %v6122_v48 = vsel %vm631_vm2, %v11134_v45, 0.0 }
0x19a4   : > { %6123 = vadd.xlane.f32.xlu1 %v6122_v48 }
0x1a03   : > { %v6106_v49 = vpop.xlane.xlu0 %6105  ;;  %v6103_v50 = vpop.xlane.xlu1 %6102 }
0x1a04   : > { %v6112_v51 = vsub.f32 %v6096_v28, %v6106_v49  ;;  %v6111_v52 = vsub.f32 %v6095_v30, %v6103_v50 }
0x1a06   : > { %v6118_v53 = vmul.f32 1.442695, %v6112_v51  ;;  %v6116_v36 = vmul.f32 1.442695, %v6111_v52 }
0x1a08   : > { %11135 = vpow2.f32 %v6118_v53 }
0x1a09   : > { %11137 = vpow2.f32 %v6116_v36 }
0x1a0b   : > { %v6109_v20 = vpop.xlane.xlu0 %6108 }
0x1a0c   : > { %v6113_v24 = vsub.f32 %v6097_v29, %v6109_v20 }
0x1a0e   : > { %v6120_v54 = vmul.f32 1.442695, %v6113_v24 }
0x1a10   : > { %11139 = vpow2.f32 %v6120_v54 }
0x1a15   : > { %v11136_v56 = vpop.eup %11135 }
0x1a16   : > { %v11138_v57 = vpop.eup %11137  ;;  %v6128_v58 = vsel %vm631_vm2, %v11136_v56, 0.0 }
0x1a17   : > { %6129 = vadd.xlane.f32.xlu1 %v6128_v58  ;;  %v6125_v16 = vsel %vm631_vm2, %v11138_v57, 0.0  ;;  %v9386_v58 = vld [vmem:[%s13763_s4 + $0x2] ss:$0 sm:$0xff] }
0x1a18   : > { %6126 = vadd.xlane.f32.xlu0 %v6125_v16 }
0x1a1d   : > { %v11140_v62 = vpop.eup %11139 }
0x1a1e   : > { %v6131_v0 = vsel %vm631_vm2, %v11140_v62, 0.0 }
0x1a1f   : > { %6132 = vadd.xlane.f32.xlu0 %v6131_v0  ;;  %v9387_v0 = vld [vmem:[%s13764_s5 + $0x2] ss:$0 sm:$0xff] }
0x1a2d   : > { %v6124_v17 = vpop.xlane.xlu1 %6123 }
0x1a2e   : > { %11141 = vrcp.f32 %v6124_v17 }
0x1a3b   : > { %v11142_v2 = vpop.eup %11141 }
0x1a3c   : > { %v6138_v5 = vmul.f32 %v11142_v2, %v11134_v45 }
0x1a3e   : > { %6142 = vst.msk [vmem:[%s12991_s25] sm:$0xff] %vm631_vm2, %v6138_v5  ;;  %v6146_v6 = vpack.c.bf16 %v6138_v5, %v6138_v5 }
0x1a40   : > { %10602 = vmatmul.mubr.msk.bf16.vlgmr.msra.gmra.mxu1 %vm631_vm2, %v6146_v6 }
0x1a41   : > { %10612 = vmatpush3.bf16.msra.mxu1 %v6243_v8  ;;  %10613 = vmatprep.mubr.msk.bf16.mxu1 %vm11317_vm0, %v11316_v1 }
0x1aa0   : > { %v6130_v9 = vpop.xlane.xlu1 %6129 }
0x1aa1   : > { %11143 = vrcp.f32 %v6130_v9  ;;  %v6127_v10 = vpop.xlane.xlu0 %6126 }
0x1aa2   : > { %11145 = vrcp.f32 %v6127_v10 }
0x1aa8   : > { %v6133_v27 = vpop.xlane.xlu0 %6132 }
0x1aa9   : > { %11147 = vrcp.f32 %v6133_v27 }
0x1aae   : > { %v11144_v12 = vpop.eup %11143 }
0x1aaf   : > { %v11146_v13 = vpop.eup %11145  ;;  %v6140_v31 = vmul.f32 %v11144_v12, %v11136_v56  ;;  %v9396_v12 = vld [vmem:[%s13767_s8 + $0x280] sm:$0xff] }
0x1ab0   : > { %v6139_v14 = vmul.f32 %v11146_v13, %v11138_v57  ;;  %v9398_v13 = vld [vmem:[%s13767_s8 + $0x2c0] sm:$0xff] }
0x1ab1   : > { %6144 = vst.msk [vmem:[%s12991_s25 + $0x10] sm:$0xff] %vm631_vm2, %v6140_v31  ;;  %v6148_v46 = vpack.c.bf16 %v6140_v31, %v6140_v31  ;;  %v9397_v31 = vld [vmem:[%s13767_s8 + $0x288] sm:$0xff] }
0x1ab2   : > { %6143 = vst.msk [vmem:[%s12991_s25 + $0x8] sm:$0xff] %vm631_vm2, %v6139_v14  ;;  %v6147_v15 = vpack.c.bf16 %v6139_v14, %v6139_v14  ;;  %v9405_v14 = vcombine.low %v9396_v12, %v9398_v13 }
0x1ab3   : > { %10614 = vmatmul.mubr.msk.bf16.vlgmr.msra.gmra.mxu1 %vm631_vm2, %v6148_v46  ;;  %v9406_v46 = vcombine.high %v9396_v12, %v9398_v13  ;;  %v10960_v12 = vld [vmem:[%s13769_s10 + $0x9a8] sm:$0xff]   ;;  %v10961_v13 = vld [vmem:[%s13769_s10 + $0x960] sm:$0xff]  }
0x1ab4   : > { %10608 = vmatmul.mubr.msk.bf16.vlgmr.msra.gmra.mxu0 %vm631_vm2, %v6147_v15  ;;  %6530 = vmatprep.mubr.bf16.mxu1 %v11321_v33  ;;  %v9399_v15 = vld [vmem:[%s13767_s8 + $0x2c8] sm:$0xff] }
0x1ab5   : > { %10618 = vmatpush3.bf16.msra.mxu0 %v6288_v7  ;;  %10619 = vmatprep.mubr.msk.bf16.mxu0 %vm11317_vm0, %v11316_v1  ;;  %v9392_v7 = vld [vmem:[%s13767_s8 + $0x200] sm:$0xff] }
0x1ab6   : > { %v11148_v18 = vpop.eup %11147  ;;  %6510 = vmatprep.subr.bf16.mxu1 %v9406_v46  ;;  %v10964_v46 = vld [vmem:[%s13769_s10 + $0x9a0] sm:$0xff]  }
0x1ab7   : > { %v6141_v19 = vmul.f32 %v11148_v18, %v11140_v62  ;;  %v9394_v18 = vld [vmem:[%s13767_s8 + $0x240] sm:$0xff]  ;;  %6511 = vmatpush1.bf16.msra.mxu1 %v9405_v14 }
0x1ab8   : > { %v10963_v14 = vld [vmem:[%s13769_s10 + $0x920] sm:$0xff]  }
0x1ab9   : > { %6145 = vst.msk [vmem:[%s12991_s25 + $0x18] sm:$0xff] %vm631_vm2, %v6141_v19  ;;  %v6149_v22 = vpack.c.bf16 %v6141_v19, %v6141_v19  ;;  %v9407_v19 = vcombine.low %v9397_v31, %v9399_v15 }
0x1abc   : > { %10620 = vmatmul.mubr.msk.bf16.vlgmr.msra.gmra.mxu0 %vm631_vm2, %v6149_v22  ;;  %v9408_v22 = vcombine.high %v9397_v31, %v9399_v15  ;;  %v10962_v31 = vld [vmem:[%s13769_s10 + $0x9e0] sm:$0xff]   ;;  %v10965_v15 = vld [vmem:[%s13769_s10 + $0x958] sm:$0xff]  }
0x1abd   : > { %6571 = vmatprep.mubr.bf16.mxu0 %v11321_v33 }
0x1abe   : > { %6551 = vmatprep.subr.bf16.mxu0 %v9408_v22  ;;  %v10969_v22 = vld [vmem:[%s13769_s10 + $0x950] sm:$0xff]  }
0x1abf   : > { %6552 = vmatpush1.bf16.msra.mxu0 %v9407_v19  ;;  %v10968_v19 = vld [vmem:[%s13769_s10 + $0x998] sm:$0xff]  }
0x1b00   : > { %v6189_v60 = vpop.f32.mrf.mxu1 }
0x1b02   : > { %v10603_v23 = vpop.f32.mrf.mxu1 }
0x1b03   : > { %v9393_v23 = vld [vmem:[%s13767_s8 + $0x208] sm:$0xff] }
0x1b04   : > { %v6192_v55 = vpop.f32.mrf.mxu1 }
0x1b05   : > { %v9395_v55 = vld [vmem:[%s13767_s8 + $0x248] sm:$0xff] }
0x1b06   : > { %v10604_v26 = vpop.f32.mrf.mxu1 }
0x1b07   : > { %v9404_v26 = vcombine.high %v9393_v23, %v9395_v55 }
0x1b09   : > { %6553 = vmatprep.subr.bf16.mxu0 %v9404_v26  ;;  %v10973_v26 = vld [vmem:[%s13769_s10 + $0x948] sm:$0xff]  }
0x1b73   : > { %v6279_v28 = vpop.f32.mrf.mxu1 }
0x1b74   : > { %v6234_v30 = vpop.f32.mrf.mxu0  ;;  %6335 = vrot.lane.b32.xlu0 %v6279_v28, %s13831_s20  ;;  %v9401_v28 = vcombine.low %v9392_v7, %v9394_v18  ;;  %s13834_s20 = sld [smem:[#allocation25_spill]] }
0x1b75   : > { %6331 = vrot.lane.b32.xlu1 %v6234_v30, %s13830_s19  ;;  %v10615_v1 = vpop.f32.mrf.mxu1  ;;  %v9403_v30 = vcombine.low %v9393_v23, %v9395_v55  ;;  %v10971_v23 = vld [vmem:[%s13769_s10 + $0x910] sm:$0xff]  }
0x1b76   : > { %v10609_v34 = vpop.f32.mrf.mxu0  ;;  %v9479_v1 = vld [vmem:[%s13767_s8 + $0x290] sm:$0xff] }
0x1b77   : > { %v6282_v35 = vpop.f32.mrf.mxu1  ;;  %6554 = vmatpush1.bf16.msra.mxu0 %v9403_v30  ;;  %v9481_v34 = vld [vmem:[%s13767_s8 + $0x2d0] sm:$0xff]  ;;  %v10975_v30 = vld [vmem:[%s13769_s10 + $0x908] sm:$0xff]  }
0x1b78   : > { %v6237_v47 = vpop.f32.mrf.mxu0  ;;  %v9480_v35 = vld [vmem:[%s13767_s8 + $0x298] sm:$0xff]  ;;  %v10972_v55 = vld [vmem:[%s13769_s10 + $0x990] sm:$0xff]  }
0x1b79   : > { %v10616_v25 = vpop.f32.mrf.mxu1  ;;  %v9489_v47 = vcombine.high %v9479_v1, %v9481_v34 }
0x1b7a   : > { %v10610_v37 = vpop.f32.mrf.mxu0  ;;  %v9482_v25 = vld [vmem:[%s13767_s8 + $0x2d8] sm:$0xff]  ;;  %s13623_s17 = scalar_lea.hbm %s13834_s20, %s13617_s26 }
0x1b7b   : > { %v9488_v37 = vcombine.low %v9479_v1, %v9481_v34  ;;  %v10976_v1 = vld [vmem:[%s13769_s10 + $0x988] sm:$0xff]   ;;  %v10977_v34 = vld [vmem:[%s13769_s10 + $0x940] sm:$0xff]  }
0x1b7c   : > { %v6324_v38 = vpop.f32.mrf.mxu0 }
0x1b7d   : > { %6339 = vrot.lane.b32.xlu1 %v6324_v38, %s13832_s24  ;;  %v9490_v38 = vcombine.low %v9480_v35, %v9482_v25  ;;  %s13835_s24 = smov %s13834_s20 }
0x1b7e   : > { %v10621_v39 = vpop.f32.mrf.mxu0 }
0x1b7f   : > { %v9491_v39 = vcombine.high %v9480_v35, %v9482_v25  ;;  %v10978_v35 = vld [vmem:[%s13769_s10 + $0x9c0] sm:$0xff]  }
0x1b80   : > { %v6327_v40 = vpop.f32.mrf.mxu0  ;;  %v10980_v25 = vld [vmem:[%s13769_s10 + $0x980] sm:$0xff]  }
0x1b81   : > { %6776 = vmatprep.subr.bf16.mxu0 %v9491_v39 }
0x1b82   : > { %v10622_v11 = vpop.f32.mrf.mxu0 }
0x1be6   : > { %v6336_v59 = vpop.permute.xlu0 %6335 }
0x1be7   : > { %v6332_v29 = vpop.permute.xlu1 %6331 }
0x1be8   : > { %v6342_v41 = vsel %vm631_vm2, %v6189_v60, %v6332_v29  ;;  %v9402_v60 = vcombine.high %v9392_v7, %v9394_v18  ;;  %v10966_v7 = vld [vmem:[%s13769_s10 + $0x9d8] sm:$0xff]  }
0x1be9   : > { %v6343_v42 = vsel %vm1075_vm6, %v6342_v41, %v6336_v59  ;;  %v10967_v18 = vld [vmem:[%s13769_s10 + $0x918] sm:$0xff]  }
0x1bea   : > { %6512 = vmatprep.subr.bf16.mxu1 %v9402_v60  ;;  %v10970_v60 = vld [vmem:[%s13769_s10 + $0x9d0] sm:$0xff]  }
0x1beb   : > { %6513 = vmatpush1.bf16.msra.mxu1 %v9401_v28  ;;  %v10974_v28 = vld [vmem:[%s13769_s10 + $0x9c8] sm:$0xff]  }
0x1bec   : > { %6735 = vmatprep.subr.bf16.mxu1 %v9489_v47  ;;  %v10979_v47 = vld [vmem:[%s13769_s10 + $0x900] sm:$0xff]  }
0x1bef   : > { %v6340_v43 = vpop.permute.xlu1 %6339 }
0x1bf0   : > { %v6344_v44 = vsel %vm1077_vm7, %v6343_v42, %v6340_v43 }
0x1bf1   : > { %v6345_v4 = vadd.f32 %v6344_v44, %v12925_v21 }
0x1bf3   : > { %v6350_v45 = vsel %vm560_vm1, %v6345_v4, 0.0 }
0x1bf4   : > { %6351 = vadd.xlane.f32.xlu1 %v6350_v45 }
0x1c7d   : > { %v6352_v48 = vpop.xlane.xlu1 %6351 }
0x1c7e   : > { %v6353_v49 = vmul.f32 0.03125, %v6352_v48 }
0x1c80   : > { %v6354_v50 = vsub.f32 %v6345_v4, %v6353_v49  ;;  %v9390_v4 = vld [vmem:[%s13765_s6 + $0x2] ss:$0 sm:$0xff] }
0x1c81   : > { %v9391_v49 = vld [vmem:[%s13766_s7 + $0x2] ss:$0 sm:$0xff] }
0x1c82   : > { %v6355_v51 = vmul.f32 %v6354_v50, %v6354_v50  ;;  %v6375_v16 = vmul.f32 %v9386_v58, %v6354_v50  ;;  %v10949_v58 = vld [vmem:[%s13769_s10 + $0x978] sm:$0xff]  }
0x1c84   : > { %v6356_v52 = vsel %vm560_vm1, %v6355_v51, 0.0  ;;  %v9475_v51 = vld [vmem:[%s13767_s8 + $0x210] sm:$0xff] }
0x1c85   : > { %6357 = vadd.xlane.f32.xlu0 %v6356_v52  ;;  %v9477_v52 = vld [vmem:[%s13767_s8 + $0x250] sm:$0xff] }
0x1d0e   : > { %v6358_v53 = vpop.xlane.xlu0 %6357 }
0x1d0f   : > { %v6359_v36 = vmul.f32 0.032258064, %v6358_v53  ;;  %v9476_v53 = vld [vmem:[%s13767_s8 + $0x218] sm:$0xff] }
0x1d11   : > { %11149 = vrsqrt.f32 %v6359_v36  ;;  %vm6362_vm0 = vcmp.eq.f32.partialorder %v6359_v36, inf  ;;  %v6365_v54 = vand.u32 2147483648, %v6359_v36  ;;  %vm6364_vm2 = vcmp.eq.f32.partialorder %v6359_v36, 0.0 }
0x1d1e   : > { %v11150_v20 = vpop.eup %11149 }
0x1d1f   : > { %v6361_v24 = vmul.f32 %v11150_v20, %v6359_v36 }
0x1d21   : > { %v6363_v56 = vsel %vm6362_vm0, %v6359_v36, %v6361_v24  ;;  %v9478_v36 = vld [vmem:[%s13767_s8 + $0x258] sm:$0xff] }
0x1d22   : > { %v6366_v21 = vsel %vm6364_vm2, %v6365_v54, %v6363_v56  ;;  %v9485_v54 = vcombine.high %v9475_v51, %v9477_v52  ;;  %v9487_v56 = vcombine.high %v9476_v53, %v9478_v36 }
0x1d23   : > { %v6367_v57 = vadd.f32 1e-06, %v6366_v21  ;;  %v9484_v21 = vcombine.low %v9475_v51, %v9477_v52 }
0x1d25   : > { %11151 = vrcp.f32 %v6367_v57  ;;  %v9486_v57 = vcombine.low %v9476_v53, %v9478_v36 }
0x1d32   : > { %v11152_v62 = vpop.eup %11151 }
0x1d33   : > { %v6376_v17 = vmul.f32 %v11152_v62, %v6375_v16  ;;  %v10950_v16 = vld [vmem:[%s13769_s10 + $0x9f8] sm:$0xff]  }
0x1d34   : > { %v10951_v62 = vld [vmem:[%s13769_s10 + $0x938] sm:$0xff]  }
0x1d35   : > { %v13030_v2 = vadd.f32 %v9387_v0, %v6376_v17  ;;  %v10952_v0 = vld [vmem:[%s13769_s10 + $0x9b8] sm:$0xff]   ;;  %v10953_v17 = vld [vmem:[%s13769_s10 + $0x970] sm:$0xff]  }
0x1d37   : > { %v6388_v5 = vsel %vm560_vm1, %v13030_v2, 0.0 }
0x1d38   : > { %6389 = vadd.xlane.f32.xlu0 %v6388_v5  ;;  %v10954_v5 = vld [vmem:[%s13769_s10 + $0x9f0] sm:$0xff]  }
0x1dc1   : > { %v6390_v6 = vpop.xlane.xlu0 %6389 }
0x1dc2   : > { %v6391_v8 = vmul.f32 0.03125, %v6390_v6  ;;  %v10955_v6 = vld [vmem:[%s13769_s10 + $0x930] sm:$0xff]  }
0x1dc4   : > { %v6392_v9 = vsub.f32 %v13030_v2, %v6391_v8  ;;  %v10956_v8 = vld [vmem:[%s13769_s10 + $0x9b0] sm:$0xff]  }
0x1dc6   : > { %v6393_v10 = vmul.f32 %v6392_v9, %v6392_v9  ;;  %v6413_v45 = vmul.f32 %v9390_v4, %v6392_v9  ;;  %v10957_v9 = vld [vmem:[%s13769_s10 + $0x968] sm:$0xff]  }
0x1dc8   : > { %v6394_v27 = vsel %vm560_vm1, %v6393_v10, 0.0  ;;  %v10958_v10 = vld [vmem:[%s13769_s10 + $0x9e8] sm:$0xff]  }
0x1dc9   : > { %6395 = vadd.xlane.f32.xlu1 %v6394_v27  ;;  %v10959_v27 = vld [vmem:[%s13769_s10 + $0x928] sm:$0xff]  }
0x1e52   : > { %v6396_v40 = vpop.xlane.xlu1 %6395 }
0x1e53   : > { %v6397_v11 = vmul.f32 0.032258064, %v6396_v40 }
0x1e55   : > { %11153 = vrsqrt.f32 %v6397_v11  ;;  %vm6400_vm3 = vcmp.eq.f32.partialorder %v6397_v11, inf  ;;  %v6403_v41 = vand.u32 2147483648, %v6397_v11  ;;  %vm6402_vm5 = vcmp.eq.f32.partialorder %v6397_v11, 0.0 }
0x1e62   : > { %v11154_v29 = vpop.eup %11153 }
0x1e63   : > { %v6399_v59 = vmul.f32 %v11154_v29, %v6397_v11 }
0x1e65   : > { %v6401_v42 = vsel %vm6400_vm3, %v6397_v11, %v6399_v59  ;;  %v9483_v59 = vld [vmem:[%s13768_s9 + $0x24] sm:$0xf] }
0x1e66   : > { %v6404_v43 = vsel %vm6402_vm5, %v6403_v41, %v6401_v42  ;;  %v6674_v4 = vrot.slane %v9483_v59, %v11797_v3  ;;  %v6670_v51 = vrot.slane %v9483_v59, %v11788_v61  ;;  %v6678_v52 = vrot.slane %v9483_v59, %v11791_v63 }
0x1e67   : > { %v6405_v44 = vadd.f32 1e-06, %v6404_v43  ;;  %v13214_v43 = vld [vmem:[%s13768_s9 + $0x20] sm:$0xf] }
0x1e69   : > { %11155 = vrcp.f32 %v6405_v44  ;;  %v6666_v44 = vrot.slane %v9483_v59, %v11536_v32  ;;  %v11000_v59 = vld [vmem:[%s13769_s10 + $0x898] sm:$0xff]  }
0x1e76   : > { %v11156_v48 = vpop.eup %11155 }
0x1e77   : > { %v6414_v50 = vmul.f32 %v11156_v48, %v6413_v45  ;;  %v6442_v45 = vrot.slane %v13214_v43, %v11788_v61  ;;  %v6450_v48 = vrot.slane %v13214_v43, %v11791_v63 }
0x1e79   : > { %v6421_v20 = vadd.f32 %v9391_v49, %v6414_v50 }
0x1e7b   : > { %v13090_v24 = vpack.c.bf16 %v6421_v20, %v6421_v20 }
0x1e7d   : > { %9409 = vmatmul.mubr.msk.bf16.vlgmr.msra.gmra.mxu1 %vm560_vm1, %v13090_v24  ;;  %9410 = vmatmul.mubr.msk.bf16.vlgmr.msra.gmra.mxu0 %vm560_vm1, %v13090_v24 }
0x1e7e   : > { %6736 = vmatpush1.bf16.msra.mxu1 %v9488_v37  ;;  %6777 = vmatpush1.bf16.msra.mxu0 %v9490_v38  ;;  %v10981_v37 = vld [vmem:[%s13769_s10 + $0x878] sm:$0xff]  }
0x1e7f   : > { %6737 = vmatprep.subr.bf16.mxu1 %v9485_v54  ;;  %6778 = vmatprep.subr.bf16.mxu0 %v9487_v56  ;;  %v10982_v38 = vld [vmem:[%s13769_s10 + $0x8f8] sm:$0xff]  }
0x1e80   : > { %6755 = vmatprep.mubr.bf16.mxu1 %v11321_v33  ;;  %6796 = vmatprep.mubr.bf16.mxu0 %v11321_v33 }
0x1e82   : > { %6738 = vmatpush1.bf16.msra.mxu1 %v9484_v21  ;;  %6779 = vmatpush1.bf16.msra.mxu0 %v9486_v57 }
0x1e83   : > { %10279 = vmatprep.subr.bf16.mxu1 %v10949_v58  ;;  %10301 = vmatprep.subr.bf16.mxu0 %v10950_v16 }
0x1e85   : > { %9492 = vmatmul.mubr.msk.bf16.vlgmr.msra.gmra.mxu1 %vm560_vm1, %v13090_v24  ;;  %9493 = vmatmul.mubr.msk.bf16.vlgmr.msra.gmra.mxu0 %vm560_vm1, %v13090_v24 }
0x1e86   : > { %10280 = vmatpush3.bf16.msra.mxu1 %v10951_v62  ;;  %10302 = vmatpush3.bf16.msra.mxu0 %v10952_v0 }
0x1e87   : > { %10281 = vmatprep.subr.bf16.mxu1 %v10953_v17  ;;  %10303 = vmatprep.subr.bf16.mxu0 %v10954_v5 }
0x1e8a   : > { %10282 = vmatpush3.bf16.msra.mxu1 %v10955_v6  ;;  %10304 = vmatpush3.bf16.msra.mxu0 %v10956_v8 }
0x1e8b   : > { %10283 = vmatprep.subr.bf16.mxu1 %v10957_v9  ;;  %10305 = vmatprep.subr.bf16.mxu0 %v10958_v10 }
0x1e8e   : > { %10284 = vmatpush3.bf16.msra.mxu1 %v10959_v27  ;;  %10306 = vmatpush3.bf16.msra.mxu0 %v10960_v12 }
0x1e8f   : > { %10285 = vmatprep.subr.bf16.mxu1 %v10961_v13  ;;  %10307 = vmatprep.subr.bf16.mxu0 %v10962_v31 }
0x1e92   : > { %10286 = vmatpush3.bf16.msra.mxu1 %v10963_v14  ;;  %10308 = vmatpush3.bf16.msra.mxu0 %v10964_v46  ;;  %v10983_v46 = vld [vmem:[%s13769_s10 + $0x838] sm:$0xff]  }
0x1e93   : > { %10287 = vmatprep.subr.bf16.mxu1 %v10965_v15  ;;  %10309 = vmatprep.subr.bf16.mxu0 %v10966_v7  ;;  %v10984_v15 = vld [vmem:[%s13769_s10 + $0x8b8] sm:$0xff]  }
0x1e96   : > { %10288 = vmatpush3.bf16.msra.mxu1 %v10967_v18  ;;  %10310 = vmatpush3.bf16.msra.mxu0 %v10968_v19  ;;  %v10985_v19 = vld [vmem:[%s13769_s10 + $0x870] sm:$0xff]  }
0x1e97   : > { %10289 = vmatprep.subr.bf16.mxu1 %v10969_v22  ;;  %10311 = vmatprep.subr.bf16.mxu0 %v10970_v60  ;;  %v10986_v22 = vld [vmem:[%s13769_s10 + $0x8f0] sm:$0xff]  }
0x1e9a   : > { %10290 = vmatpush3.bf16.msra.mxu1 %v10971_v23  ;;  %10312 = vmatpush3.bf16.msra.mxu0 %v10972_v55  ;;  %v10987_v55 = vld [vmem:[%s13769_s10 + $0x830] sm:$0xff]  }
0x1e9b   : > { %10291 = vmatprep.subr.bf16.mxu1 %v10973_v26  ;;  %10313 = vmatprep.subr.bf16.mxu0 %v10974_v28  ;;  %v10988_v26 = vld [vmem:[%s13769_s10 + $0x8b0] sm:$0xff]   ;;  %v10989_v28 = vld [vmem:[%s13769_s10 + $0x868] sm:$0xff]  }
0x1e9e   : > { %10292 = vmatpush3.bf16.msra.mxu1 %v10975_v30  ;;  %10314 = vmatpush3.bf16.msra.mxu0 %v10976_v1  ;;  %v10990_v30 = vld [vmem:[%s13769_s10 + $0x8e8] sm:$0xff]  }
0x1e9f   : > { %10293 = vmatprep.subr.bf16.mxu1 %v10977_v34  ;;  %10315 = vmatprep.subr.bf16.mxu0 %v10978_v35  ;;  %v10991_v1 = vld [vmem:[%s13769_s10 + $0x828] sm:$0xff]   ;;  %v10993_v35 = vld [vmem:[%s13769_s10 + $0x860] sm:$0xff]  }
0x1ea0   : > { %v10992_v34 = vld [vmem:[%s13769_s10 + $0x8a8] sm:$0xff]  }
0x1ea2   : > { %10294 = vmatpush3.bf16.msra.mxu1 %v10979_v47  ;;  %10316 = vmatpush3.bf16.msra.mxu0 %v10980_v25  ;;  %v10994_v47 = vld [vmem:[%s13769_s10 + $0x8e0] sm:$0xff]  }
0x1ea3   : > { %10323 = vmatprep.subr.bf16.mxu1 %v10981_v37  ;;  %10345 = vmatprep.subr.bf16.mxu0 %v10982_v38  ;;  %v10995_v25 = vld [vmem:[%s13769_s10 + $0x820] sm:$0xff]   ;;  %v10997_v38 = vld [vmem:[%s13769_s10 + $0x858] sm:$0xff]  }
0x1ea4   : > { %v10996_v37 = vld [vmem:[%s13769_s10 + $0x8a0] sm:$0xff]  }
0x1f3d   : > { %v13204_v39 = vpop.f32.mrf.mxu1  ;;  %v13206_v40 = vpop.f32.mrf.mxu0 }
0x1f3f   : > { %v6534_v11 = vpop.f32.mrf.mxu1  ;;  %v6575_v29 = vpop.f32.mrf.mxu0 }
0x1f40   : > { %v6535_v56 = vadd.f32 %v6534_v11, %v6442_v45  ;;  %v6576_v21 = vadd.f32 %v6575_v29, %v6450_v48  ;;  %v10998_v11 = vld [vmem:[%s13769_s10 + $0x8d8] sm:$0xff]   ;;  %v6438_v45 = vrot.slane %v13214_v43, %v11536_v32  ;;  %v6446_v48 = vrot.slane %v13214_v43, %v11797_v3  ;;  %v11008_v43 = vld [vmem:[%s13769_s10 + $0x888] sm:$0xff]  }
0x1f41   : > { %v6536_v41 = vpop.f32.mrf.mxu1  ;;  %v6577_v42 = vpop.f32.mrf.mxu0  ;;  %v10999_v29 = vld [vmem:[%s13769_s10 + $0x818] sm:$0xff]  }
0x1f42   : > { %v6581_v10 = vmax.f32 %v6535_v56, 0.0  ;;  %v6583_v27 = vmax.f32 %v6576_v21, 0.0  ;;  %v11001_v41 = vld [vmem:[%s13769_s10 + $0x850] sm:$0xff]   ;;  %v9629_v56 = vld [vmem:[%s13767_s8 + $0x2e8] sm:$0xff]  ;;  %v11011_v21 = vld [vmem:[%s13769_s10 + $0x800] sm:$0xff]  }
0x1f43   : > { %v6537_v49 = vpop.f32.mrf.mxu1  ;;  %v6578_v50 = vpop.f32.mrf.mxu0  ;;  %v11002_v42 = vld [vmem:[%s13769_s10 + $0x8d0] sm:$0xff]  }
0x1f44   : > { %v6585_v60 = vpack.c.bf16 %v6581_v10, %v6581_v10  ;;  %v6587_v23 = vpack.c.bf16 %v6583_v27, %v6583_v27  ;;  %v11005_v49 = vld [vmem:[%s13769_s10 + $0x848] sm:$0xff]  }
0x1f45   : > { %v6757_v53 = vpop.f32.mrf.mxu1  ;;  %v6798_v36 = vpop.f32.mrf.mxu0  ;;  %v11006_v50 = vld [vmem:[%s13769_s10 + $0x8c8] sm:$0xff]  }
0x1f46   : > { %v6758_v20 = vadd.f32 %v6757_v53, %v6666_v44  ;;  %v6799_v54 = vadd.f32 %v6798_v36, %v6674_v4  ;;  %v11003_v44 = vld [vmem:[%s13769_s10 + $0x810] sm:$0xff]   ;;  %v6574_v53 = vadd.f32 %v13206_v40, %v6446_v48  ;;  %v11009_v36 = vld [vmem:[%s13769_s10 + $0x840] sm:$0xff]   ;;  %v9627_v40 = vld [vmem:[%s13767_s8 + $0x2a8] sm:$0xff] }
0x1f47   : > { %v6759_v57 = vpop.f32.mrf.mxu1  ;;  %v6800_v58 = vpop.f32.mrf.mxu0  ;;  %v11004_v4 = vld [vmem:[%s13769_s10 + $0x890] sm:$0xff]   ;;  %v9637_v10 = vcombine.low %v9627_v40, %v9629_v56  ;;  %v11039_v48 = vld [vmem:[%s13769_s10 + $0xa08] sm:$0xff]  }
0x1f48   : > { %v6760_v16 = vadd.f32 %v6759_v57, %v6670_v51  ;;  %v6801_v62 = vadd.f32 %v6800_v58, %v6678_v52  ;;  %v6805_v0 = vmax.f32 %v6758_v20, 0.0  ;;  %v6807_v17 = vmax.f32 %v6799_v54, 0.0  ;;  %v11007_v51 = vld [vmem:[%s13769_s10 + $0x808] sm:$0xff]   ;;  %v11010_v20 = vld [vmem:[%s13769_s10 + $0x8c0] sm:$0xff]  }
0x1f49   : > { %v6761_v5 = vpop.f32.mrf.mxu1  ;;  %v6802_v6 = vpop.f32.mrf.mxu0  ;;  %v6533_v52 = vadd.f32 %v13204_v39, %v6438_v45  ;;  %v9626_v54 = vld [vmem:[%s13767_s8 + $0x2a0] sm:$0xff]  ;;  %v11038_v45 = vld [vmem:[%s13769_s10 + $0xac8] sm:$0xff]  }
0x1f4a   : > { %v6806_v8 = vmax.f32 %v6760_v16, 0.0  ;;  %v6808_v9 = vmax.f32 %v6801_v62, 0.0  ;;  %v6809_v7 = vpack.c.bf16 %v6805_v0, %v6805_v0  ;;  %v6811_v18 = vpack.c.bf16 %v6807_v17, %v6807_v17  ;;  %v9628_v39 = vld [vmem:[%s13767_s8 + $0x2e0] sm:$0xff]  ;;  %v9623_v6 = vld [vmem:[%s13767_s8 + $0x228] sm:$0xff] }
0x1f4b   : > { %v6762_v12 = vpop.f32.mrf.mxu1  ;;  %v6803_v13 = vpop.f32.mrf.mxu0  ;;  %v11012_v57 = vld [vmem:[%s13769_s10 + $0x880] sm:$0xff]   ;;  %v6580_v58 = vmax.f32 %v6533_v52, 0.0  ;;  %v6582_v16 = vmax.f32 %v6574_v53, 0.0  ;;  %v9636_v62 = vcombine.high %v9626_v54, %v9628_v39  ;;  %v9638_v0 = vcombine.high %v9627_v40, %v9629_v56  ;;  %v13449_v53 = vld [vmem:[%s13767_s8 + $0x2b0] sm:$0xff] }
0x1f4c   : > { %v6810_v31 = vpack.c.bf16 %v6806_v8, %v6806_v8  ;;  %v6812_v14 = vpack.c.bf16 %v6808_v9, %v6808_v9  ;;  %v9622_v17 = vld [vmem:[%s13767_s8 + $0x220] sm:$0xff]  ;;  %v9625_v8 = vld [vmem:[%s13767_s8 + $0x268] sm:$0xff]  ;;  %v9635_v9 = vcombine.low %v9626_v54, %v9628_v39  ;;  %v13466_v39 = vld [vmem:[%s13767_s8 + $0x2f8] sm:$0xff] }
0x1f4d   : > { %v9624_v5 = vld [vmem:[%s13767_s8 + $0x260] sm:$0xff]  ;;  %v6584_v12 = vpack.c.bf16 %v6580_v58, %v6580_v58  ;;  %v6586_v13 = vpack.c.bf16 %v6582_v16, %v6582_v16 }
0x1f4e   : > { %7101 = vmatprep.mubr.bf16.mxu1 %v6810_v31  ;;  %7141 = vmatprep.mubr.bf16.mxu0 %v6812_v14  ;;  %v9632_v27 = vcombine.high %v9622_v17, %v9624_v5  ;;  %v9634_v31 = vcombine.high %v9623_v6, %v9625_v8  ;;  %v9631_v14 = vcombine.low %v9622_v17, %v9624_v5  ;;  %v11044_v52 = vld [vmem:[%s13769_s10 + $0xa80] sm:$0xff]  }
0x1f4f   : > { %7102 = vmatmul.mubr.bf16.vlgmr.msra.gmra.mxu1 %v6809_v7  ;;  %7142 = vmatmul.mubr.bf16.vlgmr.msra.gmra.mxu0 %v6811_v18  ;;  %v11014_v7 = vld [vmem:[%s13769_s10 + $0xaf8] sm:$0xff]  }
0x1f50   : > { %10324 = vmatpush3.bf16.msra.mxu1 %v10983_v46  ;;  %10346 = vmatpush3.bf16.msra.mxu0 %v10984_v15  ;;  %v9633_v46 = vcombine.low %v9623_v6, %v9625_v8  ;;  %v11013_v15 = vld [vmem:[%s13769_s10 + $0xa78] sm:$0xff]  }
0x1f51   : > { %7373 = vmatprep.mubr.bf16.mxu1 %v6585_v60  ;;  %7413 = vmatprep.mubr.bf16.mxu0 %v6587_v23  ;;  %v11015_v18 = vld [vmem:[%s13769_s10 + $0xa38] sm:$0xff]   ;;  %v11018_v60 = vld [vmem:[%s13769_s10 + $0xaf0] sm:$0xff]  }
0x1f52   : > { %10325 = vmatprep.subr.bf16.mxu1 %v10985_v19  ;;  %10347 = vmatprep.subr.bf16.mxu0 %v10986_v22  ;;  %v11016_v19 = vld [vmem:[%s13769_s10 + $0xab8] sm:$0xff]   ;;  %v11017_v22 = vld [vmem:[%s13769_s10 + $0xa70] sm:$0xff]  }
0x1f53   : > { %v11019_v23 = vld [vmem:[%s13769_s10 + $0xa30] sm:$0xff]  }
0x1f54   : > { %10326 = vmatpush3.bf16.msra.mxu1 %v10987_v55  ;;  %10348 = vmatpush3.bf16.msra.mxu0 %v10988_v26  ;;  %v11020_v55 = vld [vmem:[%s13769_s10 + $0xab0] sm:$0xff]   ;;  %v11021_v26 = vld [vmem:[%s13769_s10 + $0xa68] sm:$0xff]  }
0x1f55   : > { %10327 = vmatprep.subr.bf16.mxu1 %v10989_v28  ;;  %10349 = vmatprep.subr.bf16.mxu0 %v10990_v30  ;;  %v11022_v28 = vld [vmem:[%s13769_s10 + $0xae8] sm:$0xff]  }
0x1f56   : > { %v11023_v30 = vld [vmem:[%s13769_s10 + $0xa28] sm:$0xff]  }
0x1f58   : > { %10328 = vmatpush3.bf16.msra.mxu1 %v10991_v1  ;;  %10350 = vmatpush3.bf16.msra.mxu0 %v10992_v34  ;;  %v11024_v1 = vld [vmem:[%s13769_s10 + $0xaa8] sm:$0xff]   ;;  %v11025_v34 = vld [vmem:[%s13769_s10 + $0xa60] sm:$0xff]  }
0x1f59   : > { %10329 = vmatprep.subr.bf16.mxu1 %v10993_v35  ;;  %10351 = vmatprep.subr.bf16.mxu0 %v10994_v47  ;;  %v11026_v35 = vld [vmem:[%s13769_s10 + $0xae0] sm:$0xff]  }
0x1f5a   : > { %v11027_v47 = vld [vmem:[%s13769_s10 + $0xa20] sm:$0xff]  }
0x1f5c   : > { %10330 = vmatpush3.bf16.msra.mxu1 %v10995_v25  ;;  %10352 = vmatpush3.bf16.msra.mxu0 %v10996_v37  ;;  %v11028_v25 = vld [vmem:[%s13769_s10 + $0xaa0] sm:$0xff]   ;;  %v11029_v37 = vld [vmem:[%s13769_s10 + $0xa58] sm:$0xff]  }
0x1f5d   : > { %10331 = vmatprep.subr.bf16.mxu1 %v10997_v38  ;;  %10353 = vmatprep.subr.bf16.mxu0 %v10998_v11  ;;  %v11030_v38 = vld [vmem:[%s13769_s10 + $0xad8] sm:$0xff]  }
0x1f5e   : > { %v11031_v11 = vld [vmem:[%s13769_s10 + $0xa18] sm:$0xff]  }
0x1f60   : > { %10332 = vmatpush3.bf16.msra.mxu1 %v10999_v29  ;;  %10354 = vmatpush3.bf16.msra.mxu0 %v11000_v59  ;;  %v11032_v29 = vld [vmem:[%s13769_s10 + $0xa98] sm:$0xff]   ;;  %v11033_v59 = vld [vmem:[%s13769_s10 + $0xa50] sm:$0xff]  }
0x1f61   : > { %10333 = vmatprep.subr.bf16.mxu1 %v11001_v41  ;;  %10355 = vmatprep.subr.bf16.mxu0 %v11002_v42  ;;  %v11034_v41 = vld [vmem:[%s13769_s10 + $0xad0] sm:$0xff]  }
0x1f62   : > { %v11035_v42 = vld [vmem:[%s13769_s10 + $0xa10] sm:$0xff]  }
0x1f64   : > { %10334 = vmatpush3.bf16.msra.mxu1 %v11003_v44  ;;  %10356 = vmatpush3.bf16.msra.mxu0 %v11004_v4  ;;  %v11036_v44 = vld [vmem:[%s13769_s10 + $0xa90] sm:$0xff]   ;;  %v11037_v4 = vld [vmem:[%s13769_s10 + $0xa48] sm:$0xff]  }
0x1f65   : > { %10335 = vmatprep.subr.bf16.mxu1 %v11005_v49  ;;  %10357 = vmatprep.subr.bf16.mxu0 %v11006_v50  ;;  %v11040_v49 = vld [vmem:[%s13769_s10 + $0xa88] sm:$0xff]   ;;  %v11041_v50 = vld [vmem:[%s13769_s10 + $0xa40] sm:$0xff]  }
0x1f68   : > { %10336 = vmatpush3.bf16.msra.mxu1 %v11007_v51  ;;  %10358 = vmatpush3.bf16.msra.mxu0 %v11008_v43  ;;  %v11042_v51 = vld [vmem:[%s13769_s10 + $0xac0] sm:$0xff]  }
0x1f69   : > { %10337 = vmatprep.subr.bf16.mxu1 %v11009_v36  ;;  %10359 = vmatprep.subr.bf16.mxu0 %v11010_v20  ;;  %v11043_v43 = vld [vmem:[%s13769_s10 + $0xa00] sm:$0xff]   ;;  %v13454_v36 = vld [vmem:[%s13767_s8 + $0x2f0] sm:$0xff]  ;;  %v13459_v20 = vld [vmem:[%s13767_s8 + $0x2b8] sm:$0xff] }
0x1f6a   : > { %v9751_v54 = vcombine.high %v13449_v53, %v13454_v36  ;;  %v9750_v40 = vcombine.low %v13449_v53, %v13454_v36  ;;  %v9752_v56 = vcombine.low %v13459_v20, %v13466_v39 }
0x1f6c   : > { %10338 = vmatpush3.bf16.msra.mxu1 %v11011_v21  ;;  %10360 = vmatpush3.bf16.msra.mxu0 %v11012_v57  ;;  %v9753_v21 = vcombine.high %v13459_v20, %v13466_v39 }
0x1f6d   : > { %7503 = vmatprep.subr.bf16.mxu1 %v9636_v62  ;;  %7544 = vmatprep.subr.bf16.mxu0 %v9638_v0 }
0x1f6f   : > { %7374 = vmatmul.mubr.bf16.vlgmr.msra.gmra.mxu1 %v6584_v12  ;;  %7414 = vmatmul.mubr.bf16.vlgmr.msra.gmra.mxu0 %v6586_v13 }
0x1f70   : > { %7504 = vmatpush1.bf16.msra.mxu1 %v9635_v9  ;;  %7545 = vmatpush1.bf16.msra.mxu0 %v9637_v10 }
0x1f71   : > { %7505 = vmatprep.subr.bf16.mxu1 %v9632_v27  ;;  %7546 = vmatprep.subr.bf16.mxu0 %v9634_v31 }
0x1f72   : > { %7523 = vmatprep.mubr.bf16.mxu1 %v11321_v33  ;;  %7564 = vmatprep.mubr.bf16.mxu0 %v11321_v33 }
0x1f74   : > { %7506 = vmatpush1.bf16.msra.mxu1 %v9631_v14  ;;  %7547 = vmatpush1.bf16.msra.mxu0 %v9633_v46  ;;  %v9630_v14 = vld [vmem:[%s13768_s9 + $0x28] sm:$0xf] }
0x1f75   : > { %10367 = vmatprep.subr.bf16.mxu1 %v11013_v15  ;;  %10389 = vmatprep.subr.bf16.mxu0 %v11014_v7 }
0x1f77   : > { %9639 = vmatmul.mubr.msk.bf16.vlgmr.msra.gmra.mxu1 %vm560_vm1, %v13090_v24  ;;  %9640 = vmatmul.mubr.msk.bf16.vlgmr.msra.gmra.mxu0 %vm560_vm1, %v13090_v24 }
0x1f78   : > { %10368 = vmatpush3.bf16.msra.mxu1 %v11015_v18  ;;  %10390 = vmatpush3.bf16.msra.mxu0 %v11016_v19 }
0x1f79   : > { %10369 = vmatprep.subr.bf16.mxu1 %v11017_v22  ;;  %10391 = vmatprep.subr.bf16.mxu0 %v11018_v60  ;;  %v7434_v22 = vrot.slane %v9630_v14, %v11536_v32  ;;  %v7442_v60 = vrot.slane %v9630_v14, %v11797_v3 }
0x1f7c   : > { %10370 = vmatpush3.bf16.msra.mxu1 %v11019_v23  ;;  %10392 = vmatpush3.bf16.msra.mxu0 %v11020_v55 }
0x1f7d   : > { %10371 = vmatprep.subr.bf16.mxu1 %v11021_v26  ;;  %10393 = vmatprep.subr.bf16.mxu0 %v11022_v28  ;;  %v7438_v28 = vrot.slane %v9630_v14, %v11788_v61 }
0x1f80   : > { %10372 = vmatpush3.bf16.msra.mxu1 %v11023_v30  ;;  %10394 = vmatpush3.bf16.msra.mxu0 %v11024_v1  ;;  %v7446_v30 = vrot.slane %v9630_v14, %v11791_v63  ;;  %v11063_v14 = vld [vmem:[%s13769_s10 + $0xb18] sm:$0xff]  }
0x1f81   : > { %10373 = vmatprep.subr.bf16.mxu1 %v11025_v34  ;;  %10395 = vmatprep.subr.bf16.mxu0 %v11026_v35 }
0x1f84   : > { %10374 = vmatpush3.bf16.msra.mxu1 %v11027_v47  ;;  %10396 = vmatpush3.bf16.msra.mxu0 %v11028_v25 }
0x1f85   : > { %10375 = vmatprep.subr.bf16.mxu1 %v11029_v37  ;;  %10397 = vmatprep.subr.bf16.mxu0 %v11030_v38 }
0x1f88   : > { %10376 = vmatpush3.bf16.msra.mxu1 %v11031_v11  ;;  %10398 = vmatpush3.bf16.msra.mxu0 %v11032_v29 }
0x1f89   : > { %10377 = vmatprep.subr.bf16.mxu1 %v11033_v59  ;;  %10399 = vmatprep.subr.bf16.mxu0 %v11034_v41 }
0x1f8c   : > { %10378 = vmatpush3.bf16.msra.mxu1 %v11035_v42  ;;  %10400 = vmatpush3.bf16.msra.mxu0 %v11036_v44  ;;  %v9737_v44 = vld [vmem:[%s13767_s8 + $0x230] sm:$0xff] }
0x1f8d   : > { %10379 = vmatprep.subr.bf16.mxu1 %v11037_v4  ;;  %10401 = vmatprep.subr.bf16.mxu0 %v11038_v45 }
0x1f90   : > { %10380 = vmatpush3.bf16.msra.mxu1 %v11039_v48  ;;  %10402 = vmatpush3.bf16.msra.mxu0 %v11040_v49  ;;  %v9739_v48 = vld [vmem:[%s13767_s8 + $0x270] sm:$0xff]  ;;  %v9738_v49 = vld [vmem:[%s13767_s8 + $0x238] sm:$0xff] }
0x1f91   : > { %10381 = vmatprep.subr.bf16.mxu1 %v11041_v50  ;;  %10403 = vmatprep.subr.bf16.mxu0 %v11042_v51  ;;  %v9740_v50 = vld [vmem:[%s13767_s8 + $0x278] sm:$0xff] }
0x1f92   : > { %v9749_v39 = vcombine.high %v9738_v49, %v9740_v50 }
0x1f94   : > { %10382 = vmatpush3.bf16.msra.mxu1 %v11043_v43  ;;  %10404 = vmatpush3.bf16.msra.mxu0 %v11044_v52 }
0x1f95   : > { %8000 = vmatprep.subr.bf16.mxu1 %v9751_v54  ;;  %8041 = vmatprep.subr.bf16.mxu0 %v9753_v21  ;;  %v9747_v54 = vcombine.high %v9737_v44, %v9739_v48  ;;  %v9746_v21 = vcombine.low %v9737_v44, %v9739_v48 }
0x200f   : > { %v10295_v57 = vpop.f32.mrf.mxu1  ;;  %v10317_v58 = vpop.f32.mrf.mxu0 }
0x2011   : > { %v10296_v16 = vpop.f32.mrf.mxu1  ;;  %v10318_v62 = vpop.f32.mrf.mxu0 }
0x2012   : > { %v10297_v0 = vadd.f32 %v10296_v16, %v10295_v57  ;;  %v10319_v17 = vadd.f32 %v10318_v62, %v10317_v58  ;;  %v9748_v57 = vcombine.low %v9738_v49, %v9740_v50  ;;  %v11045_v58 = vld [vmem:[%s13769_s10 + $0xb78] sm:$0xff]   ;;  %v11049_v62 = vld [vmem:[%s13769_s10 + $0xb70] sm:$0xff]  }
0x2013   : > { %v10298_v5 = vpop.f32.mrf.mxu1  ;;  %v10320_v6 = vpop.f32.mrf.mxu0  ;;  %v11046_v16 = vld [vmem:[%s13769_s10 + $0xbf8] sm:$0xff]  }
0x2014   : > { %v7144_v8 = vadd.f32 %v10319_v17, %v10297_v0  ;;  %v11051_v0 = vld [vmem:[%s13769_s10 + $0xb30] sm:$0xff]   ;;  %v11053_v5 = vld [vmem:[%s13769_s10 + $0xb68] sm:$0xff]  }
0x2015   : > { %v10299_v9 = vpop.f32.mrf.mxu1  ;;  %v10321_v10 = vpop.f32.mrf.mxu0  ;;  %v11052_v17 = vld [vmem:[%s13769_s10 + $0xbb0] sm:$0xff]   ;;  %v11055_v6 = vld [vmem:[%s13769_s10 + $0xb28] sm:$0xff]  }
0x2016   : > { %v11057_v9 = vld [vmem:[%s13769_s10 + $0xb60] sm:$0xff]  }
0x2017   : > { %v11058_v10 = vld [vmem:[%s13769_s10 + $0xbe0] sm:$0xff]  }
0x202f   : > { %v10339_v27 = vpop.f32.mrf.mxu1  ;;  %v10361_v12 = vpop.f32.mrf.mxu0 }
0x2031   : > { %v10340_v13 = vpop.f32.mrf.mxu1  ;;  %v10362_v31 = vpop.f32.mrf.mxu0 }
0x2032   : > { %v10341_v46 = vadd.f32 %v10340_v13, %v10339_v27  ;;  %v10363_v15 = vadd.f32 %v10362_v31, %v10361_v12  ;;  %v11059_v27 = vld [vmem:[%s13769_s10 + $0xb20] sm:$0xff]   ;;  %v11061_v13 = vld [vmem:[%s13769_s10 + $0xb58] sm:$0xff]  }
0x2033   : > { %v10342_v7 = vpop.f32.mrf.mxu1  ;;  %v10364_v18 = vpop.f32.mrf.mxu0  ;;  %v11060_v12 = vld [vmem:[%s13769_s10 + $0xba0] sm:$0xff]   ;;  %v11062_v31 = vld [vmem:[%s13769_s10 + $0xbd8] sm:$0xff]  }
0x2034   : > { %v7376_v19 = vadd.f32 %v10341_v46, %v7144_v8  ;;  %v11056_v8 = vld [vmem:[%s13769_s10 + $0xba8] sm:$0xff]   ;;  %v11064_v46 = vld [vmem:[%s13769_s10 + $0xb98] sm:$0xff]   ;;  %v11066_v7 = vld [vmem:[%s13769_s10 + $0xbd0] sm:$0xff]  }
0x2035   : > { %v10343_v23 = vpop.f32.mrf.mxu1  ;;  %v10365_v55 = vpop.f32.mrf.mxu0  ;;  %v11067_v18 = vld [vmem:[%s13769_s10 + $0xb10] sm:$0xff]  }
0x2036   : > { %v13479_v26 = vadd.f32 %v10363_v15, %v7376_v19  ;;  %v11065_v15 = vld [vmem:[%s13769_s10 + $0xb50] sm:$0xff]   ;;  %v11071_v23 = vld [vmem:[%s13769_s10 + $0xb08] sm:$0xff]  }
0x2037   : > { %v7525_v1 = vpop.f32.mrf.mxu1  ;;  %v7566_v34 = vpop.f32.mrf.mxu0  ;;  %v11068_v19 = vld [vmem:[%s13769_s10 + $0xb90] sm:$0xff]   ;;  %v11072_v55 = vld [vmem:[%s13769_s10 + $0xb88] sm:$0xff]  }
0x2038   : > { %v7526_v35 = vadd.f32 %v7525_v1, %v7434_v22  ;;  %v7567_v47 = vadd.f32 %v7566_v34, %v7442_v60  ;;  %v11069_v22 = vld [vmem:[%s13769_s10 + $0xb48] sm:$0xff]   ;;  %v11075_v1 = vld [vmem:[%s13769_s10 + $0xb00] sm:$0xff]  }
0x2039   : > { %v7527_v25 = vpop.f32.mrf.mxu1  ;;  %v7568_v37 = vpop.f32.mrf.mxu0  ;;  %v11070_v60 = vld [vmem:[%s13769_s10 + $0xbc8] sm:$0xff]   ;;  %v11076_v34 = vld [vmem:[%s13769_s10 + $0xb80] sm:$0xff]  }
0x203a   : > { %v7528_v38 = vadd.f32 %v7527_v25, %v7438_v28  ;;  %v7569_v11 = vadd.f32 %v7568_v37, %v7446_v30  ;;  %v7573_v29 = vmax.f32 %v7526_v35, 0.0  ;;  %v7575_v59 = vmax.f32 %v7567_v47, 0.0  ;;  %v11073_v28 = vld [vmem:[%s13769_s10 + $0xb40] sm:$0xff]  }
0x203b   : > { %v7529_v41 = vpop.f32.mrf.mxu1  ;;  %v7570_v42 = vpop.f32.mrf.mxu0  ;;  %v11074_v30 = vld [vmem:[%s13769_s10 + $0xbc0] sm:$0xff]  }
0x203c   : > { %v7574_v4 = vmax.f32 %v7528_v38, 0.0  ;;  %v7576_v45 = vmax.f32 %v7569_v11, 0.0  ;;  %v7577_v36 = vpack.c.bf16 %v7573_v29, %v7573_v29  ;;  %v7579_v20 = vpack.c.bf16 %v7575_v59, %v7575_v59  ;;  %v9745_v38 = vld [vmem:[%s13768_s9 + $0x2c] sm:$0xf] }
0x203d   : > { %v7530_v51 = vpop.f32.mrf.mxu1  ;;  %v7571_v43 = vpop.f32.mrf.mxu0  ;;  %v7931_v44 = vrot.slane %v9745_v38, %v11536_v32  ;;  %v7935_v50 = vrot.slane %v9745_v38, %v11788_v61 }
0x203e   : > { %v7578_v52 = vpack.c.bf16 %v7574_v4, %v7574_v4  ;;  %v7580_v53 = vpack.c.bf16 %v7576_v45, %v7576_v45  ;;  %v7939_v4 = vrot.slane %v9745_v38, %v11797_v3  ;;  %v7943_v51 = vrot.slane %v9745_v38, %v11791_v63 }
0x2040   : > { %7869 = vmatprep.mubr.bf16.mxu1 %v7578_v52  ;;  %7909 = vmatprep.mubr.bf16.mxu0 %v7580_v53 }
0x2041   : > { %7870 = vmatmul.mubr.bf16.vlgmr.msra.gmra.mxu1 %v7577_v36  ;;  %7910 = vmatmul.mubr.bf16.vlgmr.msra.gmra.mxu0 %v7579_v20 }
0x2042   : > { %8001 = vmatpush1.bf16.msra.mxu1 %v9750_v40  ;;  %8042 = vmatpush1.bf16.msra.mxu0 %v9752_v56  ;;  %v11047_v40 = vld [vmem:[%s13769_s10 + $0xb38] sm:$0xff]  }
0x2043   : > { %8002 = vmatprep.subr.bf16.mxu1 %v9747_v54  ;;  %8043 = vmatprep.subr.bf16.mxu0 %v9749_v39  ;;  %v11048_v56 = vld [vmem:[%s13769_s10 + $0xbb8] sm:$0xff]  }
0x2044   : > { %8020 = vmatprep.mubr.bf16.mxu1 %v11321_v33  ;;  %8061 = vmatprep.mubr.bf16.mxu0 %v11321_v33  ;;  %v11050_v33 = vld [vmem:[%s13769_s10 + $0xbf0] sm:$0xff]  }
0x2046   : > { %8003 = vmatpush1.bf16.msra.mxu1 %v9746_v21  ;;  %8044 = vmatpush1.bf16.msra.mxu0 %v9748_v57 }
0x2047   : > { %10411 = vmatprep.subr.bf16.mxu1 %v11045_v58  ;;  %10433 = vmatprep.subr.bf16.mxu0 %v11046_v16 }
0x2049   : > { %9754 = vmatmul.mubr.msk.bf16.vlgmr.msra.gmra.mxu1 %vm560_vm1, %v13090_v24  ;;  %9755 = vmatmul.mubr.msk.bf16.vlgmr.msra.gmra.mxu0 %vm560_vm1, %v13090_v24  ;;  %v11054_v24 = vld [vmem:[%s13769_s10 + $0xbe8] sm:$0xff]  }
0x204a   : > { %10412 = vmatpush3.bf16.msra.mxu1 %v11047_v40  ;;  %10434 = vmatpush3.bf16.msra.mxu0 %v11048_v56 }
0x204b   : > { %10413 = vmatprep.subr.bf16.mxu1 %v11049_v62  ;;  %10435 = vmatprep.subr.bf16.mxu0 %v11050_v33 }
0x204e   : > { %10414 = vmatpush3.bf16.msra.mxu1 %v11051_v0  ;;  %10436 = vmatpush3.bf16.msra.mxu0 %v11052_v17 }
0x204f   : > { %10415 = vmatprep.subr.bf16.mxu1 %v11053_v5  ;;  %10437 = vmatprep.subr.bf16.mxu0 %v11054_v24 }
0x2052   : > { %10416 = vmatpush3.bf16.msra.mxu1 %v11055_v6  ;;  %10438 = vmatpush3.bf16.msra.mxu0 %v11056_v8 }
0x2053   : > { %10417 = vmatprep.subr.bf16.mxu1 %v11057_v9  ;;  %10439 = vmatprep.subr.bf16.mxu0 %v11058_v10 }
0x2056   : > { %10418 = vmatpush3.bf16.msra.mxu1 %v11059_v27  ;;  %10440 = vmatpush3.bf16.msra.mxu0 %v11060_v12 }
0x2057   : > { %10419 = vmatprep.subr.bf16.mxu1 %v11061_v13  ;;  %10441 = vmatprep.subr.bf16.mxu0 %v11062_v31  ;;  %v9853_v31 = vld [vmem:[%s13770_s11 + $0x2] ss:$0 sm:$0xff] }
0x205a   : > { %10420 = vmatpush3.bf16.msra.mxu1 %v11063_v14  ;;  %10442 = vmatpush3.bf16.msra.mxu0 %v11064_v46 }
0x205b   : > { %10421 = vmatprep.subr.bf16.mxu1 %v11065_v15  ;;  %10443 = vmatprep.subr.bf16.mxu0 %v11066_v7 }
0x205e   : > { %10422 = vmatpush3.bf16.msra.mxu1 %v11067_v18  ;;  %10444 = vmatpush3.bf16.msra.mxu0 %v11068_v19 }
0x205f   : > { %10423 = vmatprep.subr.bf16.mxu1 %v11069_v22  ;;  %10445 = vmatprep.subr.bf16.mxu0 %v11070_v60 }
0x2062   : > { %10424 = vmatpush3.bf16.msra.mxu1 %v11071_v23  ;;  %10446 = vmatpush3.bf16.msra.mxu0 %v11072_v55 }
0x2063   : > { %10425 = vmatprep.subr.bf16.mxu1 %v11073_v28  ;;  %10447 = vmatprep.subr.bf16.mxu0 %v11074_v30 }
0x2066   : > { %10426 = vmatpush3.bf16.msra.mxu1 %v11075_v1  ;;  %10448 = vmatpush3.bf16.msra.mxu0 %v11076_v34 }
0x2101   : > { %v10383_v35 = vpop.f32.mrf.mxu1  ;;  %v10405_v47 = vpop.f32.mrf.mxu0 }
0x2103   : > { %v10384_v25 = vpop.f32.mrf.mxu1  ;;  %v10406_v37 = vpop.f32.mrf.mxu0 }
0x2104   : > { %v10385_v11 = vadd.f32 %v10384_v25, %v10383_v35  ;;  %v10407_v29 = vadd.f32 %v10406_v37, %v10405_v47 }
0x2105   : > { %v10386_v59 = vpop.f32.mrf.mxu1  ;;  %v10408_v41 = vpop.f32.mrf.mxu0 }
0x2106   : > { %v7912_v42 = vadd.f32 %v10407_v29, %v10385_v11 }
0x2107   : > { %v10387_v45 = vpop.f32.mrf.mxu1  ;;  %v10409_v48 = vpop.f32.mrf.mxu0 }
0x2108   : > { %v7917_v49 = vadd.f32 %v7912_v42, %v13479_v26 }
0x2109   : > { %v8022_v43 = vpop.f32.mrf.mxu1  ;;  %v8063_v52 = vpop.f32.mrf.mxu0 }
0x210a   : > { %v8023_v53 = vadd.f32 %v8022_v43, %v7931_v44  ;;  %v8064_v36 = vadd.f32 %v8063_v52, %v7939_v4 }
0x210b   : > { %v8024_v20 = vpop.f32.mrf.mxu1  ;;  %v8065_v54 = vpop.f32.mrf.mxu0 }
0x210c   : > { %v8025_v39 = vadd.f32 %v8024_v20, %v7935_v50  ;;  %v8066_v21 = vadd.f32 %v8065_v54, %v7943_v51  ;;  %v8070_v57 = vmax.f32 %v8023_v53, 0.0  ;;  %v8072_v32 = vmax.f32 %v8064_v36, 0.0 }
0x210d   : > { %v8026_v58 = vpop.f32.mrf.mxu1  ;;  %v8067_v3 = vpop.f32.mrf.mxu0 }
0x210e   : > { %v8071_v16 = vmax.f32 %v8025_v39, 0.0  ;;  %v8073_v40 = vmax.f32 %v8066_v21, 0.0  ;;  %v8074_v33 = vpack.c.bf16 %v8070_v57, %v8070_v57  ;;  %v8076_v63 = vpack.c.bf16 %v8072_v32, %v8072_v32 }
0x210f   : > { %v8027_v56 = vpop.f32.mrf.mxu1  ;;  %v8068_v26 = vpop.f32.mrf.mxu0 }
0x2110   : > { %v8075_v62 = vpack.c.bf16 %v8071_v16, %v8071_v16  ;;  %v8077_v61 = vpack.c.bf16 %v8073_v40, %v8073_v40 }
0x2112   : > { %8366 = vmatprep.mubr.bf16.mxu1 %v8075_v62  ;;  %8406 = vmatprep.mubr.bf16.mxu0 %v8077_v61 }
0x2113   : > { %8367 = vmatmul.mubr.bf16.vlgmr.msra.gmra.mxu1 %v8074_v33  ;;  %8407 = vmatmul.mubr.bf16.vlgmr.msra.gmra.mxu0 %v8076_v63 }
0x21d3   : > { %v10427_v0 = vpop.f32.mrf.mxu1  ;;  %v10449_v17 = vpop.f32.mrf.mxu0 }
0x21d5   : > { %v10428_v5 = vpop.f32.mrf.mxu1  ;;  %v10450_v24 = vpop.f32.mrf.mxu0 }
0x21d6   : > { %v10429_v6 = vadd.f32 %v10428_v5, %v10427_v0  ;;  %v10451_v8 = vadd.f32 %v10450_v24, %v10449_v17 }
0x21d7   : > { %v10430_v9 = vpop.f32.mrf.mxu1  ;;  %v10452_v10 = vpop.f32.mrf.mxu0 }
0x21d8   : > { %v8409_v27 = vadd.f32 %v10451_v8, %v10429_v6 }
0x21d9   : > { %v10431_v12 = vpop.f32.mrf.mxu1  ;;  %v10453_v13 = vpop.f32.mrf.mxu0 }
0x21da   : > { %v8414_v14 = vadd.f32 %v8409_v27, %v7917_v49 }
0x21dc   : > { %v8423_v46 = vadd.f32 %v9853_v31, %v8414_v14 }
0x21de   : > { %v8424_v15 = vadd.f32 %v8423_v46, %v13030_v2 }
0x21e0   : > { %v8425_v7 = vsel %vm560_vm1, %v8424_v15, 0.0 }
0x21e1   : > { %8426 = vadd.xlane.f32.xlu0 %v8425_v7 }
0x226a   : > { %v8427_v18 = vpop.xlane.xlu0 %8426 }
0x226b   : > { %v8428_v19 = vmul.f32 0.03125, %v8427_v18 }
0x226d   : > { %v13610_v22 = vsub.f32 %v8424_v15, %v8428_v19 }
0x226f   : > { %v8430_v60 = vmul.f32 %v13610_v22, %v13610_v22 }
0x2271   : > { %v8431_v23 = vsel %vm560_vm1, %v8430_v60, 0.0 }
0x2272   : > { %8432 = vadd.xlane.f32.xlu1 %v8431_v23 }
0x2273   : > { %11181 = shalt.err (!%p11178_p3)
}
0x2274   : > { %s11182_s30 = scalar_lea.hbm %s13623_s17, 512  ;;  %s11186_s29 = scalar_lea.hbm %s13835_s24, 1024 }
0x2275   : > { %p11183_p4 = scmp.ne.s32.totalorder %s13623_s17, %s11182_s30  ;;  %p11187_p9 = scmp.lt.s32.totalorder %s13623_s17, %s13835_s24 }
0x2276   : > { %p11188_p10 = scmp.lt.s32.totalorder %s11186_s29, %s11182_s30 }
0x2277   : > { %p11184_p7 = pnand %p11183_p4, %p11450_p5 }
0x2278   : > { %p11189_p11 = por %p11188_p10, %p11187_p9 }
0x2279   : > { %p11185_p8 = pneg %p11184_p7 }
0x227b   : > { %p11190_p12 = pnand %p11189_p11, %p11185_p8 }
0x227d   : > { %11193 = shalt.err (!%p11190_p12)
}
0x227e   : > { %s11326_s1 = smov 128   ;;  %s13836_s20 = sld [smem:[#allocation21_spill]] }
0x227f   : > { %10624 = dma.vmem_to_hbm [thread:$0]  (%p11450_p5), %s13626_s16, 512, %s13623_s17, %s13628_s13, %s11326_s1, %s11326_s1, %s13830_s19  }
0x2280   : > { %s13837_s15 = sld [smem:[#allocation26_spill]]  ;;  %s11327_s18 = smov [#allocation6]  }
0x2281   : > { %s11198_s29 = sshll.u32 %s11327_s18, 4  ;;  %s11199_s29 = int_to_ptr.vmem [resolvable:$false] %s11198_s29 }
0x2282   : > { %s11200_s12 = scalar_lea.vmem %s11199_s29, 1024 }
0x2284   : > { %s8506_s30 = sshll.u32 %s13836_s20, 4  ;;  %s8507_s30 = int_to_ptr.vmem [resolvable:$true] %s8506_s30 }
0x2285   : > { %s11194_s21 = scalar_lea.vmem %s8507_s30, 512  ;;  %p11201_p2 = scmp.lt.s32.totalorder %s8507_s30, %s11199_s29 }
0x2286   : > { %s13658_s27 = scalar_lea.hbm %s13837_s15, %s13617_s26  ;;  %p11195_p13 = scmp.ne.s32.totalorder %s8507_s30, %s11194_s21 }
0x2287   : > { %p11202_p3 = scmp.lt.s32.totalorder %s11200_s12, %s11194_s21 }
0x2288   : > { %p11196_p0 = pnand %p11195_p13, %p11450_p5 }
0x2289   : > { %p11203_p4 = por %p11202_p3, %p11201_p2 }
0x228a   : > { %p11197_p1 = pneg %p11196_p0 }
0x228c   : > { %p11204_p7 = pnand %p11203_p4, %p11197_p1 }
0x228e   : > { %11207 = shalt.err (!%p11204_p7)
}
0x228f   : > { %s11208_s17 = scalar_lea.hbm %s13658_s27, 512  ;;  %s11212_s20 = scalar_lea.hbm %s13837_s15, 1024 }
0x2290   : > { %p11209_p8 = scmp.ne.s32.totalorder %s13658_s27, %s11208_s17  ;;  %p11213_p11 = scmp.lt.s32.totalorder %s13658_s27, %s13837_s15 }
0x2291   : > { %p11214_p12 = scmp.lt.s32.totalorder %s11212_s20, %s11208_s17 }
0x2292   : > { %p11210_p9 = pnand %p11209_p8, %p11450_p5 }
0x2293   : > { %p11215_p13 = por %p11214_p12, %p11213_p11 }
0x2294   : > { %p11211_p10 = pneg %p11210_p9 }
0x2296   : > { %p11216_p0 = pnand %p11215_p13, %p11211_p10 }
0x2298   : > { %11219 = shalt.err (!%p11216_p0)
}
0x2299   : > { %s13838_s21 = sld [smem:[#allocation20_spill]]  ;;  %s8522_s17 = sshll.u32 %s12991_s25, 4  ;;  %s13688_s17 = int_to_ptr.vmem [resolvable:$true] %s8522_s17 }
0x229a   : > { %10625 = dma.vmem_to_hbm [thread:$0]  (%p11450_p5), %s8507_s30, 512, %s13658_s27, %s13628_s13, %s11326_s1, %s11326_s1, %s13830_s19  }
0x229b   : > { %s13839_s12 = sld [smem:[#allocation27_spill]]  ;;  %s11220_s20 = scalar_lea.vmem %s13688_s17, 512 }
0x229c   : > { %p11221_p1 = scmp.ne.s32.totalorder %s13688_s17, %s11220_s20  ;;  %s11328_s28 = smov [#allocation7]  }
0x229d   : > { %s11224_s14 = sshll.u32 %s11328_s28, 4  ;;  %s11225_s14 = int_to_ptr.vmem [resolvable:$false] %s11224_s14 }
0x229e   : > { %p11222_p2 = pnand %p11221_p1, %p11450_p5  ;;  %s11226_s13 = scalar_lea.vmem %s11225_s14, 1024 }
0x229f   : > { %s8464_s0 = scalar_lea.sflag [#allocation8], %s13838_s21  ;;  %p11227_p4 = scmp.lt.s32.totalorder %s13688_s17, %s11225_s14 }
0x22a0   : > { %p11223_p3 = pneg %p11222_p2  ;;  %p11228_p7 = scmp.lt.s32.totalorder %s11226_s13, %s11220_s20 }
0x22a1   : > { %s13685_s16 = scalar_lea.hbm %s13839_s12, %s13617_s26 }
0x22a2   : > { %p11229_p8 = por %p11228_p7, %p11227_p4 }
0x22a4   : > { %p11230_p9 = pnand %p11229_p8, %p11223_p3 }
0x22a6   : > { %11233 = shalt.err (!%p11230_p9)
}
0x22a7   : > { %s11234_s25 = scalar_lea.hbm %s13685_s16, 512  ;;  %s11238_s30 = scalar_lea.hbm %s13839_s12, 1024 }
0x22a8   : > { %p11235_p10 = scmp.ne.s32.totalorder %s13685_s16, %s11234_s25  ;;  %p11239_p13 = scmp.lt.s32.totalorder %s13685_s16, %s13839_s12 }
0x22a9   : > { %p11240_p0 = scmp.lt.s32.totalorder %s11238_s30, %s11234_s25 }
0x22aa   : > { %p11236_p11 = pnand %p11235_p10, %p11450_p5 }
0x22ab   : > { %p11241_p1 = por %p11240_p0, %p11239_p13 }
0x22ac   : > { %p11237_p12 = pneg %p11236_p11 }
0x22ae   : > { %p11242_p2 = pnand %p11241_p1, %p11237_p12 }
0x22b0   : > { %11245 = shalt.err (!%p11242_p2)
}
0x22b1   : > { %10626 = dma.vmem_to_hbm [thread:$0]  (%p11450_p5), %s13688_s17, 512, %s13685_s16, %s8464_s0, %s11326_s1, %s11326_s1, %s13830_s19  }
0x22b2   : > { %s8690_s20 = sshll.u32 %s13838_s21, 3  ;;  %v11166_v25 = vld [vmem:[%s13763_s4 + $0x2] ss:$0 sm:$0xff]  ;;  %s9858_s19 = sshll.u32 %s11431_s22, 7 }
0x22b3   : > { %v8444_v37 = vmul.f32 %v11166_v25, %v13610_v22  ;;  %s503_s1 = scalar_lea.vmem [#allocation2], %s8690_s20  ;;  %v11167_v29 = vld [vmem:[%s13764_s5 + $0x2] ss:$0 sm:$0xff]  ;;  %s13840_s26 = sld [smem:[#allocation24_spill]] }
0x22b4   : > { %s8477_s16 = sshll.u32 %s503_s1, 4  ;;  %s8449_s30 = scalar_lea.sflag [#allocation3], %s13838_s21  ;;  %s8478_s16 = int_to_ptr.vmem [resolvable:$true] %s8477_s16 }
0x22b5   : > { %s11246_s18 = scalar_lea.vmem %s8478_s16, 128  ;;  %s11329_s22 = smov [#allocation2]  }
0x22b6   : > { %p11247_p3 = scmp.ne.s32.totalorder %s8478_s16, %s11246_s18  ;;  %s11250_s29 = sshll.u32 %s11329_s22, 4  ;;  %s11251_s29 = int_to_ptr.vmem [resolvable:$false] %s11250_s29 }
0x22b7   : > { %s11252_s20 = scalar_lea.vmem %s11251_s29, 256  ;;  %p11253_p8 = scmp.lt.s32.totalorder %s8478_s16, %s11251_s29 }
0x22b8   : > { %p11248_p4 = pnand %p11247_p3, %p11450_p5  ;;  %p11254_p9 = scmp.lt.s32.totalorder %s11252_s20, %s11246_s18 }
0x22b9   : > { %s8475_s27 = scalar_lea.hbm %s13840_s26, %s9858_s19 }
0x22ba   : > { %p11249_p7 = pneg %p11248_p4  ;;  %p11255_p10 = por %p11254_p9, %p11253_p8 }
0x22bc   : > { %p11256_p11 = pnand %p11255_p10, %p11249_p7 }
0x22fb   : > { %v8433_v2 = vpop.xlane.xlu1 %8432 }
0x22fc   : > { %v8434_v55 = vmul.f32 0.032258064, %v8433_v2 }
0x22fe   : > { %11157 = vrsqrt.f32 %v8434_v55  ;;  %vm8437_vm6 = vcmp.eq.f32.partialorder %v8434_v55, inf  ;;  %v8440_v1 = vand.u32 2147483648, %v8434_v55  ;;  %vm8439_vm7 = vcmp.eq.f32.partialorder %v8434_v55, 0.0 }
0x230b   : > { %v11158_v28 = vpop.eup %11157 }
0x230c   : > { %v8436_v30 = vmul.f32 %v11158_v28, %v8434_v55 }
0x230e   : > { %v8438_v34 = vsel %vm8437_vm6, %v8434_v55, %v8436_v30 }
0x230f   : > { %v8441_v35 = vsel %vm8439_vm7, %v8440_v1, %v8438_v34 }
0x2310   : > { %v8442_v47 = vadd.f32 1e-06, %v8441_v35 }
0x2312   : > { %11159 = vrcp.f32 %v8442_v47 }
0x231f   : > { %v11160_v38 = vpop.eup %11159 }
0x2320   : > { %v8445_v11 = vmul.f32 %v11160_v38, %v8444_v37 }
0x2322   : > { %v8446_v59 = vadd.f32 %v11167_v29, %v8445_v11 }
0x2324   : > { %8447 = vst.msk [vmem:[%s503_s1] sm:$0xff] %vm560_vm1, %v8446_v59 }
0x2325   : > { %11259 = shalt.err (!%p11256_p11)
}
0x2326   : > { %s11260_s28 = scalar_lea.hbm %s8475_s27, 128  ;;  %s11264_s19 = scalar_lea.hbm %s13840_s26, 256 }
0x2327   : > { %p11261_p12 = scmp.ne.s32.totalorder %s8475_s27, %s11260_s28  ;;  %p11265_p1 = scmp.lt.s32.totalorder %s8475_s27, %s13840_s26 }
0x2328   : > { %p11266_p2 = scmp.lt.s32.totalorder %s11264_s19, %s11260_s28 }
0x2329   : > { %p11262_p13 = pnand %p11261_p12, %p11450_p5 }
0x232a   : > { %p11267_p3 = por %p11266_p2, %p11265_p1 }
0x232b   : > { %p11263_p0 = pneg %p11262_p13 }
0x232d   : > { %p11268_p4 = pnand %p11267_p3, %p11263_p0 }
0x232f   : > { %11271 = shalt.err (!%p11268_p4)
}
0x2330   : > { %10623 = dma.vmem_to_hbm [thread:$0]  (%p11450_p5), %s8478_s16, 128, %s8475_s27, %s8449_s30  }
0x2331 PF: > { %s13841_s0 = sld [smem:[#allocation15_spill]] }
0x2332   : > { %s13842_s13 = sld [smem:[#allocation12_spill]] }
0x2337   : > { %p10644_p7 = scmp.ge.s32.totalorder %s13841_s0, 2 }
0x2338   : > { %s8537_s18 = sand.u32 1, %s13842_s13  }
0x2339   : > { %p10632_p8 = pnand %p10644_p7, %p11454_p6  ;;  %s8538_s22 = scalar_lea.sflag [#allocation3], %s8537_s18 }
0x233b   : > { %p10633_p9 = pneg %p10632_p8 }
0x233d   : > { %11289 = dma.done.wait (%p10633_p9), %s8538_s22, 128  }
0x233e   : > { %11291 = vsyncadd (%p10633_p9), %s8538_s22, 4294967168  ;;  %s13844_s29 = sadd.s32 4294967294, %s13841_s0  }
0x233f   : > { %s8546_s20 = sand.u32 1, %s13844_s29  }
0x2340   : > { %s8547_s28 = scalar_lea.sflag [#allocation5], %s8546_s20 }
0x2341   : > { %11293 = dma.done.wait (%p10633_p9), %s8547_s28, 1024  }
0x2342   : > { %11295 = vsyncadd (%p10633_p9), %s8547_s28, 4294966272  ;;  %s8565_s23 = scalar_lea.sflag [#allocation8], %s8537_s18 }
0x2343   : > { %11297 = dma.done.wait (%p10633_p9), %s8565_s23, 512  }
0x2344   : > { %11299 = vsyncadd (%p10633_p9), %s8565_s23, 4294966784  ;;  %s13845_s21 = sld [smem:[#allocation16_spill]] }
0x2345   : > { %s13846_s18 = sld [smem:[#allocation13_spill]] }
0x2346   : > { %s13847_s19 = sld [smem:[#allocation14_spill]] }
0x2347   : > { %s13848_s20 = sld [smem:[#allocation17_spill]] }
0x234a   : > { %p32_p5 = scmp.ge.s32.totalorder %s13845_s21, 4  }
0x234c   :  { %34 = sbr.rel (!%p32_p5) target bundleno = 14 (0xe), region = 175 }
0x2351   :  { %8570 = vsyncpa [#allocation3], 1 }
0x2352   :  { %8572 = vsyncpa [#allocation3 + $0x1], 1 }
0x2353   :  { %8573 = vsyncpa [#allocation5], 1 }
0x2354   :  { %8575 = vsyncpa [#allocation5 + $0x1], 1 }
0x2355   :  { %8576 = vsyncpa [#allocation8], 1 }
0x2356   :  { %8578 = vsyncpa [#allocation8 + $0x1], 1 }

</bundles_post_ra>
